<compile_context>
chip_gen: v6e
topology: v6e:2x2x1
jax: 0.10.0
libtpu: 0.0.40
codegen_flags: <defaults>
</compile_context>

<pallas_src>
import functools

import jax
import jax.numpy as jnp
from jax import lax
from jax.experimental import pallas as pl
from jax.experimental.pallas import tpu as pltpu

BN_EPS = 1e-5


def _bn_rows(x, gamma, beta, inv_r):
    """Training-mode BatchNorm1d over the row (= lane) axis, channels-first.

    One-pass sum / sum-of-squares (biased variance); the affine is folded into
    a single per-channel scale/shift so the slab sees only mul + add; rsqrt
    goes to the EUP slot.
    """
    s = jnp.sum(x, axis=1, keepdims=True)          # (C, 1)
    ss = jnp.sum(x * x, axis=1, keepdims=True)     # (C, 1)
    mu = s * inv_r
    var = ss * inv_r - mu * mu                     # biased variance
    scale = lax.rsqrt(var + BN_EPS) * gamma        # (C, 1)
    shift = beta - mu * scale                      # (C, 1)
    return x * scale + shift


def criticnet_kernel(n_blocks, inv_r,
                     x_ref, c_ref,
                     convp_wx_ref, convp_wc_ref, convp_b_ref,
                     bn0_g_ref, bn0_b_ref, bn1_g_ref, bn1_b_ref,
                     fc0_w_ref, fc0_b_ref, fc1_w_ref, fc1_b_ref,
                     fcc_wx_ref, fcc_wc_ref, fcc_b_ref,
                     bnout_g_ref, bnout_b_ref,
                     convout_w_ref, convout_b_ref,
                     out_ref,
                     net_ref, work_ref):
    x = x_ref[...]            # (D, R)  channels-first coordinates, f32
    c_row = c_ref[...]        # (1, R)  sigma broadcast over points, f32

    def cond_mac(wx, wc, b):
        # W @ [x; c] + b for a K = D+1 (= 4) contraction, done as VPU
        # broadcast-MACs so the MXU pipeline is never started for a 3-deep
        # contraction.  wx: (C_out, D), wc/b: (C_out, 1).
        acc = wc * c_row + b
        for k in range(x.shape[0]):
            acc = acc + wx[:, k:k + 1] * x[k:k + 1, :]
        return acc                                        # (C_out, R) f32

    # net = ReLU(conv_p(c_xyz))
    net_ref[...] = jnp.maximum(
        cond_mac(convp_wx_ref[...], convp_wc_ref[...], convp_b_ref[...]), 0.0)

    # n_blocks is a Python int -> unrolled at trace time.  net / h / d are kept
    # in two VMEM scratch slabs so the unrolled loop does not grow the live
    # activation set beyond net + work + current-iteration temporaries.
    for i in range(n_blocks):
        # h = fc_0(ReLU(bn_0(net)))   — bf16 MXU operands, f32 accumulation
        h = jnp.maximum(_bn_rows(net_ref[...], bn0_g_ref[i], bn0_b_ref[i],
                                 inv_r), 0.0)
        work_ref[...] = (
            jnp.dot(fc0_w_ref[i], h.astype(jnp.bfloat16),
                    preferred_element_type=jnp.float32) + fc0_b_ref[i])

        # dx = fc_1(ReLU(bn_1(h)))
        d = jnp.maximum(_bn_rows(work_ref[...], bn1_g_ref[i], bn1_b_ref[i],
                                 inv_r), 0.0)
        work_ref[...] = (
            jnp.dot(fc1_w_ref[i], d.astype(jnp.bfloat16),
                    preferred_element_type=jnp.float32) + fc1_b_ref[i])

        # Per-block conditioning term fc_c(c_xyz), no hoisted (n_blocks*H, R)
        # slab; shortcut is identity (in_dim == out_dim == hidden).
        cond = cond_mac(fcc_wx_ref[i], fcc_wc_ref[i], fcc_b_ref[i])
        net_ref[...] = net_ref[...] + work_ref[...] + cond

    # out = conv_out(ReLU(bn_out(net)))
    o = jnp.maximum(_bn_rows(net_ref[...], bnout_g_ref[...], bnout_b_ref[...],
                             inv_r), 0.0)
    o = (jnp.dot(convout_w_ref[...], o.astype(jnp.bfloat16),
                 preferred_element_type=jnp.float32) + convout_b_ref[...])
    out_ref[...] = o.astype(out_ref.dtype)                 # (D, R) lane-dense


def init_params(key, in_dim=3, hidden=32, n_blocks=5):
    """Weights stored PyTorch-style: Conv1d weight -> (out, in), bias -> (out, 1)."""
    c_dim = in_dim + 1
    ks = iter(jax.random.split(key, 32))

    def w(shape, scale=0.1):
        return jax.random.normal(next(ks), shape, jnp.float32) * scale

    return dict(
        convp_w=w((hidden, c_dim)),
        convp_b=w((hidden, 1)),
        bn0_g=1.0 + w((n_blocks, hidden, 1)),
        bn0_b=w((n_blocks, hidden, 1)),
        bn1_g=1.0 + w((n_blocks, hidden, 1)),
        bn1_b=w((n_blocks, hidden, 1)),
        fc0_w=w((n_blocks, hidden, hidden)),
        fc0_b=w((n_blocks, hidden, 1)),
        fc1_w=w((n_blocks, hidden, hidden)),
        fc1_b=w((n_blocks, hidden, 1)),
        fcc_w=w((n_blocks, hidden, c_dim)),
        fcc_b=w((n_blocks, hidden, 1)),
        bnout_g=1.0 + w((hidden, 1)),
        bnout_b=w((hidden, 1)),
        convout_w=w((in_dim, hidden)),
        convout_b=w((in_dim, 1)),
    )


def criticnet_forward(x, c, params, n_blocks):
    """x: (B, N, in_dim) float32, c: (B, 1) float32 -> (B, N, in_dim)."""
    B, N, D = x.shape
    R = B * N
    H = params["convp_w"].shape[0]
    c_dim = D + 1

    # Channels-first staging: rows (batch*points) on the 128-lane axis.
    x_cf = jnp.transpose(x, (2, 0, 1)).reshape(D, R)                   # (D, R)
    c_row = jnp.broadcast_to(c.reshape(B, 1), (B, N)).reshape(1, R)    # (1, R)

    # Pre-split the c_xyz-consuming weights so the kernel never builds the
    # concatenated (c_dim, R) slab:  W @ [x; c] = W[:, :D] @ x + W[:, D:] * c.
    convp_wx = params["convp_w"][:, :D]          # (H, D)
    convp_wc = params["convp_w"][:, D:]          # (H, 1)
    fcc_wx = params["fcc_w"][:, :, :D]           # (n_blocks, H, D)
    fcc_wc = params["fcc_w"][:, :, D:]           # (n_blocks, H, 1)

    # bf16 operands for the MXU matmuls; biases / BN params stay f32.
    fc0_w = params["fc0_w"].astype(jnp.bfloat16)
    fc1_w = params["fc1_w"].astype(jnp.bfloat16)
    convout_w = params["convout_w"].astype(jnp.bfloat16)

    inputs = [
        x_cf, c_row,
        convp_wx, convp_wc, params["convp_b"],
        params["bn0_g"], params["bn0_b"], params["bn1_g"], params["bn1_b"],
        fc0_w, params["fc0_b"], fc1_w, params["fc1_b"],
        fcc_wx, fcc_wc, params["fcc_b"],
        params["bnout_g"], params["bnout_b"],
        convout_w, params["convout_b"],
    ]

    vmem_spec = pl.BlockSpec(memory_space=pltpu.MemorySpace.VMEM)

    # VMEM budget from the lane-padded slab footprint (cc_all slab removed:
    # resident activations are x, c, out, net, work + a few temporaries).
    r_pad = -(-R // 128) * 128

    def slab_bytes(ch, itemsize=4):
        return (-(-ch // 8) * 8) * r_pad * itemsize

    act_bytes = 3 * slab_bytes(D) + slab_bytes(1) + 8 * slab_bytes(H)
    param_bytes = int(sum(int(a.size) * a.dtype.itemsize for a in inputs[2:]))

    # Per-generation VMEM ceiling with headroom for compiler scratch:
    # ~56 MiB on v7x (64 MiB phys), ~112 MiB on v5e/v6e (128 MiB phys).
    try:
        vmem_cap = int(pltpu.get_tpu_info().vmem_capacity_bytes)
    except Exception:
        vmem_cap = 64 << 20
    vmem_ceiling = vmem_cap - max(8 << 20, vmem_cap // 8)
    vmem_limit = int(min(max(act_bytes + 2 * param_bytes + (4 << 20), 32 << 20),
                         vmem_ceiling))

    flops = 2 * R * (H * c_dim + n_blocks * (H * c_dim + 2 * H * H) + D * H)
    cost = pl.CostEstimate(
        flops=flops,
        transcendentals=(2 * n_blocks + 1) * H,
        bytes_accessed=int(4 * R * (2 * D + 1)) + param_bytes,
    )

    # TODO(synk): v7x dual-TensorCore split (core_map + cross-core BN-stat
    # exchange via VMEM_SHARED/CMEM + core_barrier) — the grid-less call runs
    # on a single TC, capping v7x at ~50% of per-chip compute.
    # TODO(synk): large-R fallback — segment the network at BN boundaries with
    # a row-tiled grid and per-channel sum/sumsq accumulators (init/finalize
    # via pl.when) once B*N exceeds VMEM residency; grid-less is used here
    # since the whole problem fits comfortably in VMEM.
    out_cf = pl.pallas_call(
        functools.partial(criticnet_kernel, n_blocks, 1.0 / R),
        out_shape=jax.ShapeDtypeStruct((D, R), jnp.float32),
        in_specs=[vmem_spec] * len(inputs),
        out_specs=vmem_spec,
        scratch_shapes=[pltpu.VMEM((H, R), jnp.float32),   # net
                        pltpu.VMEM((H, R), jnp.float32)],  # h / d work slab
        compiler_params=pltpu.CompilerParams(vmem_limit_bytes=vmem_limit),
        cost_estimate=cost,
    )(*inputs)

    return out_cf.reshape(D, B, N).transpose(1, 2, 0)                  # (B, N, D)


def criticnet_reference(x, c, params, n_blocks):
    """Pure-JAX reference with exact PyTorch math (f32, two-pass biased-var BN,
    un-split conv weights) for a correctness check."""
    B, N, D = x.shape
    xcf = jnp.transpose(x, (2, 0, 1)).reshape(D, B * N)
    crow = jnp.broadcast_to(c.reshape(B, 1), (B, N)).reshape(1, B * N)
    cxyz = jnp.concatenate([xcf, crow], axis=0)                        # (c_dim, R)

    def bn(v, g, b):
        mu = jnp.mean(v, axis=1, keepdims=True)
        var = jnp.mean((v - mu) ** 2, axis=1, keepdims=True)
        return (v - mu) * lax.rsqrt(var + BN_EPS) * g + b

    net = jnp.maximum(params["convp_w"] @ cxyz + params["convp_b"], 0.0)
    for i in range(n_blocks):
        h = jnp.maximum(bn(net, params["bn0_g"][i], params["bn0_b"][i]), 0.0)
        h = params["fc0_w"][i] @ h + params["fc0_b"][i]
        d = jnp.maximum(bn(h, params["bn1_g"][i], params["bn1_b"][i]), 0.0)
        d = params["fc1_w"][i] @ d + params["fc1_b"][i]
        cc = params["fcc_w"][i] @ cxyz + params["fcc_b"][i]
        net = net + d + cc
    o = jnp.maximum(bn(net, params["bnout_g"], params["bnout_b"]), 0.0)
    o = params["convout_w"] @ o + params["convout_b"]
    return o.reshape(D, B, N).transpose(1, 2, 0)


if __name__ == "__main__":
    B, N, IN_DIM, HIDDEN, N_BLOCKS = 2, 64, 3, 32, 5

    key = jax.random.PRNGKey(0)
    kx, kc, kp = jax.random.split(key, 3)
    x = jax.random.normal(kx, (B, N, IN_DIM), jnp.float32)
    c = jax.random.normal(kc, (B, 1), jnp.float32)
    params = init_params(kp, IN_DIM, HIDDEN, N_BLOCKS)

    out = criticnet_forward(x, c, params, N_BLOCKS)
    out = jax.block_until_ready(out)
    assert out.shape == (B, N, IN_DIM), out.shape

    ref = jax.block_until_ready(criticnet_reference(x, c, params, N_BLOCKS))
    # Tolerance reflects bf16 MXU operands (f32 accumulation / BN / residuals);
    # observed error is well under this bound.
    assert jnp.allclose(out, ref, rtol=2e-2, atol=2e-2), \
        float(jnp.max(jnp.abs(out - ref)))

    print("KERNEL_OK")
</pallas_src>

<mosaic_0001>
module attributes {stable_mosaic.version = 11 : i64} {
  func.func @criticnet_kernel(%arg0: memref<3x128xf32, #tpu.memory_space<vmem>>, %arg1: memref<1x128xf32, #tpu.memory_space<vmem>>, %arg2: memref<32x3xf32, #tpu.memory_space<vmem>>, %arg3: memref<32x1xf32, #tpu.memory_space<vmem>>, %arg4: memref<32x1xf32, #tpu.memory_space<vmem>>, %arg5: memref<5x32x1xf32, #tpu.memory_space<vmem>>, %arg6: memref<5x32x1xf32, #tpu.memory_space<vmem>>, %arg7: memref<5x32x1xf32, #tpu.memory_space<vmem>>, %arg8: memref<5x32x1xf32, #tpu.memory_space<vmem>>, %arg9: memref<5x32x32xbf16, #tpu.memory_space<vmem>>, %arg10: memref<5x32x1xf32, #tpu.memory_space<vmem>>, %arg11: memref<5x32x32xbf16, #tpu.memory_space<vmem>>, %arg12: memref<5x32x1xf32, #tpu.memory_space<vmem>>, %arg13: memref<5x32x3xf32, #tpu.memory_space<vmem>>, %arg14: memref<5x32x1xf32, #tpu.memory_space<vmem>>, %arg15: memref<5x32x1xf32, #tpu.memory_space<vmem>>, %arg16: memref<32x1xf32, #tpu.memory_space<vmem>>, %arg17: memref<32x1xf32, #tpu.memory_space<vmem>>, %arg18: memref<3x32xbf16, #tpu.memory_space<vmem>>, %arg19: memref<3x1xf32, #tpu.memory_space<vmem>>, %arg20: memref<3x128xf32, #tpu.memory_space<vmem>>, %arg21: memref<32x128xf32, #tpu.memory_space<vmem>>, %arg22: memref<32x128xf32, #tpu.memory_space<vmem>>) attributes {dimension_semantics = [], scalar_prefetch = 0 : i64, scratch_operands = 2 : i64, tpu.core_type = #tpu.core_type<tc>} {
    %c0 = arith.constant 0 : index
    %c0_0 = arith.constant 0 : index
    %0 = vector.load %arg0[%c0, %c0_0] : memref<3x128xf32, #tpu.memory_space<vmem>>, vector<3x128xf32>
    %c0_1 = arith.constant 0 : index
    %c0_2 = arith.constant 0 : index
    %1 = vector.load %arg1[%c0_1, %c0_2] : memref<1x128xf32, #tpu.memory_space<vmem>>, vector<1x128xf32>
    %c0_3 = arith.constant 0 : index
    %c0_4 = arith.constant 0 : index
    %2 = vector.load %arg2[%c0_3, %c0_4] : memref<32x3xf32, #tpu.memory_space<vmem>>, vector<32x3xf32>
    %c0_5 = arith.constant 0 : index
    %c0_6 = arith.constant 0 : index
    %3 = vector.load %arg3[%c0_5, %c0_6] : memref<32x1xf32, #tpu.memory_space<vmem>>, vector<32x1xf32>
    %c0_7 = arith.constant 0 : index
    %c0_8 = arith.constant 0 : index
    %4 = vector.load %arg4[%c0_7, %c0_8] : memref<32x1xf32, #tpu.memory_space<vmem>>, vector<32x1xf32>
    %5 = vector.broadcast %3 : vector<32x1xf32> to vector<32x128xf32>
    %6 = vector.broadcast %1 : vector<1x128xf32> to vector<32x128xf32>
    %7 = arith.mulf %5, %6 : vector<32x128xf32>
    %8 = vector.broadcast %4 : vector<32x1xf32> to vector<32x128xf32>
    %9 = arith.addf %7, %8 : vector<32x128xf32>
    %10 = vector.extract_strided_slice %2 {offsets = [0, 0], sizes = [32, 1], strides = [1, 1]} : vector<32x3xf32> to vector<32x1xf32>
    %11 = vector.extract_strided_slice %0 {offsets = [0, 0], sizes = [1, 128], strides = [1, 1]} : vector<3x128xf32> to vector<1x128xf32>
    %12 = vector.broadcast %10 : vector<32x1xf32> to vector<32x128xf32>
    %13 = vector.broadcast %11 : vector<1x128xf32> to vector<32x128xf32>
    %14 = arith.mulf %12, %13 : vector<32x128xf32>
    %15 = arith.addf %9, %14 : vector<32x128xf32>
    %16 = vector.extract_strided_slice %2 {offsets = [0, 1], sizes = [32, 1], strides = [1, 1]} : vector<32x3xf32> to vector<32x1xf32>
    %17 = vector.extract_strided_slice %0 {offsets = [1, 0], sizes = [1, 128], strides = [1, 1]} : vector<3x128xf32> to vector<1x128xf32>
    %18 = vector.broadcast %16 : vector<32x1xf32> to vector<32x128xf32>
    %19 = vector.broadcast %17 : vector<1x128xf32> to vector<32x128xf32>
    %20 = arith.mulf %18, %19 : vector<32x128xf32>
    %21 = arith.addf %15, %20 : vector<32x128xf32>
    %22 = vector.extract_strided_slice %2 {offsets = [0, 2], sizes = [32, 1], strides = [1, 1]} : vector<32x3xf32> to vector<32x1xf32>
    %23 = vector.extract_strided_slice %0 {offsets = [2, 0], sizes = [1, 128], strides = [1, 1]} : vector<3x128xf32> to vector<1x128xf32>
    %24 = vector.broadcast %22 : vector<32x1xf32> to vector<32x128xf32>
    %25 = vector.broadcast %23 : vector<1x128xf32> to vector<32x128xf32>
    %26 = arith.mulf %24, %25 : vector<32x128xf32>
    %27 = arith.addf %21, %26 : vector<32x128xf32>
    %cst = arith.constant 0.000000e+00 : f32
    %28 = vector.broadcast %cst : f32 to vector<32x128xf32>
    %29 = arith.maximumf %27, %28 : vector<32x128xf32>
    %c0_9 = arith.constant 0 : index
    %c0_10 = arith.constant 0 : index
    %30 = vector.load %arg21[%c0_9, %c0_10] : memref<32x128xf32, #tpu.memory_space<vmem>>, vector<32x128xf32>
    tpu.vector_store %arg21[%c0_9, %c0_10], %29 {strides = array<i32>} : memref<32x128xf32, #tpu.memory_space<vmem>>, vector<32x128xf32>,
    %c0_11 = arith.constant 0 : index
    %c0_12 = arith.constant 0 : index
    %31 = vector.load %arg21[%c0_11, %c0_12] : memref<32x128xf32, #tpu.memory_space<vmem>>, vector<32x128xf32>
    %c0_13 = arith.constant 0 : index
    %c0_14 = arith.constant 0 : index
    %c0_15 = arith.constant 0 : index
    %32 = vector.load %arg5[%c0_13, %c0_14, %c0_15] : memref<5x32x1xf32, #tpu.memory_space<vmem>>, vector<1x32x1xf32>
    %33 = vector.shape_cast %32 : vector<1x32x1xf32> to vector<32x1xf32>
    %c0_16 = arith.constant 0 : index
    %c0_17 = arith.constant 0 : index
    %c0_18 = arith.constant 0 : index
    %34 = vector.load %arg6[%c0_16, %c0_17, %c0_18] : memref<5x32x1xf32, #tpu.memory_space<vmem>>, vector<1x32x1xf32>
    %35 = vector.shape_cast %34 : vector<1x32x1xf32> to vector<32x1xf32>
    %cst_19 = arith.constant dense<0.000000e+00> : vector<32xf32>
    %36 = vector.multi_reduction <add>, %31, %cst_19 [1] : vector<32x128xf32> to vector<32xf32>
    %37 = vector.shape_cast %36 : vector<32xf32> to vector<32x1xf32>
    %38 = arith.mulf %31, %31 : vector<32x128xf32>
    %cst_20 = arith.constant dense<0.000000e+00> : vector<32xf32>
    %39 = vector.multi_reduction <add>, %38, %cst_20 [1] : vector<32x128xf32> to vector<32xf32>
    %40 = vector.shape_cast %39 : vector<32xf32> to vector<32x1xf32>
    %cst_21 = arith.constant 7.812500e-03 : f32
    %41 = vector.broadcast %cst_21 : f32 to vector<32x1xf32>
    %42 = arith.mulf %37, %41 : vector<32x1xf32>
    %cst_22 = arith.constant 7.812500e-03 : f32
    %43 = vector.broadcast %cst_22 : f32 to vector<32x1xf32>
    %44 = arith.mulf %40, %43 : vector<32x1xf32>
    %45 = arith.mulf %42, %42 : vector<32x1xf32>
    %46 = arith.subf %44, %45 : vector<32x1xf32>
    %cst_23 = arith.constant 9.99999974E-6 : f32
    %47 = vector.broadcast %cst_23 : f32 to vector<32x1xf32>
    %48 = arith.addf %46, %47 : vector<32x1xf32>
    %49 = math.rsqrt %48 : vector<32x1xf32>
    %50 = arith.mulf %49, %33 : vector<32x1xf32>
    %51 = arith.mulf %42, %50 : vector<32x1xf32>
    %52 = arith.subf %35, %51 : vector<32x1xf32>
    %53 = vector.broadcast %50 : vector<32x1xf32> to vector<32x128xf32>
    %54 = arith.mulf %31, %53 : vector<32x128xf32>
    %55 = vector.broadcast %52 : vector<32x1xf32> to vector<32x128xf32>
    %56 = arith.addf %54, %55 : vector<32x128xf32>
    %cst_24 = arith.constant 0.000000e+00 : f32
    %57 = vector.broadcast %cst_24 : f32 to vector<32x128xf32>
    %58 = arith.maximumf %56, %57 : vector<32x128xf32>
    %c0_25 = arith.constant 0 : index
    %c0_26 = arith.constant 0 : index
    %c0_27 = arith.constant 0 : index
    %59 = vector.load %arg9[%c0_25, %c0_26, %c0_27] : memref<5x32x32xbf16, #tpu.memory_space<vmem>>, vector<1x32x32xbf16>
    %60 = vector.shape_cast %59 : vector<1x32x32xbf16> to vector<32x32xbf16>
    %61 = arith.truncf %58 : vector<32x128xf32> to vector<32x128xbf16>
    %cst_28 = arith.constant dense<0.000000e+00> : vector<32x128xf32>
    %62 = tpu.matmul %60, %61, %cst_28 {dimension_numbers = #tpu.dot_dimension_numbers<[1], [0], [0], [1], [0, 0, 1, 1], [], []>} : vector<32x32xbf16>, vector<32x128xbf16>, vector<32x128xf32> -> vector<32x128xf32>
    %c0_29 = arith.constant 0 : index
    %c0_30 = arith.constant 0 : index
    %c0_31 = arith.constant 0 : index
    %63 = vector.load %arg10[%c0_29, %c0_30, %c0_31] : memref<5x32x1xf32, #tpu.memory_space<vmem>>, vector<1x32x1xf32>
    %64 = vector.shape_cast %63 : vector<1x32x1xf32> to vector<32x1xf32>
    %65 = vector.broadcast %64 : vector<32x1xf32> to vector<32x128xf32>
    %66 = arith.addf %62, %65 : vector<32x128xf32>
    %c0_32 = arith.constant 0 : index
    %c0_33 = arith.constant 0 : index
    %67 = vector.load %arg22[%c0_32, %c0_33] : memref<32x128xf32, #tpu.memory_space<vmem>>, vector<32x128xf32>
    tpu.vector_store %arg22[%c0_32, %c0_33], %66 {strides = array<i32>} : memref<32x128xf32, #tpu.memory_space<vmem>>, vector<32x128xf32>,
    %c0_34 = arith.constant 0 : index
    %c0_35 = arith.constant 0 : index
    %68 = vector.load %arg22[%c0_34, %c0_35] : memref<32x128xf32, #tpu.memory_space<vmem>>, vector<32x128xf32>
    %c0_36 = arith.constant 0 : index
    %c0_37 = arith.constant 0 : index
    %c0_38 = arith.constant 0 : index
    %69 = vector.load %arg7[%c0_36, %c0_37, %c0_38] : memref<5x32x1xf32, #tpu.memory_space<vmem>>, vector<1x32x1xf32>
    %70 = vector.shape_cast %69 : vector<1x32x1xf32> to vector<32x1xf32>
    %c0_39 = arith.constant 0 : index
    %c0_40 = arith.constant 0 : index
    %c0_41 = arith.constant 0 : index
    %71 = vector.load %arg8[%c0_39, %c0_40, %c0_41] : memref<5x32x1xf32, #tpu.memory_space<vmem>>, vector<1x32x1xf32>
    %72 = vector.shape_cast %71 : vector<1x32x1xf32> to vector<32x1xf32>
    %cst_42 = arith.constant dense<0.000000e+00> : vector<32xf32>
    %73 = vector.multi_reduction <add>, %68, %cst_42 [1] : vector<32x128xf32> to vector<32xf32>
    %74 = vector.shape_cast %73 : vector<32xf32> to vector<32x1xf32>
    %75 = arith.mulf %68, %68 : vector<32x128xf32>
    %cst_43 = arith.constant dense<0.000000e+00> : vector<32xf32>
    %76 = vector.multi_reduction <add>, %75, %cst_43 [1] : vector<32x128xf32> to vector<32xf32>
    %77 = vector.shape_cast %76 : vector<32xf32> to vector<32x1xf32>
    %cst_44 = arith.constant 7.812500e-03 : f32
    %78 = vector.broadcast %cst_44 : f32 to vector<32x1xf32>
    %79 = arith.mulf %74, %78 : vector<32x1xf32>
    %cst_45 = arith.constant 7.812500e-03 : f32
    %80 = vector.broadcast %cst_45 : f32 to vector<32x1xf32>
    %81 = arith.mulf %77, %80 : vector<32x1xf32>
    %82 = arith.mulf %79, %79 : vector<32x1xf32>
    %83 = arith.subf %81, %82 : vector<32x1xf32>
    %cst_46 = arith.constant 9.99999974E-6 : f32
    %84 = vector.broadcast %cst_46 : f32 to vector<32x1xf32>
    %85 = arith.addf %83, %84 : vector<32x1xf32>
    %86 = math.rsqrt %85 : vector<32x1xf32>
    %87 = arith.mulf %86, %70 : vector<32x1xf32>
    %88 = arith.mulf %79, %87 : vector<32x1xf32>
    %89 = arith.subf %72, %88 : vector<32x1xf32>
    %90 = vector.broadcast %87 : vector<32x1xf32> to vector<32x128xf32>
    %91 = arith.mulf %68, %90 : vector<32x128xf32>
    %92 = vector.broadcast %89 : vector<32x1xf32> to vector<32x128xf32>
    %93 = arith.addf %91, %92 : vector<32x128xf32>
    %cst_47 = arith.constant 0.000000e+00 : f32
    %94 = vector.broadcast %cst_47 : f32 to vector<32x128xf32>
    %95 = arith.maximumf %93, %94 : vector<32x128xf32>
    %c0_48 = arith.constant 0 : index
    %c0_49 = arith.constant 0 : index
    %c0_50 = arith.constant 0 : index
    %96 = vector.load %arg11[%c0_48, %c0_49, %c0_50] : memref<5x32x32xbf16, #tpu.memory_space<vmem>>, vector<1x32x32xbf16>
    %97 = vector.shape_cast %96 : vector<1x32x32xbf16> to vector<32x32xbf16>
    %98 = arith.truncf %95 : vector<32x128xf32> to vector<32x128xbf16>
    %cst_51 = arith.constant dense<0.000000e+00> : vector<32x128xf32>
    %99 = tpu.matmul %97, %98, %cst_51 {dimension_numbers = #tpu.dot_dimension_numbers<[1], [0], [0], [1], [0, 0, 1, 1], [], []>} : vector<32x32xbf16>, vector<32x128xbf16>, vector<32x128xf32> -> vector<32x128xf32>
    %c0_52 = arith.constant 0 : index
    %c0_53 = arith.constant 0 : index
    %c0_54 = arith.constant 0 : index
    %100 = vector.load %arg12[%c0_52, %c0_53, %c0_54] : memref<5x32x1xf32, #tpu.memory_space<vmem>>, vector<1x32x1xf32>
    %101 = vector.shape_cast %100 : vector<1x32x1xf32> to vector<32x1xf32>
    %102 = vector.broadcast %101 : vector<32x1xf32> to vector<32x128xf32>
    %103 = arith.addf %99, %102 : vector<32x128xf32>
    %c0_55 = arith.constant 0 : index
    %c0_56 = arith.constant 0 : index
    %104 = vector.load %arg22[%c0_55, %c0_56] : memref<32x128xf32, #tpu.memory_space<vmem>>, vector<32x128xf32>
    tpu.vector_store %arg22[%c0_55, %c0_56], %103 {strides = array<i32>} : memref<32x128xf32, #tpu.memory_space<vmem>>, vector<32x128xf32>,
    %c0_57 = arith.constant 0 : index
    %c0_58 = arith.constant 0 : index
    %c0_59 = arith.constant 0 : index
    %105 = vector.load %arg13[%c0_57, %c0_58, %c0_59] : memref<5x32x3xf32, #tpu.memory_space<vmem>>, vector<1x32x3xf32>
    %106 = vector.shape_cast %105 : vector<1x32x3xf32> to vector<32x3xf32>
    %c0_60 = arith.constant 0 : index
    %c0_61 = arith.constant 0 : index
    %c0_62 = arith.constant 0 : index
    %107 = vector.load %arg14[%c0_60, %c0_61, %c0_62] : memref<5x32x1xf32, #tpu.memory_space<vmem>>, vector<1x32x1xf32>
    %108 = vector.shape_cast %107 : vector<1x32x1xf32> to vector<32x1xf32>
    %c0_63 = arith.constant 0 : index
    %c0_64 = arith.constant 0 : index
    %c0_65 = arith.constant 0 : index
    %109 = vector.load %arg15[%c0_63, %c0_64, %c0_65] : memref<5x32x1xf32, #tpu.memory_space<vmem>>, vector<1x32x1xf32>
    %110 = vector.shape_cast %109 : vector<1x32x1xf32> to vector<32x1xf32>
    %111 = vector.broadcast %108 : vector<32x1xf32> to vector<32x128xf32>
    %112 = vector.broadcast %1 : vector<1x128xf32> to vector<32x128xf32>
    %113 = arith.mulf %111, %112 : vector<32x128xf32>
    %114 = vector.broadcast %110 : vector<32x1xf32> to vector<32x128xf32>
    %115 = arith.addf %113, %114 : vector<32x128xf32>
    %116 = vector.extract_strided_slice %106 {offsets = [0, 0], sizes = [32, 1], strides = [1, 1]} : vector<32x3xf32> to vector<32x1xf32>
    %117 = vector.extract_strided_slice %0 {offsets = [0, 0], sizes = [1, 128], strides = [1, 1]} : vector<3x128xf32> to vector<1x128xf32>
    %118 = vector.broadcast %116 : vector<32x1xf32> to vector<32x128xf32>
    %119 = vector.broadcast %117 : vector<1x128xf32> to vector<32x128xf32>
    %120 = arith.mulf %118, %119 : vector<32x128xf32>
    %121 = arith.addf %115, %120 : vector<32x128xf32>
    %122 = vector.extract_strided_slice %106 {offsets = [0, 1], sizes = [32, 1], strides = [1, 1]} : vector<32x3xf32> to vector<32x1xf32>
    %123 = vector.extract_strided_slice %0 {offsets = [1, 0], sizes = [1, 128], strides = [1, 1]} : vector<3x128xf32> to vector<1x128xf32>
    %124 = vector.broadcast %122 : vector<32x1xf32> to vector<32x128xf32>
    %125 = vector.broadcast %123 : vector<1x128xf32> to vector<32x128xf32>
    %126 = arith.mulf %124, %125 : vector<32x128xf32>
    %127 = arith.addf %121, %126 : vector<32x128xf32>
    %128 = vector.extract_strided_slice %106 {offsets = [0, 2], sizes = [32, 1], strides = [1, 1]} : vector<32x3xf32> to vector<32x1xf32>
    %129 = vector.extract_strided_slice %0 {offsets = [2, 0], sizes = [1, 128], strides = [1, 1]} : vector<3x128xf32> to vector<1x128xf32>
    %130 = vector.broadcast %128 : vector<32x1xf32> to vector<32x128xf32>
    %131 = vector.broadcast %129 : vector<1x128xf32> to vector<32x128xf32>
    %132 = arith.mulf %130, %131 : vector<32x128xf32>
    %133 = arith.addf %127, %132 : vector<32x128xf32>
    %c0_66 = arith.constant 0 : index
    %c0_67 = arith.constant 0 : index
    %134 = vector.load %arg21[%c0_66, %c0_67] : memref<32x128xf32, #tpu.memory_space<vmem>>, vector<32x128xf32>
    %c0_68 = arith.constant 0 : index
    %c0_69 = arith.constant 0 : index
    %135 = vector.load %arg22[%c0_68, %c0_69] : memref<32x128xf32, #tpu.memory_space<vmem>>, vector<32x128xf32>
    %136 = arith.addf %134, %135 : vector<32x128xf32>
    %137 = arith.addf %136, %133 : vector<32x128xf32>
    %c0_70 = arith.constant 0 : index
    %c0_71 = arith.constant 0 : index
    %138 = vector.load %arg21[%c0_70, %c0_71] : memref<32x128xf32, #tpu.memory_space<vmem>>, vector<32x128xf32>
    tpu.vector_store %arg21[%c0_70, %c0_71], %137 {strides = array<i32>} : memref<32x128xf32, #tpu.memory_space<vmem>>, vector<32x128xf32>,
    %c0_72 = arith.constant 0 : index
    %c0_73 = arith.constant 0 : index
    %139 = vector.load %arg21[%c0_72, %c0_73] : memref<32x128xf32, #tpu.memory_space<vmem>>, vector<32x128xf32>
    %c1 = arith.constant 1 : index
    %c0_74 = arith.constant 0 : index
    %c0_75 = arith.constant 0 : index
    %140 = vector.load %arg5[%c1, %c0_74, %c0_75] : memref<5x32x1xf32, #tpu.memory_space<vmem>>, vector<1x32x1xf32>
    %141 = vector.shape_cast %140 : vector<1x32x1xf32> to vector<32x1xf32>
    %c1_76 = arith.constant 1 : index
    %c0_77 = arith.constant 0 : index
    %c0_78 = arith.constant 0 : index
    %142 = vector.load %arg6[%c1_76, %c0_77, %c0_78] : memref<5x32x1xf32, #tpu.memory_space<vmem>>, vector<1x32x1xf32>
    %143 = vector.shape_cast %142 : vector<1x32x1xf32> to vector<32x1xf32>
    %cst_79 = arith.constant dense<0.000000e+00> : vector<32xf32>
    %144 = vector.multi_reduction <add>, %139, %cst_79 [1] : vector<32x128xf32> to vector<32xf32>
    %145 = vector.shape_cast %144 : vector<32xf32> to vector<32x1xf32>
    %146 = arith.mulf %139, %139 : vector<32x128xf32>
    %cst_80 = arith.constant dense<0.000000e+00> : vector<32xf32>
    %147 = vector.multi_reduction <add>, %146, %cst_80 [1] : vector<32x128xf32> to vector<32xf32>
    %148 = vector.shape_cast %147 : vector<32xf32> to vector<32x1xf32>
    %cst_81 = arith.constant 7.812500e-03 : f32
    %149 = vector.broadcast %cst_81 : f32 to vector<32x1xf32>
    %150 = arith.mulf %145, %149 : vector<32x1xf32>
    %cst_82 = arith.constant 7.812500e-03 : f32
    %151 = vector.broadcast %cst_82 : f32 to vector<32x1xf32>
    %152 = arith.mulf %148, %151 : vector<32x1xf32>
    %153 = arith.mulf %150, %150 : vector<32x1xf32>
    %154 = arith.subf %152, %153 : vector<32x1xf32>
    %cst_83 = arith.constant 9.99999974E-6 : f32
    %155 = vector.broadcast %cst_83 : f32 to vector<32x1xf32>
    %156 = arith.addf %154, %155 : vector<32x1xf32>
    %157 = math.rsqrt %156 : vector<32x1xf32>
    %158 = arith.mulf %157, %141 : vector<32x1xf32>
    %159 = arith.mulf %150, %158 : vector<32x1xf32>
    %160 = arith.subf %143, %159 : vector<32x1xf32>
    %161 = vector.broadcast %158 : vector<32x1xf32> to vector<32x128xf32>
    %162 = arith.mulf %139, %161 : vector<32x128xf32>
    %163 = vector.broadcast %160 : vector<32x1xf32> to vector<32x128xf32>
    %164 = arith.addf %162, %163 : vector<32x128xf32>
    %cst_84 = arith.constant 0.000000e+00 : f32
    %165 = vector.broadcast %cst_84 : f32 to vector<32x128xf32>
    %166 = arith.maximumf %164, %165 : vector<32x128xf32>
    %c1_85 = arith.constant 1 : index
    %c0_86 = arith.constant 0 : index
    %c0_87 = arith.constant 0 : index
    %167 = vector.load %arg9[%c1_85, %c0_86, %c0_87] : memref<5x32x32xbf16, #tpu.memory_space<vmem>>, vector<1x32x32xbf16>
    %168 = vector.shape_cast %167 : vector<1x32x32xbf16> to vector<32x32xbf16>
    %169 = arith.truncf %166 : vector<32x128xf32> to vector<32x128xbf16>
    %cst_88 = arith.constant dense<0.000000e+00> : vector<32x128xf32>
    %170 = tpu.matmul %168, %169, %cst_88 {dimension_numbers = #tpu.dot_dimension_numbers<[1], [0], [0], [1], [0, 0, 1, 1], [], []>} : vector<32x32xbf16>, vector<32x128xbf16>, vector<32x128xf32> -> vector<32x128xf32>
    %c1_89 = arith.constant 1 : index
    %c0_90 = arith.constant 0 : index
    %c0_91 = arith.constant 0 : index
    %171 = vector.load %arg10[%c1_89, %c0_90, %c0_91] : memref<5x32x1xf32, #tpu.memory_space<vmem>>, vector<1x32x1xf32>
    %172 = vector.shape_cast %171 : vector<1x32x1xf32> to vector<32x1xf32>
    %173 = vector.broadcast %172 : vector<32x1xf32> to vector<32x128xf32>
    %174 = arith.addf %170, %173 : vector<32x128xf32>
    %c0_92 = arith.constant 0 : index
    %c0_93 = arith.constant 0 : index
    %175 = vector.load %arg22[%c0_92, %c0_93] : memref<32x128xf32, #tpu.memory_space<vmem>>, vector<32x128xf32>
    tpu.vector_store %arg22[%c0_92, %c0_93], %174 {strides = array<i32>} : memref<32x128xf32, #tpu.memory_space<vmem>>, vector<32x128xf32>,
    %c0_94 = arith.constant 0 : index
    %c0_95 = arith.constant 0 : index
    %176 = vector.load %arg22[%c0_94, %c0_95] : memref<32x128xf32, #tpu.memory_space<vmem>>, vector<32x128xf32>
    %c1_96 = arith.constant 1 : index
    %c0_97 = arith.constant 0 : index
    %c0_98 = arith.constant 0 : index
    %177 = vector.load %arg7[%c1_96, %c0_97, %c0_98] : memref<5x32x1xf32, #tpu.memory_space<vmem>>, vector<1x32x1xf32>
    %178 = vector.shape_cast %177 : vector<1x32x1xf32> to vector<32x1xf32>
    %c1_99 = arith.constant 1 : index
    %c0_100 = arith.constant 0 : index
    %c0_101 = arith.constant 0 : index
    %179 = vector.load %arg8[%c1_99, %c0_100, %c0_101] : memref<5x32x1xf32, #tpu.memory_space<vmem>>, vector<1x32x1xf32>
    %180 = vector.shape_cast %179 : vector<1x32x1xf32> to vector<32x1xf32>
    %cst_102 = arith.constant dense<0.000000e+00> : vector<32xf32>
    %181 = vector.multi_reduction <add>, %176, %cst_102 [1] : vector<32x128xf32> to vector<32xf32>
    %182 = vector.shape_cast %181 : vector<32xf32> to vector<32x1xf32>
    %183 = arith.mulf %176, %176 : vector<32x128xf32>
    %cst_103 = arith.constant dense<0.000000e+00> : vector<32xf32>
    %184 = vector.multi_reduction <add>, %183, %cst_103 [1] : vector<32x128xf32> to vector<32xf32>
    %185 = vector.shape_cast %184 : vector<32xf32> to vector<32x1xf32>
    %cst_104 = arith.constant 7.812500e-03 : f32
    %186 = vector.broadcast %cst_104 : f32 to vector<32x1xf32>
    %187 = arith.mulf %182, %186 : vector<32x1xf32>
    %cst_105 = arith.constant 7.812500e-03 : f32
    %188 = vector.broadcast %cst_105 : f32 to vector<32x1xf32>
    %189 = arith.mulf %185, %188 : vector<32x1xf32>
    %190 = arith.mulf %187, %187 : vector<32x1xf32>
    %191 = arith.subf %189, %190 : vector<32x1xf32>
    %cst_106 = arith.constant 9.99999974E-6 : f32
    %192 = vector.broadcast %cst_106 : f32 to vector<32x1xf32>
    %193 = arith.addf %191, %192 : vector<32x1xf32>
    %194 = math.rsqrt %193 : vector<32x1xf32>
    %195 = arith.mulf %194, %178 : vector<32x1xf32>
    %196 = arith.mulf %187, %195 : vector<32x1xf32>
    %197 = arith.subf %180, %196 : vector<32x1xf32>
    %198 = vector.broadcast %195 : vector<32x1xf32> to vector<32x128xf32>
    %199 = arith.mulf %176, %198 : vector<32x128xf32>
    %200 = vector.broadcast %197 : vector<32x1xf32> to vector<32x128xf32>
    %201 = arith.addf %199, %200 : vector<32x128xf32>
    %cst_107 = arith.constant 0.000000e+00 : f32
    %202 = vector.broadcast %cst_107 : f32 to vector<32x128xf32>
    %203 = arith.maximumf %201, %202 : vector<32x128xf32>
    %c1_108 = arith.constant 1 : index
    %c0_109 = arith.constant 0 : index
    %c0_110 = arith.constant 0 : index
    %204 = vector.load %arg11[%c1_108, %c0_109, %c0_110] : memref<5x32x32xbf16, #tpu.memory_space<vmem>>, vector<1x32x32xbf16>
    %205 = vector.shape_cast %204 : vector<1x32x32xbf16> to vector<32x32xbf16>
    %206 = arith.truncf %203 : vector<32x128xf32> to vector<32x128xbf16>
    %cst_111 = arith.constant dense<0.000000e+00> : vector<32x128xf32>
    %207 = tpu.matmul %205, %206, %cst_111 {dimension_numbers = #tpu.dot_dimension_numbers<[1], [0], [0], [1], [0, 0, 1, 1], [], []>} : vector<32x32xbf16>, vector<32x128xbf16>, vector<32x128xf32> -> vector<32x128xf32>
    %c1_112 = arith.constant 1 : index
    %c0_113 = arith.constant 0 : index
    %c0_114 = arith.constant 0 : index
    %208 = vector.load %arg12[%c1_112, %c0_113, %c0_114] : memref<5x32x1xf32, #tpu.memory_space<vmem>>, vector<1x32x1xf32>
    %209 = vector.shape_cast %208 : vector<1x32x1xf32> to vector<32x1xf32>
    %210 = vector.broadcast %209 : vector<32x1xf32> to vector<32x128xf32>
    %211 = arith.addf %207, %210 : vector<32x128xf32>
    %c0_115 = arith.constant 0 : index
    %c0_116 = arith.constant 0 : index
    %212 = vector.load %arg22[%c0_115, %c0_116] : memref<32x128xf32, #tpu.memory_space<vmem>>, vector<32x128xf32>
    tpu.vector_store %arg22[%c0_115, %c0_116], %211 {strides = array<i32>} : memref<32x128xf32, #tpu.memory_space<vmem>>, vector<32x128xf32>,
    %c1_117 = arith.constant 1 : index
    %c0_118 = arith.constant 0 : index
    %c0_119 = arith.constant 0 : index
    %213 = vector.load %arg13[%c1_117, %c0_118, %c0_119] : memref<5x32x3xf32, #tpu.memory_space<vmem>>, vector<1x32x3xf32>
    %214 = vector.shape_cast %213 : vector<1x32x3xf32> to vector<32x3xf32>
    %c1_120 = arith.constant 1 : index
    %c0_121 = arith.constant 0 : index
    %c0_122 = arith.constant 0 : index
    %215 = vector.load %arg14[%c1_120, %c0_121, %c0_122] : memref<5x32x1xf32, #tpu.memory_space<vmem>>, vector<1x32x1xf32>
    %216 = vector.shape_cast %215 : vector<1x32x1xf32> to vector<32x1xf32>
    %c1_123 = arith.constant 1 : index
    %c0_124 = arith.constant 0 : index
    %c0_125 = arith.constant 0 : index
    %217 = vector.load %arg15[%c1_123, %c0_124, %c0_125] : memref<5x32x1xf32, #tpu.memory_space<vmem>>, vector<1x32x1xf32>
    %218 = vector.shape_cast %217 : vector<1x32x1xf32> to vector<32x1xf32>
    %219 = vector.broadcast %216 : vector<32x1xf32> to vector<32x128xf32>
    %220 = vector.broadcast %1 : vector<1x128xf32> to vector<32x128xf32>
    %221 = arith.mulf %219, %220 : vector<32x128xf32>
    %222 = vector.broadcast %218 : vector<32x1xf32> to vector<32x128xf32>
    %223 = arith.addf %221, %222 : vector<32x128xf32>
    %224 = vector.extract_strided_slice %214 {offsets = [0, 0], sizes = [32, 1], strides = [1, 1]} : vector<32x3xf32> to vector<32x1xf32>
    %225 = vector.extract_strided_slice %0 {offsets = [0, 0], sizes = [1, 128], strides = [1, 1]} : vector<3x128xf32> to vector<1x128xf32>
    %226 = vector.broadcast %224 : vector<32x1xf32> to vector<32x128xf32>
    %227 = vector.broadcast %225 : vector<1x128xf32> to vector<32x128xf32>
    %228 = arith.mulf %226, %227 : vector<32x128xf32>
    %229 = arith.addf %223, %228 : vector<32x128xf32>
    %230 = vector.extract_strided_slice %214 {offsets = [0, 1], sizes = [32, 1], strides = [1, 1]} : vector<32x3xf32> to vector<32x1xf32>
    %231 = vector.extract_strided_slice %0 {offsets = [1, 0], sizes = [1, 128], strides = [1, 1]} : vector<3x128xf32> to vector<1x128xf32>
    %232 = vector.broadcast %230 : vector<32x1xf32> to vector<32x128xf32>
    %233 = vector.broadcast %231 : vector<1x128xf32> to vector<32x128xf32>
    %234 = arith.mulf %232, %233 : vector<32x128xf32>
    %235 = arith.addf %229, %234 : vector<32x128xf32>
    %236 = vector.extract_strided_slice %214 {offsets = [0, 2], sizes = [32, 1], strides = [1, 1]} : vector<32x3xf32> to vector<32x1xf32>
    %237 = vector.extract_strided_slice %0 {offsets = [2, 0], sizes = [1, 128], strides = [1, 1]} : vector<3x128xf32> to vector<1x128xf32>
    %238 = vector.broadcast %236 : vector<32x1xf32> to vector<32x128xf32>
    %239 = vector.broadcast %237 : vector<1x128xf32> to vector<32x128xf32>
    %240 = arith.mulf %238, %239 : vector<32x128xf32>
    %241 = arith.addf %235, %240 : vector<32x128xf32>
    %c0_126 = arith.constant 0 : index
    %c0_127 = arith.constant 0 : index
    %242 = vector.load %arg21[%c0_126, %c0_127] : memref<32x128xf32, #tpu.memory_space<vmem>>, vector<32x128xf32>
    %c0_128 = arith.constant 0 : index
    %c0_129 = arith.constant 0 : index
    %243 = vector.load %arg22[%c0_128, %c0_129] : memref<32x128xf32, #tpu.memory_space<vmem>>, vector<32x128xf32>
    %244 = arith.addf %242, %243 : vector<32x128xf32>
    %245 = arith.addf %244, %241 : vector<32x128xf32>
    %c0_130 = arith.constant 0 : index
    %c0_131 = arith.constant 0 : index
    %246 = vector.load %arg21[%c0_130, %c0_131] : memref<32x128xf32, #tpu.memory_space<vmem>>, vector<32x128xf32>
    tpu.vector_store %arg21[%c0_130, %c0_131], %245 {strides = array<i32>} : memref<32x128xf32, #tpu.memory_space<vmem>>, vector<32x128xf32>,
    %c0_132 = arith.constant 0 : index
    %c0_133 = arith.constant 0 : index
    %247 = vector.load %arg21[%c0_132, %c0_133] : memref<32x128xf32, #tpu.memory_space<vmem>>, vector<32x128xf32>
    %c2 = arith.constant 2 : index
    %c0_134 = arith.constant 0 : index
    %c0_135 = arith.constant 0 : index
    %248 = vector.load %arg5[%c2, %c0_134, %c0_135] : memref<5x32x1xf32, #tpu.memory_space<vmem>>, vector<1x32x1xf32>
    %249 = vector.shape_cast %248 : vector<1x32x1xf32> to vector<32x1xf32>
    %c2_136 = arith.constant 2 : index
    %c0_137 = arith.constant 0 : index
    %c0_138 = arith.constant 0 : index
    %250 = vector.load %arg6[%c2_136, %c0_137, %c0_138] : memref<5x32x1xf32, #tpu.memory_space<vmem>>, vector<1x32x1xf32>
    %251 = vector.shape_cast %250 : vector<1x32x1xf32> to vector<32x1xf32>
    %cst_139 = arith.constant dense<0.000000e+00> : vector<32xf32>
    %252 = vector.multi_reduction <add>, %247, %cst_139 [1] : vector<32x128xf32> to vector<32xf32>
    %253 = vector.shape_cast %252 : vector<32xf32> to vector<32x1xf32>
    %254 = arith.mulf %247, %247 : vector<32x128xf32>
    %cst_140 = arith.constant dense<0.000000e+00> : vector<32xf32>
    %255 = vector.multi_reduction <add>, %254, %cst_140 [1] : vector<32x128xf32> to vector<32xf32>
    %256 = vector.shape_cast %255 : vector<32xf32> to vector<32x1xf32>
    %cst_141 = arith.constant 7.812500e-03 : f32
    %257 = vector.broadcast %cst_141 : f32 to vector<32x1xf32>
    %258 = arith.mulf %253, %257 : vector<32x1xf32>
    %cst_142 = arith.constant 7.812500e-03 : f32
    %259 = vector.broadcast %cst_142 : f32 to vector<32x1xf32>
    %260 = arith.mulf %256, %259 : vector<32x1xf32>
    %261 = arith.mulf %258, %258 : vector<32x1xf32>
    %262 = arith.subf %260, %261 : vector<32x1xf32>
    %cst_143 = arith.constant 9.99999974E-6 : f32
    %263 = vector.broadcast %cst_143 : f32 to vector<32x1xf32>
    %264 = arith.addf %262, %263 : vector<32x1xf32>
    %265 = math.rsqrt %264 : vector<32x1xf32>
    %266 = arith.mulf %265, %249 : vector<32x1xf32>
    %267 = arith.mulf %258, %266 : vector<32x1xf32>
    %268 = arith.subf %251, %267 : vector<32x1xf32>
    %269 = vector.broadcast %266 : vector<32x1xf32> to vector<32x128xf32>
    %270 = arith.mulf %247, %269 : vector<32x128xf32>
    %271 = vector.broadcast %268 : vector<32x1xf32> to vector<32x128xf32>
    %272 = arith.addf %270, %271 : vector<32x128xf32>
    %cst_144 = arith.constant 0.000000e+00 : f32
    %273 = vector.broadcast %cst_144 : f32 to vector<32x128xf32>
    %274 = arith.maximumf %272, %273 : vector<32x128xf32>
    %c2_145 = arith.constant 2 : index
    %c0_146 = arith.constant 0 : index
    %c0_147 = arith.constant 0 : index
    %275 = vector.load %arg9[%c2_145, %c0_146, %c0_147] : memref<5x32x32xbf16, #tpu.memory_space<vmem>>, vector<1x32x32xbf16>
    %276 = vector.shape_cast %275 : vector<1x32x32xbf16> to vector<32x32xbf16>
    %277 = arith.truncf %274 : vector<32x128xf32> to vector<32x128xbf16>
    %cst_148 = arith.constant dense<0.000000e+00> : vector<32x128xf32>
    %278 = tpu.matmul %276, %277, %cst_148 {dimension_numbers = #tpu.dot_dimension_numbers<[1], [0], [0], [1], [0, 0, 1, 1], [], []>} : vector<32x32xbf16>, vector<32x128xbf16>, vector<32x128xf32> -> vector<32x128xf32>
    %c2_149 = arith.constant 2 : index
    %c0_150 = arith.constant 0 : index
    %c0_151 = arith.constant 0 : index
    %279 = vector.load %arg10[%c2_149, %c0_150, %c0_151] : memref<5x32x1xf32, #tpu.memory_space<vmem>>, vector<1x32x1xf32>
    %280 = vector.shape_cast %279 : vector<1x32x1xf32> to vector<32x1xf32>
    %281 = vector.broadcast %280 : vector<32x1xf32> to vector<32x128xf32>
    %282 = arith.addf %278, %281 : vector<32x128xf32>
    %c0_152 = arith.constant 0 : index
    %c0_153 = arith.constant 0 : index
    %283 = vector.load %arg22[%c0_152, %c0_153] : memref<32x128xf32, #tpu.memory_space<vmem>>, vector<32x128xf32>
    tpu.vector_store %arg22[%c0_152, %c0_153], %282 {strides = array<i32>} : memref<32x128xf32, #tpu.memory_space<vmem>>, vector<32x128xf32>,
    %c0_154 = arith.constant 0 : index
    %c0_155 = arith.constant 0 : index
    %284 = vector.load %arg22[%c0_154, %c0_155] : memref<32x128xf32, #tpu.memory_space<vmem>>, vector<32x128xf32>
    %c2_156 = arith.constant 2 : index
    %c0_157 = arith.constant 0 : index
    %c0_158 = arith.constant 0 : index
    %285 = vector.load %arg7[%c2_156, %c0_157, %c0_158] : memref<5x32x1xf32, #tpu.memory_space<vmem>>, vector<1x32x1xf32>
    %286 = vector.shape_cast %285 : vector<1x32x1xf32> to vector<32x1xf32>
    %c2_159 = arith.constant 2 : index
    %c0_160 = arith.constant 0 : index
    %c0_161 = arith.constant 0 : index
    %287 = vector.load %arg8[%c2_159, %c0_160, %c0_161] : memref<5x32x1xf32, #tpu.memory_space<vmem>>, vector<1x32x1xf32>
    %288 = vector.shape_cast %287 : vector<1x32x1xf32> to vector<32x1xf32>
    %cst_162 = arith.constant dense<0.000000e+00> : vector<32xf32>
    %289 = vector.multi_reduction <add>, %284, %cst_162 [1] : vector<32x128xf32> to vector<32xf32>
    %290 = vector.shape_cast %289 : vector<32xf32> to vector<32x1xf32>
    %291 = arith.mulf %284, %284 : vector<32x128xf32>
    %cst_163 = arith.constant dense<0.000000e+00> : vector<32xf32>
    %292 = vector.multi_reduction <add>, %291, %cst_163 [1] : vector<32x128xf32> to vector<32xf32>
    %293 = vector.shape_cast %292 : vector<32xf32> to vector<32x1xf32>
    %cst_164 = arith.constant 7.812500e-03 : f32
    %294 = vector.broadcast %cst_164 : f32 to vector<32x1xf32>
    %295 = arith.mulf %290, %294 : vector<32x1xf32>
    %cst_165 = arith.constant 7.812500e-03 : f32
    %296 = vector.broadcast %cst_165 : f32 to vector<32x1xf32>
    %297 = arith.mulf %293, %296 : vector<32x1xf32>
    %298 = arith.mulf %295, %295 : vector<32x1xf32>
    %299 = arith.subf %297, %298 : vector<32x1xf32>
    %cst_166 = arith.constant 9.99999974E-6 : f32
    %300 = vector.broadcast %cst_166 : f32 to vector<32x1xf32>
    %301 = arith.addf %299, %300 : vector<32x1xf32>
    %302 = math.rsqrt %301 : vector<32x1xf32>
    %303 = arith.mulf %302, %286 : vector<32x1xf32>
    %304 = arith.mulf %295, %303 : vector<32x1xf32>
    %305 = arith.subf %288, %304 : vector<32x1xf32>
    %306 = vector.broadcast %303 : vector<32x1xf32> to vector<32x128xf32>
    %307 = arith.mulf %284, %306 : vector<32x128xf32>
    %308 = vector.broadcast %305 : vector<32x1xf32> to vector<32x128xf32>
    %309 = arith.addf %307, %308 : vector<32x128xf32>
    %cst_167 = arith.constant 0.000000e+00 : f32
    %310 = vector.broadcast %cst_167 : f32 to vector<32x128xf32>
    %311 = arith.maximumf %309, %310 : vector<32x128xf32>
    %c2_168 = arith.constant 2 : index
    %c0_169 = arith.constant 0 : index
    %c0_170 = arith.constant 0 : index
    %312 = vector.load %arg11[%c2_168, %c0_169, %c0_170] : memref<5x32x32xbf16, #tpu.memory_space<vmem>>, vector<1x32x32xbf16>
    %313 = vector.shape_cast %312 : vector<1x32x32xbf16> to vector<32x32xbf16>
    %314 = arith.truncf %311 : vector<32x128xf32> to vector<32x128xbf16>
    %cst_171 = arith.constant dense<0.000000e+00> : vector<32x128xf32>
    %315 = tpu.matmul %313, %314, %cst_171 {dimension_numbers = #tpu.dot_dimension_numbers<[1], [0], [0], [1], [0, 0, 1, 1], [], []>} : vector<32x32xbf16>, vector<32x128xbf16>, vector<32x128xf32> -> vector<32x128xf32>
    %c2_172 = arith.constant 2 : index
    %c0_173 = arith.constant 0 : index
    %c0_174 = arith.constant 0 : index
    %316 = vector.load %arg12[%c2_172, %c0_173, %c0_174] : memref<5x32x1xf32, #tpu.memory_space<vmem>>, vector<1x32x1xf32>
    %317 = vector.shape_cast %316 : vector<1x32x1xf32> to vector<32x1xf32>
    %318 = vector.broadcast %317 : vector<32x1xf32> to vector<32x128xf32>
    %319 = arith.addf %315, %318 : vector<32x128xf32>
    %c0_175 = arith.constant 0 : index
    %c0_176 = arith.constant 0 : index
    %320 = vector.load %arg22[%c0_175, %c0_176] : memref<32x128xf32, #tpu.memory_space<vmem>>, vector<32x128xf32>
    tpu.vector_store %arg22[%c0_175, %c0_176], %319 {strides = array<i32>} : memref<32x128xf32, #tpu.memory_space<vmem>>, vector<32x128xf32>,
    %c2_177 = arith.constant 2 : index
    %c0_178 = arith.constant 0 : index
    %c0_179 = arith.constant 0 : index
    %321 = vector.load %arg13[%c2_177, %c0_178, %c0_179] : memref<5x32x3xf32, #tpu.memory_space<vmem>>, vector<1x32x3xf32>
    %322 = vector.shape_cast %321 : vector<1x32x3xf32> to vector<32x3xf32>
    %c2_180 = arith.constant 2 : index
    %c0_181 = arith.constant 0 : index
    %c0_182 = arith.constant 0 : index
    %323 = vector.load %arg14[%c2_180, %c0_181, %c0_182] : memref<5x32x1xf32, #tpu.memory_space<vmem>>, vector<1x32x1xf32>
    %324 = vector.shape_cast %323 : vector<1x32x1xf32> to vector<32x1xf32>
    %c2_183 = arith.constant 2 : index
    %c0_184 = arith.constant 0 : index
    %c0_185 = arith.constant 0 : index
    %325 = vector.load %arg15[%c2_183, %c0_184, %c0_185] : memref<5x32x1xf32, #tpu.memory_space<vmem>>, vector<1x32x1xf32>
    %326 = vector.shape_cast %325 : vector<1x32x1xf32> to vector<32x1xf32>
    %327 = vector.broadcast %324 : vector<32x1xf32> to vector<32x128xf32>
    %328 = vector.broadcast %1 : vector<1x128xf32> to vector<32x128xf32>
    %329 = arith.mulf %327, %328 : vector<32x128xf32>
    %330 = vector.broadcast %326 : vector<32x1xf32> to vector<32x128xf32>
    %331 = arith.addf %329, %330 : vector<32x128xf32>
    %332 = vector.extract_strided_slice %322 {offsets = [0, 0], sizes = [32, 1], strides = [1, 1]} : vector<32x3xf32> to vector<32x1xf32>
    %333 = vector.extract_strided_slice %0 {offsets = [0, 0], sizes = [1, 128], strides = [1, 1]} : vector<3x128xf32> to vector<1x128xf32>
    %334 = vector.broadcast %332 : vector<32x1xf32> to vector<32x128xf32>
    %335 = vector.broadcast %333 : vector<1x128xf32> to vector<32x128xf32>
    %336 = arith.mulf %334, %335 : vector<32x128xf32>
    %337 = arith.addf %331, %336 : vector<32x128xf32>
    %338 = vector.extract_strided_slice %322 {offsets = [0, 1], sizes = [32, 1], strides = [1, 1]} : vector<32x3xf32> to vector<32x1xf32>
    %339 = vector.extract_strided_slice %0 {offsets = [1, 0], sizes = [1, 128], strides = [1, 1]} : vector<3x128xf32> to vector<1x128xf32>
    %340 = vector.broadcast %338 : vector<32x1xf32> to vector<32x128xf32>
    %341 = vector.broadcast %339 : vector<1x128xf32> to vector<32x128xf32>
    %342 = arith.mulf %340, %341 : vector<32x128xf32>
    %343 = arith.addf %337, %342 : vector<32x128xf32>
    %344 = vector.extract_strided_slice %322 {offsets = [0, 2], sizes = [32, 1], strides = [1, 1]} : vector<32x3xf32> to vector<32x1xf32>
    %345 = vector.extract_strided_slice %0 {offsets = [2, 0], sizes = [1, 128], strides = [1, 1]} : vector<3x128xf32> to vector<1x128xf32>
    %346 = vector.broadcast %344 : vector<32x1xf32> to vector<32x128xf32>
    %347 = vector.broadcast %345 : vector<1x128xf32> to vector<32x128xf32>
    %348 = arith.mulf %346, %347 : vector<32x128xf32>
    %349 = arith.addf %343, %348 : vector<32x128xf32>
    %c0_186 = arith.constant 0 : index
    %c0_187 = arith.constant 0 : index
    %350 = vector.load %arg21[%c0_186, %c0_187] : memref<32x128xf32, #tpu.memory_space<vmem>>, vector<32x128xf32>
    %c0_188 = arith.constant 0 : index
    %c0_189 = arith.constant 0 : index
    %351 = vector.load %arg22[%c0_188, %c0_189] : memref<32x128xf32, #tpu.memory_space<vmem>>, vector<32x128xf32>
    %352 = arith.addf %350, %351 : vector<32x128xf32>
    %353 = arith.addf %352, %349 : vector<32x128xf32>
    %c0_190 = arith.constant 0 : index
    %c0_191 = arith.constant 0 : index
    %354 = vector.load %arg21[%c0_190, %c0_191] : memref<32x128xf32, #tpu.memory_space<vmem>>, vector<32x128xf32>
    tpu.vector_store %arg21[%c0_190, %c0_191], %353 {strides = array<i32>} : memref<32x128xf32, #tpu.memory_space<vmem>>, vector<32x128xf32>,
    %c0_192 = arith.constant 0 : index
    %c0_193 = arith.constant 0 : index
    %355 = vector.load %arg21[%c0_192, %c0_193] : memref<32x128xf32, #tpu.memory_space<vmem>>, vector<32x128xf32>
    %c3 = arith.constant 3 : index
    %c0_194 = arith.constant 0 : index
    %c0_195 = arith.constant 0 : index
    %356 = vector.load %arg5[%c3, %c0_194, %c0_195] : memref<5x32x1xf32, #tpu.memory_space<vmem>>, vector<1x32x1xf32>
    %357 = vector.shape_cast %356 : vector<1x32x1xf32> to vector<32x1xf32>
    %c3_196 = arith.constant 3 : index
    %c0_197 = arith.constant 0 : index
    %c0_198 = arith.constant 0 : index
    %358 = vector.load %arg6[%c3_196, %c0_197, %c0_198] : memref<5x32x1xf32, #tpu.memory_space<vmem>>, vector<1x32x1xf32>
    %359 = vector.shape_cast %358 : vector<1x32x1xf32> to vector<32x1xf32>
    %cst_199 = arith.constant dense<0.000000e+00> : vector<32xf32>
    %360 = vector.multi_reduction <add>, %355, %cst_199 [1] : vector<32x128xf32> to vector<32xf32>
    %361 = vector.shape_cast %360 : vector<32xf32> to vector<32x1xf32>
    %362 = arith.mulf %355, %355 : vector<32x128xf32>
    %cst_200 = arith.constant dense<0.000000e+00> : vector<32xf32>
    %363 = vector.multi_reduction <add>, %362, %cst_200 [1] : vector<32x128xf32> to vector<32xf32>
    %364 = vector.shape_cast %363 : vector<32xf32> to vector<32x1xf32>
    %cst_201 = arith.constant 7.812500e-03 : f32
    %365 = vector.broadcast %cst_201 : f32 to vector<32x1xf32>
    %366 = arith.mulf %361, %365 : vector<32x1xf32>
    %cst_202 = arith.constant 7.812500e-03 : f32
    %367 = vector.broadcast %cst_202 : f32 to vector<32x1xf32>
    %368 = arith.mulf %364, %367 : vector<32x1xf32>
    %369 = arith.mulf %366, %366 : vector<32x1xf32>
    %370 = arith.subf %368, %369 : vector<32x1xf32>
    %cst_203 = arith.constant 9.99999974E-6 : f32
    %371 = vector.broadcast %cst_203 : f32 to vector<32x1xf32>
    %372 = arith.addf %370, %371 : vector<32x1xf32>
    %373 = math.rsqrt %372 : vector<32x1xf32>
    %374 = arith.mulf %373, %357 : vector<32x1xf32>
    %375 = arith.mulf %366, %374 : vector<32x1xf32>
    %376 = arith.subf %359, %375 : vector<32x1xf32>
    %377 = vector.broadcast %374 : vector<32x1xf32> to vector<32x128xf32>
    %378 = arith.mulf %355, %377 : vector<32x128xf32>
    %379 = vector.broadcast %376 : vector<32x1xf32> to vector<32x128xf32>
    %380 = arith.addf %378, %379 : vector<32x128xf32>
    %cst_204 = arith.constant 0.000000e+00 : f32
    %381 = vector.broadcast %cst_204 : f32 to vector<32x128xf32>
    %382 = arith.maximumf %380, %381 : vector<32x128xf32>
    %c3_205 = arith.constant 3 : index
    %c0_206 = arith.constant 0 : index
    %c0_207 = arith.constant 0 : index
    %383 = vector.load %arg9[%c3_205, %c0_206, %c0_207] : memref<5x32x32xbf16, #tpu.memory_space<vmem>>, vector<1x32x32xbf16>
    %384 = vector.shape_cast %383 : vector<1x32x32xbf16> to vector<32x32xbf16>
    %385 = arith.truncf %382 : vector<32x128xf32> to vector<32x128xbf16>
    %cst_208 = arith.constant dense<0.000000e+00> : vector<32x128xf32>
    %386 = tpu.matmul %384, %385, %cst_208 {dimension_numbers = #tpu.dot_dimension_numbers<[1], [0], [0], [1], [0, 0, 1, 1], [], []>} : vector<32x32xbf16>, vector<32x128xbf16>, vector<32x128xf32> -> vector<32x128xf32>
    %c3_209 = arith.constant 3 : index
    %c0_210 = arith.constant 0 : index
    %c0_211 = arith.constant 0 : index
    %387 = vector.load %arg10[%c3_209, %c0_210, %c0_211] : memref<5x32x1xf32, #tpu.memory_space<vmem>>, vector<1x32x1xf32>
    %388 = vector.shape_cast %387 : vector<1x32x1xf32> to vector<32x1xf32>
    %389 = vector.broadcast %388 : vector<32x1xf32> to vector<32x128xf32>
    %390 = arith.addf %386, %389 : vector<32x128xf32>
    %c0_212 = arith.constant 0 : index
    %c0_213 = arith.constant 0 : index
    %391 = vector.load %arg22[%c0_212, %c0_213] : memref<32x128xf32, #tpu.memory_space<vmem>>, vector<32x128xf32>
    tpu.vector_store %arg22[%c0_212, %c0_213], %390 {strides = array<i32>} : memref<32x128xf32, #tpu.memory_space<vmem>>, vector<32x128xf32>,
    %c0_214 = arith.constant 0 : index
    %c0_215 = arith.constant 0 : index
    %392 = vector.load %arg22[%c0_214, %c0_215] : memref<32x128xf32, #tpu.memory_space<vmem>>, vector<32x128xf32>
    %c3_216 = arith.constant 3 : index
    %c0_217 = arith.constant 0 : index
    %c0_218 = arith.constant 0 : index
    %393 = vector.load %arg7[%c3_216, %c0_217, %c0_218] : memref<5x32x1xf32, #tpu.memory_space<vmem>>, vector<1x32x1xf32>
    %394 = vector.shape_cast %393 : vector<1x32x1xf32> to vector<32x1xf32>
    %c3_219 = arith.constant 3 : index
    %c0_220 = arith.constant 0 : index
    %c0_221 = arith.constant 0 : index
    %395 = vector.load %arg8[%c3_219, %c0_220, %c0_221] : memref<5x32x1xf32, #tpu.memory_space<vmem>>, vector<1x32x1xf32>
    %396 = vector.shape_cast %395 : vector<1x32x1xf32> to vector<32x1xf32>
    %cst_222 = arith.constant dense<0.000000e+00> : vector<32xf32>
    %397 = vector.multi_reduction <add>, %392, %cst_222 [1] : vector<32x128xf32> to vector<32xf32>
    %398 = vector.shape_cast %397 : vector<32xf32> to vector<32x1xf32>
    %399 = arith.mulf %392, %392 : vector<32x128xf32>
    %cst_223 = arith.constant dense<0.000000e+00> : vector<32xf32>
    %400 = vector.multi_reduction <add>, %399, %cst_223 [1] : vector<32x128xf32> to vector<32xf32>
    %401 = vector.shape_cast %400 : vector<32xf32> to vector<32x1xf32>
    %cst_224 = arith.constant 7.812500e-03 : f32
    %402 = vector.broadcast %cst_224 : f32 to vector<32x1xf32>
    %403 = arith.mulf %398, %402 : vector<32x1xf32>
    %cst_225 = arith.constant 7.812500e-03 : f32
    %404 = vector.broadcast %cst_225 : f32 to vector<32x1xf32>
    %405 = arith.mulf %401, %404 : vector<32x1xf32>
    %406 = arith.mulf %403, %403 : vector<32x1xf32>
    %407 = arith.subf %405, %406 : vector<32x1xf32>
    %cst_226 = arith.constant 9.99999974E-6 : f32
    %408 = vector.broadcast %cst_226 : f32 to vector<32x1xf32>
    %409 = arith.addf %407, %408 : vector<32x1xf32>
    %410 = math.rsqrt %409 : vector<32x1xf32>
    %411 = arith.mulf %410, %394 : vector<32x1xf32>
    %412 = arith.mulf %403, %411 : vector<32x1xf32>
    %413 = arith.subf %396, %412 : vector<32x1xf32>
    %414 = vector.broadcast %411 : vector<32x1xf32> to vector<32x128xf32>
    %415 = arith.mulf %392, %414 : vector<32x128xf32>
    %416 = vector.broadcast %413 : vector<32x1xf32> to vector<32x128xf32>
    %417 = arith.addf %415, %416 : vector<32x128xf32>
    %cst_227 = arith.constant 0.000000e+00 : f32
    %418 = vector.broadcast %cst_227 : f32 to vector<32x128xf32>
    %419 = arith.maximumf %417, %418 : vector<32x128xf32>
    %c3_228 = arith.constant 3 : index
    %c0_229 = arith.constant 0 : index
    %c0_230 = arith.constant 0 : index
    %420 = vector.load %arg11[%c3_228, %c0_229, %c0_230] : memref<5x32x32xbf16, #tpu.memory_space<vmem>>, vector<1x32x32xbf16>
    %421 = vector.shape_cast %420 : vector<1x32x32xbf16> to vector<32x32xbf16>
    %422 = arith.truncf %419 : vector<32x128xf32> to vector<32x128xbf16>
    %cst_231 = arith.constant dense<0.000000e+00> : vector<32x128xf32>
    %423 = tpu.matmul %421, %422, %cst_231 {dimension_numbers = #tpu.dot_dimension_numbers<[1], [0], [0], [1], [0, 0, 1, 1], [], []>} : vector<32x32xbf16>, vector<32x128xbf16>, vector<32x128xf32> -> vector<32x128xf32>
    %c3_232 = arith.constant 3 : index
    %c0_233 = arith.constant 0 : index
    %c0_234 = arith.constant 0 : index
    %424 = vector.load %arg12[%c3_232, %c0_233, %c0_234] : memref<5x32x1xf32, #tpu.memory_space<vmem>>, vector<1x32x1xf32>
    %425 = vector.shape_cast %424 : vector<1x32x1xf32> to vector<32x1xf32>
    %426 = vector.broadcast %425 : vector<32x1xf32> to vector<32x128xf32>
    %427 = arith.addf %423, %426 : vector<32x128xf32>
    %c0_235 = arith.constant 0 : index
    %c0_236 = arith.constant 0 : index
    %428 = vector.load %arg22[%c0_235, %c0_236] : memref<32x128xf32, #tpu.memory_space<vmem>>, vector<32x128xf32>
    tpu.vector_store %arg22[%c0_235, %c0_236], %427 {strides = array<i32>} : memref<32x128xf32, #tpu.memory_space<vmem>>, vector<32x128xf32>,
    %c3_237 = arith.constant 3 : index
    %c0_238 = arith.constant 0 : index
    %c0_239 = arith.constant 0 : index
    %429 = vector.load %arg13[%c3_237, %c0_238, %c0_239] : memref<5x32x3xf32, #tpu.memory_space<vmem>>, vector<1x32x3xf32>
    %430 = vector.shape_cast %429 : vector<1x32x3xf32> to vector<32x3xf32>
    %c3_240 = arith.constant 3 : index
    %c0_241 = arith.constant 0 : index
    %c0_242 = arith.constant 0 : index
    %431 = vector.load %arg14[%c3_240, %c0_241, %c0_242] : memref<5x32x1xf32, #tpu.memory_space<vmem>>, vector<1x32x1xf32>
    %432 = vector.shape_cast %431 : vector<1x32x1xf32> to vector<32x1xf32>
    %c3_243 = arith.constant 3 : index
    %c0_244 = arith.constant 0 : index
    %c0_245 = arith.constant 0 : index
    %433 = vector.load %arg15[%c3_243, %c0_244, %c0_245] : memref<5x32x1xf32, #tpu.memory_space<vmem>>, vector<1x32x1xf32>
    %434 = vector.shape_cast %433 : vector<1x32x1xf32> to vector<32x1xf32>
    %435 = vector.broadcast %432 : vector<32x1xf32> to vector<32x128xf32>
    %436 = vector.broadcast %1 : vector<1x128xf32> to vector<32x128xf32>
    %437 = arith.mulf %435, %436 : vector<32x128xf32>
    %438 = vector.broadcast %434 : vector<32x1xf32> to vector<32x128xf32>
    %439 = arith.addf %437, %438 : vector<32x128xf32>
    %440 = vector.extract_strided_slice %430 {offsets = [0, 0], sizes = [32, 1], strides = [1, 1]} : vector<32x3xf32> to vector<32x1xf32>
    %441 = vector.extract_strided_slice %0 {offsets = [0, 0], sizes = [1, 128], strides = [1, 1]} : vector<3x128xf32> to vector<1x128xf32>
    %442 = vector.broadcast %440 : vector<32x1xf32> to vector<32x128xf32>
    %443 = vector.broadcast %441 : vector<1x128xf32> to vector<32x128xf32>
    %444 = arith.mulf %442, %443 : vector<32x128xf32>
    %445 = arith.addf %439, %444 : vector<32x128xf32>
    %446 = vector.extract_strided_slice %430 {offsets = [0, 1], sizes = [32, 1], strides = [1, 1]} : vector<32x3xf32> to vector<32x1xf32>
    %447 = vector.extract_strided_slice %0 {offsets = [1, 0], sizes = [1, 128], strides = [1, 1]} : vector<3x128xf32> to vector<1x128xf32>
    %448 = vector.broadcast %446 : vector<32x1xf32> to vector<32x128xf32>
    %449 = vector.broadcast %447 : vector<1x128xf32> to vector<32x128xf32>
    %450 = arith.mulf %448, %449 : vector<32x128xf32>
    %451 = arith.addf %445, %450 : vector<32x128xf32>
    %452 = vector.extract_strided_slice %430 {offsets = [0, 2], sizes = [32, 1], strides = [1, 1]} : vector<32x3xf32> to vector<32x1xf32>
    %453 = vector.extract_strided_slice %0 {offsets = [2, 0], sizes = [1, 128], strides = [1, 1]} : vector<3x128xf32> to vector<1x128xf32>
    %454 = vector.broadcast %452 : vector<32x1xf32> to vector<32x128xf32>
    %455 = vector.broadcast %453 : vector<1x128xf32> to vector<32x128xf32>
    %456 = arith.mulf %454, %455 : vector<32x128xf32>
    %457 = arith.addf %451, %456 : vector<32x128xf32>
    %c0_246 = arith.constant 0 : index
    %c0_247 = arith.constant 0 : index
    %458 = vector.load %arg21[%c0_246, %c0_247] : memref<32x128xf32, #tpu.memory_space<vmem>>, vector<32x128xf32>
    %c0_248 = arith.constant 0 : index
    %c0_249 = arith.constant 0 : index
    %459 = vector.load %arg22[%c0_248, %c0_249] : memref<32x128xf32, #tpu.memory_space<vmem>>, vector<32x128xf32>
    %460 = arith.addf %458, %459 : vector<32x128xf32>
    %461 = arith.addf %460, %457 : vector<32x128xf32>
    %c0_250 = arith.constant 0 : index
    %c0_251 = arith.constant 0 : index
    %462 = vector.load %arg21[%c0_250, %c0_251] : memref<32x128xf32, #tpu.memory_space<vmem>>, vector<32x128xf32>
    tpu.vector_store %arg21[%c0_250, %c0_251], %461 {strides = array<i32>} : memref<32x128xf32, #tpu.memory_space<vmem>>, vector<32x128xf32>,
    %c0_252 = arith.constant 0 : index
    %c0_253 = arith.constant 0 : index
    %463 = vector.load %arg21[%c0_252, %c0_253] : memref<32x128xf32, #tpu.memory_space<vmem>>, vector<32x128xf32>
    %c4 = arith.constant 4 : index
    %c0_254 = arith.constant 0 : index
    %c0_255 = arith.constant 0 : index
    %464 = vector.load %arg5[%c4, %c0_254, %c0_255] : memref<5x32x1xf32, #tpu.memory_space<vmem>>, vector<1x32x1xf32>
    %465 = vector.shape_cast %464 : vector<1x32x1xf32> to vector<32x1xf32>
    %c4_256 = arith.constant 4 : index
    %c0_257 = arith.constant 0 : index
    %c0_258 = arith.constant 0 : index
    %466 = vector.load %arg6[%c4_256, %c0_257, %c0_258] : memref<5x32x1xf32, #tpu.memory_space<vmem>>, vector<1x32x1xf32>
    %467 = vector.shape_cast %466 : vector<1x32x1xf32> to vector<32x1xf32>
    %cst_259 = arith.constant dense<0.000000e+00> : vector<32xf32>
    %468 = vector.multi_reduction <add>, %463, %cst_259 [1] : vector<32x128xf32> to vector<32xf32>
    %469 = vector.shape_cast %468 : vector<32xf32> to vector<32x1xf32>
    %470 = arith.mulf %463, %463 : vector<32x128xf32>
    %cst_260 = arith.constant dense<0.000000e+00> : vector<32xf32>
    %471 = vector.multi_reduction <add>, %470, %cst_260 [1] : vector<32x128xf32> to vector<32xf32>
    %472 = vector.shape_cast %471 : vector<32xf32> to vector<32x1xf32>
    %cst_261 = arith.constant 7.812500e-03 : f32
    %473 = vector.broadcast %cst_261 : f32 to vector<32x1xf32>
    %474 = arith.mulf %469, %473 : vector<32x1xf32>
    %cst_262 = arith.constant 7.812500e-03 : f32
    %475 = vector.broadcast %cst_262 : f32 to vector<32x1xf32>
    %476 = arith.mulf %472, %475 : vector<32x1xf32>
    %477 = arith.mulf %474, %474 : vector<32x1xf32>
    %478 = arith.subf %476, %477 : vector<32x1xf32>
    %cst_263 = arith.constant 9.99999974E-6 : f32
    %479 = vector.broadcast %cst_263 : f32 to vector<32x1xf32>
    %480 = arith.addf %478, %479 : vector<32x1xf32>
    %481 = math.rsqrt %480 : vector<32x1xf32>
    %482 = arith.mulf %481, %465 : vector<32x1xf32>
    %483 = arith.mulf %474, %482 : vector<32x1xf32>
    %484 = arith.subf %467, %483 : vector<32x1xf32>
    %485 = vector.broadcast %482 : vector<32x1xf32> to vector<32x128xf32>
    %486 = arith.mulf %463, %485 : vector<32x128xf32>
    %487 = vector.broadcast %484 : vector<32x1xf32> to vector<32x128xf32>
    %488 = arith.addf %486, %487 : vector<32x128xf32>
    %cst_264 = arith.constant 0.000000e+00 : f32
    %489 = vector.broadcast %cst_264 : f32 to vector<32x128xf32>
    %490 = arith.maximumf %488, %489 : vector<32x128xf32>
    %c4_265 = arith.constant 4 : index
    %c0_266 = arith.constant 0 : index
    %c0_267 = arith.constant 0 : index
    %491 = vector.load %arg9[%c4_265, %c0_266, %c0_267] : memref<5x32x32xbf16, #tpu.memory_space<vmem>>, vector<1x32x32xbf16>
    %492 = vector.shape_cast %491 : vector<1x32x32xbf16> to vector<32x32xbf16>
    %493 = arith.truncf %490 : vector<32x128xf32> to vector<32x128xbf16>
    %cst_268 = arith.constant dense<0.000000e+00> : vector<32x128xf32>
    %494 = tpu.matmul %492, %493, %cst_268 {dimension_numbers = #tpu.dot_dimension_numbers<[1], [0], [0], [1], [0, 0, 1, 1], [], []>} : vector<32x32xbf16>, vector<32x128xbf16>, vector<32x128xf32> -> vector<32x128xf32>
    %c4_269 = arith.constant 4 : index
    %c0_270 = arith.constant 0 : index
    %c0_271 = arith.constant 0 : index
    %495 = vector.load %arg10[%c4_269, %c0_270, %c0_271] : memref<5x32x1xf32, #tpu.memory_space<vmem>>, vector<1x32x1xf32>
    %496 = vector.shape_cast %495 : vector<1x32x1xf32> to vector<32x1xf32>
    %497 = vector.broadcast %496 : vector<32x1xf32> to vector<32x128xf32>
    %498 = arith.addf %494, %497 : vector<32x128xf32>
    %c0_272 = arith.constant 0 : index
    %c0_273 = arith.constant 0 : index
    %499 = vector.load %arg22[%c0_272, %c0_273] : memref<32x128xf32, #tpu.memory_space<vmem>>, vector<32x128xf32>
    tpu.vector_store %arg22[%c0_272, %c0_273], %498 {strides = array<i32>} : memref<32x128xf32, #tpu.memory_space<vmem>>, vector<32x128xf32>,
    %c0_274 = arith.constant 0 : index
    %c0_275 = arith.constant 0 : index
    %500 = vector.load %arg22[%c0_274, %c0_275] : memref<32x128xf32, #tpu.memory_space<vmem>>, vector<32x128xf32>
    %c4_276 = arith.constant 4 : index
    %c0_277 = arith.constant 0 : index
    %c0_278 = arith.constant 0 : index
    %501 = vector.load %arg7[%c4_276, %c0_277, %c0_278] : memref<5x32x1xf32, #tpu.memory_space<vmem>>, vector<1x32x1xf32>
    %502 = vector.shape_cast %501 : vector<1x32x1xf32> to vector<32x1xf32>
    %c4_279 = arith.constant 4 : index
    %c0_280 = arith.constant 0 : index
    %c0_281 = arith.constant 0 : index
    %503 = vector.load %arg8[%c4_279, %c0_280, %c0_281] : memref<5x32x1xf32, #tpu.memory_space<vmem>>, vector<1x32x1xf32>
    %504 = vector.shape_cast %503 : vector<1x32x1xf32> to vector<32x1xf32>
    %cst_282 = arith.constant dense<0.000000e+00> : vector<32xf32>
    %505 = vector.multi_reduction <add>, %500, %cst_282 [1] : vector<32x128xf32> to vector<32xf32>
    %506 = vector.shape_cast %505 : vector<32xf32> to vector<32x1xf32>
    %507 = arith.mulf %500, %500 : vector<32x128xf32>
    %cst_283 = arith.constant dense<0.000000e+00> : vector<32xf32>
    %508 = vector.multi_reduction <add>, %507, %cst_283 [1] : vector<32x128xf32> to vector<32xf32>
    %509 = vector.shape_cast %508 : vector<32xf32> to vector<32x1xf32>
    %cst_284 = arith.constant 7.812500e-03 : f32
    %510 = vector.broadcast %cst_284 : f32 to vector<32x1xf32>
    %511 = arith.mulf %506, %510 : vector<32x1xf32>
    %cst_285 = arith.constant 7.812500e-03 : f32
    %512 = vector.broadcast %cst_285 : f32 to vector<32x1xf32>
    %513 = arith.mulf %509, %512 : vector<32x1xf32>
    %514 = arith.mulf %511, %511 : vector<32x1xf32>
    %515 = arith.subf %513, %514 : vector<32x1xf32>
    %cst_286 = arith.constant 9.99999974E-6 : f32
    %516 = vector.broadcast %cst_286 : f32 to vector<32x1xf32>
    %517 = arith.addf %515, %516 : vector<32x1xf32>
    %518 = math.rsqrt %517 : vector<32x1xf32>
    %519 = arith.mulf %518, %502 : vector<32x1xf32>
    %520 = arith.mulf %511, %519 : vector<32x1xf32>
    %521 = arith.subf %504, %520 : vector<32x1xf32>
    %522 = vector.broadcast %519 : vector<32x1xf32> to vector<32x128xf32>
    %523 = arith.mulf %500, %522 : vector<32x128xf32>
    %524 = vector.broadcast %521 : vector<32x1xf32> to vector<32x128xf32>
    %525 = arith.addf %523, %524 : vector<32x128xf32>
    %cst_287 = arith.constant 0.000000e+00 : f32
    %526 = vector.broadcast %cst_287 : f32 to vector<32x128xf32>
    %527 = arith.maximumf %525, %526 : vector<32x128xf32>
    %c4_288 = arith.constant 4 : index
    %c0_289 = arith.constant 0 : index
    %c0_290 = arith.constant 0 : index
    %528 = vector.load %arg11[%c4_288, %c0_289, %c0_290] : memref<5x32x32xbf16, #tpu.memory_space<vmem>>, vector<1x32x32xbf16>
    %529 = vector.shape_cast %528 : vector<1x32x32xbf16> to vector<32x32xbf16>
    %530 = arith.truncf %527 : vector<32x128xf32> to vector<32x128xbf16>
    %cst_291 = arith.constant dense<0.000000e+00> : vector<32x128xf32>
    %531 = tpu.matmul %529, %530, %cst_291 {dimension_numbers = #tpu.dot_dimension_numbers<[1], [0], [0], [1], [0, 0, 1, 1], [], []>} : vector<32x32xbf16>, vector<32x128xbf16>, vector<32x128xf32> -> vector<32x128xf32>
    %c4_292 = arith.constant 4 : index
    %c0_293 = arith.constant 0 : index
    %c0_294 = arith.constant 0 : index
    %532 = vector.load %arg12[%c4_292, %c0_293, %c0_294] : memref<5x32x1xf32, #tpu.memory_space<vmem>>, vector<1x32x1xf32>
    %533 = vector.shape_cast %532 : vector<1x32x1xf32> to vector<32x1xf32>
    %534 = vector.broadcast %533 : vector<32x1xf32> to vector<32x128xf32>
    %535 = arith.addf %531, %534 : vector<32x128xf32>
    %c0_295 = arith.constant 0 : index
    %c0_296 = arith.constant 0 : index
    %536 = vector.load %arg22[%c0_295, %c0_296] : memref<32x128xf32, #tpu.memory_space<vmem>>, vector<32x128xf32>
    tpu.vector_store %arg22[%c0_295, %c0_296], %535 {strides = array<i32>} : memref<32x128xf32, #tpu.memory_space<vmem>>, vector<32x128xf32>,
    %c4_297 = arith.constant 4 : index
    %c0_298 = arith.constant 0 : index
    %c0_299 = arith.constant 0 : index
    %537 = vector.load %arg13[%c4_297, %c0_298, %c0_299] : memref<5x32x3xf32, #tpu.memory_space<vmem>>, vector<1x32x3xf32>
    %538 = vector.shape_cast %537 : vector<1x32x3xf32> to vector<32x3xf32>
    %c4_300 = arith.constant 4 : index
    %c0_301 = arith.constant 0 : index
    %c0_302 = arith.constant 0 : index
    %539 = vector.load %arg14[%c4_300, %c0_301, %c0_302] : memref<5x32x1xf32, #tpu.memory_space<vmem>>, vector<1x32x1xf32>
    %540 = vector.shape_cast %539 : vector<1x32x1xf32> to vector<32x1xf32>
    %c4_303 = arith.constant 4 : index
    %c0_304 = arith.constant 0 : index
    %c0_305 = arith.constant 0 : index
    %541 = vector.load %arg15[%c4_303, %c0_304, %c0_305] : memref<5x32x1xf32, #tpu.memory_space<vmem>>, vector<1x32x1xf32>
    %542 = vector.shape_cast %541 : vector<1x32x1xf32> to vector<32x1xf32>
    %543 = vector.broadcast %540 : vector<32x1xf32> to vector<32x128xf32>
    %544 = vector.broadcast %1 : vector<1x128xf32> to vector<32x128xf32>
    %545 = arith.mulf %543, %544 : vector<32x128xf32>
    %546 = vector.broadcast %542 : vector<32x1xf32> to vector<32x128xf32>
    %547 = arith.addf %545, %546 : vector<32x128xf32>
    %548 = vector.extract_strided_slice %538 {offsets = [0, 0], sizes = [32, 1], strides = [1, 1]} : vector<32x3xf32> to vector<32x1xf32>
    %549 = vector.extract_strided_slice %0 {offsets = [0, 0], sizes = [1, 128], strides = [1, 1]} : vector<3x128xf32> to vector<1x128xf32>
    %550 = vector.broadcast %548 : vector<32x1xf32> to vector<32x128xf32>
    %551 = vector.broadcast %549 : vector<1x128xf32> to vector<32x128xf32>
    %552 = arith.mulf %550, %551 : vector<32x128xf32>
    %553 = arith.addf %547, %552 : vector<32x128xf32>
    %554 = vector.extract_strided_slice %538 {offsets = [0, 1], sizes = [32, 1], strides = [1, 1]} : vector<32x3xf32> to vector<32x1xf32>
    %555 = vector.extract_strided_slice %0 {offsets = [1, 0], sizes = [1, 128], strides = [1, 1]} : vector<3x128xf32> to vector<1x128xf32>
    %556 = vector.broadcast %554 : vector<32x1xf32> to vector<32x128xf32>
    %557 = vector.broadcast %555 : vector<1x128xf32> to vector<32x128xf32>
    %558 = arith.mulf %556, %557 : vector<32x128xf32>
    %559 = arith.addf %553, %558 : vector<32x128xf32>
    %560 = vector.extract_strided_slice %538 {offsets = [0, 2], sizes = [32, 1], strides = [1, 1]} : vector<32x3xf32> to vector<32x1xf32>
    %561 = vector.extract_strided_slice %0 {offsets = [2, 0], sizes = [1, 128], strides = [1, 1]} : vector<3x128xf32> to vector<1x128xf32>
    %562 = vector.broadcast %560 : vector<32x1xf32> to vector<32x128xf32>
    %563 = vector.broadcast %561 : vector<1x128xf32> to vector<32x128xf32>
    %564 = arith.mulf %562, %563 : vector<32x128xf32>
    %565 = arith.addf %559, %564 : vector<32x128xf32>
    %c0_306 = arith.constant 0 : index
    %c0_307 = arith.constant 0 : index
    %566 = vector.load %arg21[%c0_306, %c0_307] : memref<32x128xf32, #tpu.memory_space<vmem>>, vector<32x128xf32>
    %c0_308 = arith.constant 0 : index
    %c0_309 = arith.constant 0 : index
    %567 = vector.load %arg22[%c0_308, %c0_309] : memref<32x128xf32, #tpu.memory_space<vmem>>, vector<32x128xf32>
    %568 = arith.addf %566, %567 : vector<32x128xf32>
    %569 = arith.addf %568, %565 : vector<32x128xf32>
    %c0_310 = arith.constant 0 : index
    %c0_311 = arith.constant 0 : index
    %570 = vector.load %arg21[%c0_310, %c0_311] : memref<32x128xf32, #tpu.memory_space<vmem>>, vector<32x128xf32>
    tpu.vector_store %arg21[%c0_310, %c0_311], %569 {strides = array<i32>} : memref<32x128xf32, #tpu.memory_space<vmem>>, vector<32x128xf32>,
    %c0_312 = arith.constant 0 : index
    %c0_313 = arith.constant 0 : index
    %571 = vector.load %arg21[%c0_312, %c0_313] : memref<32x128xf32, #tpu.memory_space<vmem>>, vector<32x128xf32>
    %c0_314 = arith.constant 0 : index
    %c0_315 = arith.constant 0 : index
    %572 = vector.load %arg16[%c0_314, %c0_315] : memref<32x1xf32, #tpu.memory_space<vmem>>, vector<32x1xf32>
    %c0_316 = arith.constant 0 : index
    %c0_317 = arith.constant 0 : index
    %573 = vector.load %arg17[%c0_316, %c0_317] : memref<32x1xf32, #tpu.memory_space<vmem>>, vector<32x1xf32>
    %cst_318 = arith.constant dense<0.000000e+00> : vector<32xf32>
    %574 = vector.multi_reduction <add>, %571, %cst_318 [1] : vector<32x128xf32> to vector<32xf32>
    %575 = vector.shape_cast %574 : vector<32xf32> to vector<32x1xf32>
    %576 = arith.mulf %571, %571 : vector<32x128xf32>
    %cst_319 = arith.constant dense<0.000000e+00> : vector<32xf32>
    %577 = vector.multi_reduction <add>, %576, %cst_319 [1] : vector<32x128xf32> to vector<32xf32>
    %578 = vector.shape_cast %577 : vector<32xf32> to vector<32x1xf32>
    %cst_320 = arith.constant 7.812500e-03 : f32
    %579 = vector.broadcast %cst_320 : f32 to vector<32x1xf32>
    %580 = arith.mulf %575, %579 : vector<32x1xf32>
    %cst_321 = arith.constant 7.812500e-03 : f32
    %581 = vector.broadcast %cst_321 : f32 to vector<32x1xf32>
    %582 = arith.mulf %578, %581 : vector<32x1xf32>
    %583 = arith.mulf %580, %580 : vector<32x1xf32>
    %584 = arith.subf %582, %583 : vector<32x1xf32>
    %cst_322 = arith.constant 9.99999974E-6 : f32
    %585 = vector.broadcast %cst_322 : f32 to vector<32x1xf32>
    %586 = arith.addf %584, %585 : vector<32x1xf32>
    %587 = math.rsqrt %586 : vector<32x1xf32>
    %588 = arith.mulf %587, %572 : vector<32x1xf32>
    %589 = arith.mulf %580, %588 : vector<32x1xf32>
    %590 = arith.subf %573, %589 : vector<32x1xf32>
    %591 = vector.broadcast %588 : vector<32x1xf32> to vector<32x128xf32>
    %592 = arith.mulf %571, %591 : vector<32x128xf32>
    %593 = vector.broadcast %590 : vector<32x1xf32> to vector<32x128xf32>
    %594 = arith.addf %592, %593 : vector<32x128xf32>
    %cst_323 = arith.constant 0.000000e+00 : f32
    %595 = vector.broadcast %cst_323 : f32 to vector<32x128xf32>
    %596 = arith.maximumf %594, %595 : vector<32x128xf32>
    %c0_324 = arith.constant 0 : index
    %c0_325 = arith.constant 0 : index
    %597 = vector.load %arg18[%c0_324, %c0_325] : memref<3x32xbf16, #tpu.memory_space<vmem>>, vector<3x32xbf16>
    %598 = arith.truncf %596 : vector<32x128xf32> to vector<32x128xbf16>
    %cst_326 = arith.constant dense<0.000000e+00> : vector<3x128xf32>
    %599 = tpu.matmul %597, %598, %cst_326 {dimension_numbers = #tpu.dot_dimension_numbers<[1], [0], [0], [1], [0, 0, 1, 1], [], []>} : vector<3x32xbf16>, vector<32x128xbf16>, vector<3x128xf32> -> vector<3x128xf32>
    %c0_327 = arith.constant 0 : index
    %c0_328 = arith.constant 0 : index
    %600 = vector.load %arg19[%c0_327, %c0_328] : memref<3x1xf32, #tpu.memory_space<vmem>>, vector<3x1xf32>
    %601 = vector.broadcast %600 : vector<3x1xf32> to vector<3x128xf32>
    %602 = arith.addf %599, %601 : vector<3x128xf32>
    %c0_329 = arith.constant 0 : index
    %c0_330 = arith.constant 0 : index
    %603 = vector.load %arg20[%c0_329, %c0_330] : memref<3x128xf32, #tpu.memory_space<vmem>>, vector<3x128xf32>
    tpu.vector_store %arg20[%c0_329, %c0_330], %602 {strides = array<i32>} : memref<3x128xf32, #tpu.memory_space<vmem>>, vector<3x128xf32>,
    return
  }
}

</mosaic_0001>

<bundles_post_ra>
// kernel: tpu_custom_call.1
= control target key start
LH: loop header
LB: loop body
LE: loop exit
PB: predicated region body
PF: predicated region fallthrough
CT: control target
= control target key end

     0   :  { %s5251_s0 = inlined_call_operand.vmem [shape: f32[3,128], index: 0, kind: input, shape index: {}]   ;;  %s5252_s1 = inlined_call_operand.vmem [shape: f32[1,128], index: 1, kind: input, shape index: {}]   ;;  %s5253_s2 = inlined_call_operand.vmem [shape: f32[32,3], index: 2, kind: input, shape index: {}]   ;;  %s5254_s3 = inlined_call_operand.vmem [shape: f32[32,1], index: 3, kind: input, shape index: {}]   ;;  %s5255_s4 = inlined_call_operand.vmem [shape: f32[32,1], index: 4, kind: input, shape index: {}]   ;;  %s5256_s5 = inlined_call_operand.vmem [shape: f32[5,32,1], index: 5, kind: input, shape index: {}]   ;;  %s5257_s6 = inlined_call_operand.vmem [shape: f32[5,32,1], index: 6, kind: input, shape index: {}]   ;;  %s5258_s7 = inlined_call_operand.vmem [shape: f32[5,32,1], index: 7, kind: input, shape index: {}]   ;;  %s5259_s8 = inlined_call_operand.vmem [shape: f32[5,32,1], index: 8, kind: input, shape index: {}]   ;;  %s5260_s9 = inlined_call_operand.vmem [shape: bf16[5,32,32], index: 9, kind: input, shape index: {}]   ;;  %s5261_s10 = inlined_call_operand.vmem [shape: f32[5,32,1], index: 10, kind: input, shape index: {}]   ;;  %s5262_s11 = inlined_call_operand.vmem [shape: bf16[5,32,32], index: 11, kind: input, shape index: {}]   ;;  %s5263_s12 = inlined_call_operand.vmem [shape: f32[5,32,1], index: 12, kind: input, shape index: {}]   ;;  %s5264_s13 = inlined_call_operand.vmem [shape: f32[5,32,3], index: 13, kind: input, shape index: {}]   ;;  %s5265_s14 = inlined_call_operand.vmem [shape: f32[5,32,1], index: 14, kind: input, shape index: {}]   ;;  %s5266_s15 = inlined_call_operand.vmem [shape: f32[5,32,1], index: 15, kind: input, shape index: {}]   ;;  %s5267_s16 = inlined_call_operand.vmem [shape: f32[32,1], index: 16, kind: input, shape index: {}]   ;;  %s5268_s17 = inlined_call_operand.vmem [shape: f32[32,1], index: 17, kind: input, shape index: {}]   ;;  %s5269_s18 = inlined_call_operand.vmem [shape: bf16[3,32], index: 18, kind: input, shape index: {}]   ;;  %s5270_s19 = inlined_call_operand.vmem [shape: f32[3,1], index: 19, kind: input, shape index: {}]   ;;  %s5271_s20 = inlined_call_operand.hbm [shape: f32[3,128], index: 20, kind: output, shape index: {}]  }
   0x1   :  { %5277 = sst [smem:[#allocation7_spill]] %s5251_s0 }
   0x2   :  { %5278 = sst [smem:[#allocation8_spill]] %s5252_s1 }
   0x3   :  { %5279 = sst [smem:[#allocation9_spill]] %s5253_s2 }
   0x4   :  { %5280 = sst [smem:[#allocation10_spill]] %s5254_s3 }
   0x5   :  { %5281 = sst [smem:[#allocation11_spill]] %s5255_s4 }
   0x6   :  { %5282 = sst [smem:[#allocation12_spill]] %s5263_s12 }
   0x7   :  { %s5283_s23 = sld [smem:[#allocation11_spill]]  ;;  %v3983_v2 = vmov 0   ;;  %v3984_v10 = vmov 1  }
   0x8   :  { %s5284_s12 = sld [smem:[#allocation10_spill]]  ;;  %3789 = vset.pattern.permute.xlu1 %v3983_v2  ;;  %3788 = vset.pattern.permute.xlu0 %v3983_v2 }
   0x9   :  { %s5285_s29 = sld [smem:[#allocation9_spill]] }
   0xd   :  { %v79_v0 = vld [vmem:[%s5283_s23 + $0x10] sm:$0xff]  ;;  %v80_v3 = vld [vmem:[%s5283_s23 + $0x18] sm:$0xff]  ;;  %v78_v9 = vld [vmem:[%s5283_s23 + $0x8] sm:$0xff] }
   0xe   :  { %v75_v1 = vld [vmem:[%s5284_s12 + $0x10] sm:$0xff]  ;;  %123 = vperm.xlu1 %3789, %v79_v0   ;;  %v76_v4 = vld [vmem:[%s5284_s12 + $0x18] sm:$0xff]  ;;  %v74_v7 = vld [vmem:[%s5284_s12 + $0x8] sm:$0xff] }
   0xf   :  { %93 = vperm.xlu0 %3788, %v75_v1   ;;  %v72_v5 = vld [vmem:[%s5285_s29 + $0x18] sm:$0xff]  ;;  %v71_v6 = vld [vmem:[%s5285_s29 + $0x10] sm:$0xff]  ;;  %v73_v8 = vld [vmem:[%s5284_s12] sm:$0xff] }
  0x12   :  { %128 = vperm.xlu1 %3789, %v80_v3  }
  0x13   :  { %98 = vperm.xlu0 %3788, %v76_v4  }
  0x16   :  { %152 = vperm.xlu1 %3789, %v72_v5  }
  0x17   :  { %147 = vperm.xlu0 %3788, %v71_v6  }
  0x1a   :  { %88 = vperm.xlu1 %3789, %v74_v7  }
  0x1b   :  { %83 = vperm.xlu0 %3788, %v73_v8  }
  0x1e   :  { %3790 = vset.pattern.permute.xlu1 %v3984_v10 }
  0x1f   :  { %118 = vperm.xlu0 %3788, %v78_v9  }
  0x20   :  { %25 = vsyncpa [#allocation5], 0  ;;  %180 = vperm.xlu1 %3790, %v72_v5   ;;  %v77_v11 = vld [vmem:[%s5283_s23] sm:$0xff]  ;;  %v3985_v12 = vmov 2   ;;  %v70_v14 = vld [vmem:[%s5285_s29 + $0x8] sm:$0xff]  ;;  %v155_v19 = vlaneseq  ;;  %s5286_s30 = sld [smem:[#allocation7_spill]] }
  0x21   :  { %v69_v13 = vld [vmem:[%s5285_s29] sm:$0xff]  ;;  %s5287_s1 = sld [smem:[#allocation8_spill]]  ;;  %vm391_vm0 = vcmask 261120   ;;  %vm3987_vm1 = vmmov 0   ;;  %s3988_s28 = smov [#allocation4]  }
  0x22   :  { %v156_v22 = vshrl.u32 %v155_v19, 7  ;;  %s5288_s2 = sld [smem:[#allocation12_spill]]  ;;  %s3425_s4 = sshll.u32 %s3988_s28, 4  ;;  %s3426_s4 = int_to_ptr.vmem [resolvable:$true] %s3425_s4 }
  0x23   :  { %3792 = vset.pattern.permute.xlu0 %v3985_v12  ;;  %s3961_s23 = scalar_lea.vmem %s3426_s4, 64  ;;  %p3966_p1 = scmp.lt.s32.totalorder %s3426_s4, %s3426_s4 }
  0x24   :  { %3791 = vset.pattern.permute.xlu1 %v3983_v2  ;;  %204 = vperm.xlu0 %3792, %v71_v6   ;;  %v157_v25 = vsub.s32 0, %v156_v22  ;;  %v213_v31 = vsub.s32 2, %v156_v22  ;;  %v185_v33 = vsub.s32 1, %v156_v22  ;;  %p3962_p0 = scmp.ne.s32.totalorder %s3426_s4, %s3961_s23  ;;  %p3967_p2 = scmp.lt.s32.totalorder %s3961_s23, %s3961_s23 }
  0x25   :  { %113 = vperm.xlu1 %3791, %v77_v11  }
  0x26   :  { %v67_v26 = vld [vmem:[%s5286_s30] sm:$0x7]  ;;  %p3968_p3 = por %p3967_p2, %p3966_p1 }
  0x27   :  { %v4147_v29 = vld [vmem:[%s5287_s1] ss:$0 sm:$0xff]  ;;  %v4149_v30 = vrot.slane %v67_v26, %v157_v25  ;;  %v4153_v37 = vrot.slane %v67_v26, %v213_v31  ;;  %v4155_v39 = vrot.slane %v67_v26, %v185_v33 }
  0x28   :  { %3793 = vset.pattern.permute.xlu0 %v3984_v10  ;;  %p3969_p4 = pnand %p3968_p3, %p3962_p0 }
  0x29   :  { %176 = vperm.xlu0 %3793, %v71_v6   ;;  %137 = vperm.xlu1 %3791, %v69_v13  }
  0x2d   :  { %142 = vperm.xlu1 %3791, %v70_v14   ;;  %172 = vperm.xlu0 %3793, %v70_v14  }
  0x31   :  { %3794 = vset.pattern.permute.xlu1 %v3985_v12  ;;  %3798 = vset.pattern.permute.xlu0 %v3983_v2 }
  0x32   :  { %208 = vperm.xlu1 %3794, %v72_v5  }
  0x36   :  { %3795 = vset.pattern.permute.xlu1 %v3984_v10 }
  0x37   :  { %168 = vperm.xlu1 %3795, %v69_v13  }
  0x3b   :  { %3796 = vset.pattern.permute.xlu1 %v3985_v12 }
  0x3c   :  { %196 = vperm.xlu1 %3796, %v69_v13  }
  0x40   :  { %200 = vperm.xlu1 %3796, %v70_v14  }
  0x44   :  { %3797 = vset.pattern.permute.xlu1 %v3983_v2 }
  0x89   :  { %v124_v15 = vpop.permute.xlu1 %123 }
  0x8a   :  { %v94_v16 = vpop.permute.xlu0 %93 }
  0x8b   :  { %v109_v32 = vmul.f32 %v4147_v29, %v94_v16 }
  0x8d   :  { %v129_v17 = vpop.permute.xlu1 %128  ;;  %v133_v38 = vadd.f32 %v124_v15, %v109_v32 }
  0x8e   :  { %v99_v18 = vpop.permute.xlu0 %98 }
  0x8f   :  { %v110_v45 = vmul.f32 %v4147_v29, %v99_v18 }
  0x91   :  { %v153_v20 = vpop.permute.xlu1 %152  ;;  %v134_v50 = vadd.f32 %v129_v17, %v110_v45 }
  0x92   :  { %v148_v21 = vpop.permute.xlu0 %147  ;;  %v162_v47 = vmul.f32 %v4149_v30, %v153_v20 }
  0x93   :  { %v161_v36 = vmul.f32 %v4149_v30, %v148_v21 }
  0x94   :  { %v166_v53 = vadd.f32 %v162_v47, %v134_v50 }
  0x95   :  { %v89_v23 = vpop.permute.xlu1 %88  ;;  %v165_v42 = vadd.f32 %v161_v36, %v133_v38 }
  0x96   :  { %v84_v24 = vpop.permute.xlu0 %83  ;;  %v108_v62 = vmul.f32 %v4147_v29, %v89_v23 }
  0x97   :  { %v107_v58 = vmul.f32 %v4147_v29, %v84_v24 }
  0x9a   :  { %v119_v27 = vpop.permute.xlu0 %118 }
  0x9b   :  { %v181_v28 = vpop.permute.xlu1 %180  ;;  %v132_v4 = vadd.f32 %v119_v27, %v108_v62  ;;  %v238_v62 = vld [vmem:[%s5256_s5 + $0x18] sm:$0xff] }
  0x9c   :  { %v190_v51 = vmul.f32 %v4155_v39, %v181_v28 }
  0x9e   :  { %v194_v55 = vadd.f32 %v190_v51, %v166_v53 }
  0x9f   :  { %v205_v34 = vpop.permute.xlu0 %204 }
  0xa0   :  { %v114_v35 = vpop.permute.xlu1 %113  ;;  %v217_v43 = vmul.f32 %v4153_v37, %v205_v34 }
  0xa1   :  { %v131_v63 = vadd.f32 %v114_v35, %v107_v58 }
  0xa4   :  { %v177_v40 = vpop.permute.xlu0 %176  ;;  %v138_v41 = vpop.permute.xlu1 %137 }
  0xa5   :  { %v189_v44 = vmul.f32 %v4155_v39, %v177_v40  ;;  %v159_v59 = vmul.f32 %v4149_v30, %v138_v41 }
  0xa7   :  { %v193_v46 = vadd.f32 %v189_v44, %v165_v42  ;;  %v163_v5 = vadd.f32 %v159_v59, %v131_v63  ;;  %v235_v63 = vld [vmem:[%s5256_s5] sm:$0xff] }
  0xa8   :  { %v143_v48 = vpop.permute.xlu1 %142  ;;  %v173_v3 = vpop.permute.xlu0 %172 }
  0xa9   :  { %v221_v49 = vadd.f32 %v217_v43, %v193_v46  ;;  %v160_v0 = vmul.f32 %v4149_v30, %v143_v48  ;;  %v188_v8 = vmul.f32 %v4155_v39, %v173_v3 }
  0xab   :  { %v4162_v52 = vmax.f32 %v221_v49, 0.0  ;;  %v164_v7 = vadd.f32 %v160_v0, %v132_v4  ;;  %v236_v4 = vld [vmem:[%s5256_s5 + $0x8] sm:$0xff] }
  0xad   :  { %v209_v54 = vpop.permute.xlu1 %208  ;;  %247 = vadd.xlane.f32.xlu0 %v4162_v52  ;;  %v192_v15 = vadd.f32 %v188_v8, %v164_v7  ;;  %v253_v21 = vmul.f32 %v4162_v52, %v4162_v52 }
  0xae   :  { %v218_v56 = vmul.f32 %v4153_v37, %v209_v54 }
  0xb0   :  { %v222_v57 = vadd.f32 %v218_v56, %v194_v55 }
  0xb2   :  { %v4168_v60 = vmax.f32 %v222_v57, 0.0  ;;  %v169_v61 = vpop.permute.xlu1 %168  ;;  %v237_v57 = vld [vmem:[%s5256_s5 + $0x10] sm:$0xff] }
  0xb3   :  { %v187_v1 = vmul.f32 %v4155_v39, %v169_v61 }
  0xb4   :  { %249 = vadd.xlane.f32.xlu1 %v4168_v60  ;;  %v254_v22 = vmul.f32 %v4168_v60, %v4168_v60 }
  0xb5   :  { %v191_v9 = vadd.f32 %v187_v1, %v163_v5 }
  0xb7   :  { %v197_v6 = vpop.permute.xlu1 %196 }
  0xb8   :  { %v215_v11 = vmul.f32 %v4153_v37, %v197_v6  ;;  %v357_v6 = vld [vmem:[%s5261_s10] sm:$0xff] }
  0xba   :  { %v219_v13 = vadd.f32 %v215_v11, %v191_v9  ;;  %v241_v9 = vld [vmem:[%s5257_s6 + $0x10] sm:$0xff] }
  0xbb   :  { %v201_v14 = vpop.permute.xlu1 %200 }
  0xbc   :  { %v4176_v16 = vmax.f32 %v219_v13, 0.0  ;;  %v216_v17 = vmul.f32 %v4153_v37, %v201_v14  ;;  %v242_v14 = vld [vmem:[%s5257_s6 + $0x18] sm:$0xff] }
  0xbe   :  { %v220_v18 = vadd.f32 %v216_v17, %v192_v15  ;;  %243 = vadd.xlane.f32.xlu1 %v4176_v16  ;;  %v251_v20 = vmul.f32 %v4176_v16, %v4176_v16 }
  0xc0   :  { %v4180_v19 = vmax.f32 %v220_v18, 0.0  ;;  %v239_v18 = vld [vmem:[%s5257_s6] sm:$0xff] }
  0xc2   :  { %245 = vadd.xlane.f32.xlu0 %v4180_v19  ;;  %255 = vadd.xlane.f32.xlu1 %v251_v20  ;;  %v252_v23 = vmul.f32 %v4180_v19, %v4180_v19 }
  0xc6   :  { %259 = vadd.xlane.f32.xlu0 %v253_v21 }
  0xca   :  { %261 = vadd.xlane.f32.xlu0 %v254_v22  ;;  %v240_v22 = vld [vmem:[%s5257_s6 + $0x8] sm:$0xff] }
  0xce   :  { %257 = vadd.xlane.f32.xlu0 %v252_v23 }
 0x136   :  { %v248_v25 = vpop.xlane.xlu0 %247 }
 0x137   :  { %v265_v32 = vmul.f32 0.0078125, %v248_v25  ;;  %v3851_v25 = vld [vmem:[%s5260_s9] sm:$0xff]  }
 0x138   :  { %3698 = vmatprep.mubr.msk.bf16.mxu0 %vm391_vm0, %v3851_v25 }
 0x139   :  { %v273_v38 = vmul.f32 %v265_v32, %v265_v32 }
 0x13d   :  { %v250_v24 = vpop.xlane.xlu1 %249 }
 0x13e   :  { %v266_v35 = vmul.f32 0.0078125, %v250_v24  ;;  %v359_v24 = vld [vmem:[%s5261_s10 + $0x10] sm:$0xff] }
 0x140   :  { %v274_v43 = vmul.f32 %v266_v35, %v266_v35 }
 0x147   :  { %v244_v26 = vpop.xlane.xlu1 %243 }
 0x148   :  { %v263_v27 = vmul.f32 0.0078125, %v244_v26  ;;  %v360_v26 = vld [vmem:[%s5261_s10 + $0x18] sm:$0xff] }
 0x14a   :  { %v271_v34 = vmul.f32 %v263_v27, %v263_v27 }
 0x14b   :  { %v246_v28 = vpop.xlane.xlu0 %245  ;;  %v256_v31 = vpop.xlane.xlu1 %255 }
 0x14c   :  { %v267_v33 = vmul.f32 0.0078125, %v256_v31  ;;  %v264_v45 = vmul.f32 0.0078125, %v246_v28 }
 0x14e   :  { %v275_v40 = vsub.f32 %v267_v33, %v271_v34  ;;  %v272_v51 = vmul.f32 %v264_v45, %v264_v45 }
 0x14f   :  { %v260_v36 = vpop.xlane.xlu0 %259 }
 0x150   :  { %v269_v41 = vmul.f32 0.0078125, %v260_v36  ;;  %v279_v46 = vadd.f32 1e-05, %v275_v40 }
 0x152   :  { %v277_v42 = vsub.f32 %v269_v41, %v273_v38 }
 0x153   :  { %v262_v44 = vpop.xlane.xlu0 %261 }
 0x154   :  { %v281_v47 = vadd.f32 1e-05, %v277_v42  ;;  %v270_v48 = vmul.f32 0.0078125, %v262_v44 }
 0x156   :  { %3871 = vrsqrt.f32 %v281_v47  ;;  %v278_v49 = vsub.f32 %v270_v48, %v274_v43 }
 0x157   :  { %v258_v50 = vpop.xlane.xlu0 %257  ;;  %3873 = vrsqrt.f32 %v279_v46 }
 0x158   :  { %v282_v53 = vadd.f32 1e-05, %v278_v49  ;;  %v268_v54 = vmul.f32 0.0078125, %v258_v50 }
 0x15a   :  { %3875 = vrsqrt.f32 %v282_v53  ;;  %v276_v55 = vsub.f32 %v268_v54, %v272_v51 }
 0x15c   :  { %v280_v56 = vadd.f32 1e-05, %v276_v55  ;;  %v3852_v55 = vld [vmem:[%s5260_s9 + $0x8] sm:$0xff]  }
 0x15e   :  { %3877 = vrsqrt.f32 %v280_v56 }
 0x163   :  { %v3872_v58 = vpop.eup %3871 }
 0x164   :  { %v289_v59 = vmul.f32 %v3872_v58, %v237_v57  ;;  %v3874_v61 = vpop.eup %3873 }
 0x165   :  { %v287_v3 = vmul.f32 %v3874_v61, %v235_v63 }
 0x166   :  { %311 = vperm.xlu1 %3797, %v289_v59   ;;  %v293_v8 = vmul.f32 %v289_v59, %v265_v32 }
 0x167   :  { %v3876_v0 = vpop.eup %3875  ;;  %v291_v17 = vmul.f32 %v287_v3, %v263_v27  ;;  %v358_v27 = vld [vmem:[%s5261_s10 + $0x8] sm:$0xff] }
 0x168   :  { %v290_v1 = vmul.f32 %v3876_v0, %v238_v62  ;;  %v297_v11 = vsub.f32 %v241_v9, %v293_v8 }
 0x169   :  { %v295_v20 = vsub.f32 %v239_v18, %v291_v17 }
 0x16a   :  { %316 = vperm.xlu0 %3798, %v290_v1   ;;  %301 = vperm.xlu1 %3797, %v287_v3   ;;  %v294_v13 = vmul.f32 %v290_v1, %v266_v35 }
 0x16b   :  { %v3878_v5 = vpop.eup %3877 }
 0x16c   :  { %v288_v7 = vmul.f32 %v3878_v5, %v236_v4  ;;  %v298_v15 = vsub.f32 %v242_v14, %v294_v13 }
 0x16e   :  { %306 = vperm.xlu1 %3797, %v288_v7   ;;  %363 = vperm.xlu0 %3798, %v357_v6   ;;  %v292_v21 = vmul.f32 %v288_v7, %v264_v45 }
 0x170   :  { %v296_v23 = vsub.f32 %v240_v22, %v292_v21 }
 0x172   :  { %335 = vperm.xlu1 %3797, %v297_v11  }
 0x176   :  { %340 = vperm.xlu1 %3797, %v298_v15  }
 0x17a   :  { %325 = vperm.xlu1 %3797, %v295_v20  }
 0x17e   :  { %330 = vperm.xlu1 %3797, %v296_v23  }
 0x182   :  { %373 = vperm.xlu1 %3797, %v359_v24  }
 0x186   :  { %378 = vperm.xlu1 %3797, %v360_v26  }
 0x18a   :  { %368 = vperm.xlu1 %3797, %v358_v27  }
 0x1e1   :  { %v312_v28 = vpop.permute.xlu1 %311 }
 0x1e2   :  { %v321_v35 = vmul.f32 %v312_v28, %v4162_v52 }
 0x1e5   :  { %v302_v31 = vpop.permute.xlu1 %301  ;;  %v317_v33 = vpop.permute.xlu0 %316 }
 0x1e6   :  { %v322_v36 = vmul.f32 %v317_v33, %v4168_v60  ;;  %v319_v45 = vmul.f32 %v302_v31, %v4176_v16 }
 0x1e9   :  { %v307_v32 = vpop.permute.xlu1 %306  ;;  %v364_v1 = vpop.permute.xlu0 %363 }
 0x1ea   :  { %v320_v47 = vmul.f32 %v307_v32, %v4180_v19 }
 0x1ed   :  { %v336_v34 = vpop.permute.xlu1 %335 }
 0x1ee   :  { %v345_v38 = vadd.f32 %v336_v34, %v321_v35 }
 0x1f0   :  { %v349_v42 = vmax.f32 %v345_v38, 0.0 }
 0x1f1   :  { %v341_v40 = vpop.permute.xlu1 %340 }
 0x1f2   :  { %v346_v41 = vadd.f32 %v341_v40, %v322_v36 }
 0x1f4   :  { %v350_v43 = vmax.f32 %v346_v41, 0.0 }
 0x1f5   :  { %v326_v44 = vpop.permute.xlu1 %325 }
 0x1f6   :  { %v356_v46 = vpack.c.bf16 %v350_v43, %v349_v42  ;;  %v343_v48 = vadd.f32 %v326_v44, %v319_v45 }
 0x1f8   :  { %3694 = vmatprep.subr.bf16.mxu0 %v356_v46  ;;  %v347_v51 = vmax.f32 %v343_v48, 0.0 }
 0x1f9   :  { %3695 = vmatpush3.bf16.msra.mxu0 %v356_v46  ;;  %v331_v49 = vpop.permute.xlu1 %330  ;;  %v457_v46 = vld [vmem:[%s5258_s7 + $0x10] sm:$0xff] }
 0x1fa   :  { %v344_v50 = vadd.f32 %v331_v49, %v320_v47  ;;  %v461_v49 = vld [vmem:[%s5259_s8 + $0x10] sm:$0xff] }
 0x1fc   :  { %v348_v53 = vmax.f32 %v344_v50, 0.0  ;;  %v458_v50 = vld [vmem:[%s5258_s7 + $0x18] sm:$0xff] }
 0x1fd   :  { %v374_v56 = vpop.permute.xlu1 %373 }
 0x1fe   :  { %v355_v54 = vpack.c.bf16 %v348_v53, %v347_v51 }
 0x200   :  { %3696 = vmatprep.subr.bf16.mxu0 %v355_v54 }
 0x201   :  { %3697 = vmatpush3.bf16.msra.mxu0 %v355_v54  ;;  %v379_v61 = vpop.permute.xlu1 %378 }
 0x204   :  { %3699 = vmatmul.mubr.msk.bf16.vlgmr.msra.gmra.mxu0 %vm391_vm0, %v3852_v55 }
 0x205   :  { %v369_v6 = vpop.permute.xlu1 %368 }
 0x2c4   :  { %v3700_v57 = vpop.f32.mrf.mxu0 }
 0x2c5   :  { %v4239_v58 = vadd.f32 %v3700_v57, %v374_v56  ;;  %v455_v56 = vld [vmem:[%s5258_s7] sm:$0xff] }
 0x2c6   :  { %v432_v59 = vpop.f32.mrf.mxu0 }
 0x2c7   :  { %467 = vadd.xlane.f32.xlu0 %v4239_v58  ;;  %v473_v0 = vmul.f32 %v4239_v58, %v4239_v58  ;;  %v4247_v3 = vadd.f32 %v432_v59, %v364_v1 }
 0x2c8   :  { %v3701_v62 = vpop.f32.mrf.mxu0 }
 0x2c9   :  { %v4242_v63 = vadd.f32 %v3701_v62, %v379_v61  ;;  %v471_v8 = vmul.f32 %v4247_v3, %v4247_v3  ;;  %v456_v61 = vld [vmem:[%s5258_s7 + $0x8] sm:$0xff]  ;;  %v459_v62 = vld [vmem:[%s5259_s8] sm:$0xff] }
 0x2ca   :  { %v435_v5 = vpop.f32.mrf.mxu0 }
 0x2cb   :  { %479 = vadd.xlane.f32.xlu0 %v473_v0  ;;  %469 = vadd.xlane.f32.xlu1 %v4242_v63  ;;  %v474_v4 = vmul.f32 %v4242_v63, %v4242_v63  ;;  %v4252_v7 = vadd.f32 %v435_v5, %v369_v6 }
 0x2cd   :  { %v472_v9 = vmul.f32 %v4252_v7, %v4252_v7 }
 0x2cf   :  { %463 = vadd.xlane.f32.xlu1 %v4247_v3  ;;  %481 = vadd.xlane.f32.xlu0 %v474_v4 }
 0x2d3   :  { %475 = vadd.xlane.f32.xlu1 %v471_v8  ;;  %465 = vadd.xlane.f32.xlu0 %v4252_v7  ;;  %v462_v8 = vld [vmem:[%s5259_s8 + $0x18] sm:$0xff] }
 0x2d7   :  { %477 = vadd.xlane.f32.xlu0 %v472_v9  ;;  %v676_v9 = vld [vmem:[%s5265_s14 + $0x10] sm:$0xff] }
 0x350   :  { %v468_v11 = vpop.xlane.xlu0 %467 }
 0x351   :  { %v485_v13 = vmul.f32 0.0078125, %v468_v11 }
 0x353   :  { %v493_v17 = vmul.f32 %v485_v13, %v485_v13 }
 0x354   :  { %v480_v14 = vpop.xlane.xlu0 %479  ;;  %v470_v15 = vpop.xlane.xlu1 %469 }
 0x355   :  { %v489_v18 = vmul.f32 0.0078125, %v480_v14  ;;  %v486_v20 = vmul.f32 0.0078125, %v470_v15  ;;  %v460_v14 = vld [vmem:[%s5259_s8 + $0x8] sm:$0xff]  ;;  %v680_v15 = vld [vmem:[%s5266_s15 + $0x10] sm:$0xff] }
 0x357   :  { %v497_v21 = vsub.f32 %v489_v18, %v493_v17  ;;  %v494_v25 = vmul.f32 %v486_v20, %v486_v20  ;;  %v677_v18 = vld [vmem:[%s5265_s14 + $0x18] sm:$0xff] }
 0x358   :  { %v482_v22 = vpop.xlane.xlu0 %481  ;;  %v464_v23 = vpop.xlane.xlu1 %463 }
 0x359   :  { %v501_v24 = vadd.f32 1e-05, %v497_v21  ;;  %v490_v26 = vmul.f32 0.0078125, %v482_v22  ;;  %v483_v27 = vmul.f32 0.0078125, %v464_v23  ;;  %v3853_v21 = vld [vmem:[%s5262_s11] sm:$0xff]   ;;  %v681_v22 = vld [vmem:[%s5266_s15 + $0x18] sm:$0xff] }
 0x35a   :  { %v674_v23 = vld [vmem:[%s5265_s14] sm:$0xff]  ;;  %3706 = vmatprep.mubr.msk.bf16.mxu1 %vm391_vm0, %v3853_v21 }
 0x35b   :  { %3879 = vrsqrt.f32 %v501_v24  ;;  %v498_v28 = vsub.f32 %v490_v26, %v494_v25  ;;  %v491_v34 = vmul.f32 %v483_v27, %v483_v27  ;;  %v673_v24 = vld [vmem:[%s5264_s13 + $0x18] sm:$0xff]  ;;  %v675_v26 = vld [vmem:[%s5265_s14 + $0x8] sm:$0xff] }
 0x35c   :  { %v466_v31 = vpop.xlane.xlu0 %465  ;;  %v476_v32 = vpop.xlane.xlu1 %475  ;;  %v580_v25 = vld [vmem:[%s5288_s2 + $0x18] sm:$0xff] }
 0x35d   :  { %v502_v33 = vadd.f32 1e-05, %v498_v28  ;;  %v484_v35 = vmul.f32 0.0078125, %v466_v31  ;;  %v487_v36 = vmul.f32 0.0078125, %v476_v32  ;;  %v671_v28 = vld [vmem:[%s5264_s13 + $0x8] sm:$0xff]  ;;  %v579_v31 = vld [vmem:[%s5288_s2 + $0x10] sm:$0xff] }
 0x35e   :  { %v678_v32 = vld [vmem:[%s5266_s15] sm:$0xff] }
 0x35f   :  { %3881 = vrsqrt.f32 %v502_v33  ;;  %v495_v38 = vsub.f32 %v487_v36, %v491_v34  ;;  %v492_v41 = vmul.f32 %v484_v35, %v484_v35  ;;  %v679_v33 = vld [vmem:[%s5266_s15 + $0x8] sm:$0xff]  ;;  %v577_v34 = vld [vmem:[%s5288_s2] sm:$0xff] }
 0x360   :  { %v478_v40 = vpop.xlane.xlu0 %477 }
 0x361   :  { %v499_v42 = vadd.f32 1e-05, %v495_v38  ;;  %v488_v43 = vmul.f32 0.0078125, %v478_v40 }
 0x363   :  { %3883 = vrsqrt.f32 %v499_v42  ;;  %v496_v44 = vsub.f32 %v488_v43, %v492_v41 }
 0x365   :  { %v500_v45 = vadd.f32 1e-05, %v496_v44 }
 0x367   :  { %3885 = vrsqrt.f32 %v500_v45 }
 0x368   :  { %v3880_v47 = vpop.eup %3879 }
 0x369   :  { %v509_v48 = vmul.f32 %v3880_v47, %v457_v46 }
 0x36b   :  { %531 = vperm.xlu1 %3797, %v509_v48   ;;  %v513_v51 = vmul.f32 %v509_v48, %v485_v13 }
 0x36c   :  { %v3882_v53 = vpop.eup %3881 }
 0x36d   :  { %v517_v54 = vsub.f32 %v461_v49, %v513_v51  ;;  %v510_v55 = vmul.f32 %v3882_v53, %v458_v50 }
 0x36f   :  { %555 = vperm.xlu1 %3797, %v517_v54   ;;  %536 = vperm.xlu0 %3798, %v510_v55   ;;  %v514_v6 = vmul.f32 %v510_v55, %v486_v20  ;;  %v672_v20 = vld [vmem:[%s5264_s13 + $0x10] sm:$0xff] }
 0x370   :  { %v3884_v57 = vpop.eup %3883 }
 0x371   :  { %v507_v59 = vmul.f32 %v3884_v57, %v455_v56  ;;  %v518_v11 = vsub.f32 %v462_v8, %v514_v6 }
 0x373   :  { %521 = vperm.xlu0 %3798, %v507_v59   ;;  %v511_v0 = vmul.f32 %v507_v59, %v483_v27  ;;  %v670_v27 = vld [vmem:[%s5264_s13] sm:$0xff] }
 0x374   :  { %v3886_v1 = vpop.eup %3885 }
 0x375   :  { %v508_v4 = vmul.f32 %v3886_v1, %v456_v61  ;;  %v515_v5 = vsub.f32 %v459_v62, %v511_v0 }
 0x377   :  { %526 = vperm.xlu1 %3797, %v508_v4   ;;  %545 = vperm.xlu0 %3798, %v515_v5   ;;  %v512_v13 = vmul.f32 %v508_v4, %v484_v35  ;;  %v578_v35 = vld [vmem:[%s5288_s2 + $0x8] sm:$0xff] }
 0x379   :  { %v516_v17 = vsub.f32 %v460_v14, %v512_v13 }
 0x37b   :  { %560 = vperm.xlu1 %3797, %v518_v11   ;;  %694 = vperm.xlu0 %3798, %v676_v9  }
 0x37f   :  { %550 = vperm.xlu1 %3797, %v516_v17   ;;  %718 = vperm.xlu0 %3798, %v680_v15  }
 0x383   :  { %699 = vperm.xlu1 %3797, %v677_v18   ;;  %742 = vperm.xlu0 %3798, %v672_v20  }
 0x387   :  { %723 = vperm.xlu1 %3797, %v681_v22   ;;  %684 = vperm.xlu0 %3798, %v674_v23  }
 0x38b   :  { %747 = vperm.xlu1 %3797, %v673_v24   ;;  %598 = vperm.xlu0 %3798, %v580_v25  }
 0x38f   :  { %689 = vperm.xlu1 %3797, %v675_v26   ;;  %732 = vperm.xlu0 %3798, %v670_v27  }
 0x393   :  { %3799 = vset.pattern.permute.xlu1 %v3984_v10  ;;  %3801 = vset.pattern.permute.xlu0 %v3984_v10 }
 0x394   :  { %771 = vperm.xlu1 %3799, %v673_v24   ;;  %767 = vperm.xlu0 %3801, %v672_v20  }
 0x398   :  { %3800 = vset.pattern.permute.xlu1 %v3983_v2  ;;  %763 = vperm.xlu0 %3801, %v671_v28  }
 0x399   :  { %593 = vperm.xlu1 %3800, %v579_v31  }
 0x39c   :  { %3804 = vset.pattern.permute.xlu0 %v3985_v12 }
 0x39d   :  { %708 = vperm.xlu1 %3800, %v678_v32   ;;  %791 = vperm.xlu0 %3804, %v672_v20  }
 0x3a1   :  { %713 = vperm.xlu1 %3800, %v679_v33   ;;  %783 = vperm.xlu0 %3804, %v670_v27  }
 0x3a5   :  { %737 = vperm.xlu1 %3800, %v671_v28   ;;  %3807 = vset.pattern.permute.xlu0 %v3983_v2 }
 0x3a9   :  { %3802 = vset.pattern.permute.xlu1 %v3985_v12 }
 0x3aa   :  { %795 = vperm.xlu1 %3802, %v673_v24  }
 0x3ae   :  { %3803 = vset.pattern.permute.xlu1 %v3984_v10 }
 0x3af   :  { %759 = vperm.xlu1 %3803, %v670_v27  }
 0x3b3   :  { %3805 = vset.pattern.permute.xlu1 %v3983_v2 }
 0x3b4   :  { %583 = vperm.xlu1 %3805, %v577_v34  }
 0x3b8   :  { %588 = vperm.xlu1 %3805, %v578_v35  }
 0x3bc   :  { %3806 = vset.pattern.permute.xlu1 %v3985_v12 }
 0x3bd   :  { %787 = vperm.xlu1 %3806, %v671_v28  }
 0x3c1   :  { %3808 = vset.pattern.permute.xlu1 %v3983_v2 }
 0x3e6   :  { %v532_v36 = vpop.permute.xlu1 %531 }
 0x3e7   :  { %v541_v43 = vmul.f32 %v532_v36, %v4239_v58 }
 0x3ea   :  { %v537_v38 = vpop.permute.xlu0 %536  ;;  %v556_v40 = vpop.permute.xlu1 %555 }
 0x3eb   :  { %v542_v44 = vmul.f32 %v537_v38, %v4242_v63  ;;  %v565_v45 = vadd.f32 %v556_v40, %v541_v43  ;;  %v3854_v63 = vld [vmem:[%s5262_s11 + $0x8] sm:$0xff]  }
 0x3ed   :  { %v569_v50 = vmax.f32 %v565_v45, 0.0 }
 0x3ee   :  { %v522_v41 = vpop.permute.xlu0 %521 }
 0x3ef   :  { %v539_v48 = vmul.f32 %v522_v41, %v4247_v3 }
 0x3f2   :  { %v527_v42 = vpop.permute.xlu1 %526  ;;  %v546_v46 = vpop.permute.xlu0 %545 }
 0x3f3   :  { %v563_v51 = vadd.f32 %v546_v46, %v539_v48  ;;  %v540_v53 = vmul.f32 %v527_v42, %v4252_v7 }
 0x3f5   :  { %v567_v59 = vmax.f32 %v563_v51, 0.0 }
 0x3f6   :  { %v561_v47 = vpop.permute.xlu1 %560  ;;  %v695_v0 = vpop.permute.xlu0 %694 }
 0x3f7   :  { %v566_v49 = vadd.f32 %v561_v47, %v542_v44  ;;  %v704_v24 = vmul.f32 %v4147_v29, %v695_v0 }
 0x3f9   :  { %v570_v54 = vmax.f32 %v566_v49, 0.0 }
 0x3fa   :  { %v551_v55 = vpop.permute.xlu1 %550  ;;  %v719_v4 = vpop.permute.xlu0 %718 }
 0x3fb   :  { %v564_v56 = vadd.f32 %v551_v55, %v540_v53  ;;  %v576_v57 = vpack.c.bf16 %v570_v54, %v569_v50  ;;  %v728_v27 = vadd.f32 %v719_v4, %v704_v24 }
 0x3fd   :  { %v568_v61 = vmax.f32 %v564_v56, 0.0  ;;  %3702 = vmatprep.subr.bf16.mxu1 %v576_v57 }
 0x3fe   :  { %3703 = vmatpush3.bf16.msra.mxu1 %v576_v57  ;;  %v700_v3 = vpop.permute.xlu1 %699  ;;  %v743_v6 = vpop.permute.xlu0 %742 }
 0x3ff   :  { %v575_v58 = vpack.c.bf16 %v568_v61, %v567_v59  ;;  %v752_v25 = vmul.f32 %v743_v6, %v4149_v30  ;;  %v705_v28 = vmul.f32 %v4147_v29, %v700_v3 }
 0x401   :  { %3704 = vmatprep.subr.bf16.mxu1 %v575_v58  ;;  %v756_v33 = vadd.f32 %v752_v25, %v728_v27 }
 0x402   :  { %3705 = vmatpush3.bf16.msra.mxu1 %v575_v58  ;;  %v724_v62 = vpop.permute.xlu1 %723  ;;  %v685_v9 = vpop.permute.xlu0 %684 }
 0x403   :  { %v729_v34 = vadd.f32 %v724_v62, %v705_v28  ;;  %v702_v36 = vmul.f32 %v4147_v29, %v685_v9 }
 0x405   :  { %3707 = vmatmul.mubr.msk.bf16.vlgmr.msra.gmra.mxu1 %vm391_vm0, %v3854_v63 }
 0x406   :  { %v748_v7 = vpop.permute.xlu1 %747  ;;  %v599_v13 = vpop.permute.xlu0 %598 }
 0x407   :  { %v753_v31 = vmul.f32 %v748_v7, %v4149_v30 }
 0x409   :  { %v757_v42 = vadd.f32 %v753_v31, %v729_v34 }
 0x40a   :  { %v690_v1 = vpop.permute.xlu1 %689  ;;  %v733_v15 = vpop.permute.xlu0 %732 }
 0x40b   :  { %v703_v45 = vmul.f32 %v4147_v29, %v690_v1  ;;  %v750_v53 = vmul.f32 %v733_v15, %v4149_v30 }
 0x40f   :  { %v772_v5 = vpop.permute.xlu1 %771  ;;  %v768_v18 = vpop.permute.xlu0 %767 }
 0x410   :  { %v776_v32 = vmul.f32 %v768_v18, %v4155_v39  ;;  %v777_v38 = vmul.f32 %v772_v5, %v4155_v39 }
 0x412   :  { %v780_v43 = vadd.f32 %v776_v32, %v756_v33  ;;  %v781_v54 = vadd.f32 %v777_v38, %v757_v42 }
 0x413   :  { %v764_v21 = vpop.permute.xlu0 %763 }
 0x414   :  { %v594_v8 = vpop.permute.xlu1 %593  ;;  %v775_v58 = vmul.f32 %v764_v21, %v4155_v39 }
 0x418   :  { %v709_v11 = vpop.permute.xlu1 %708  ;;  %v792_v26 = vpop.permute.xlu0 %791 }
 0x419   :  { %v800_v35 = vmul.f32 %v792_v26, %v4153_v37  ;;  %v726_v46 = vadd.f32 %v709_v11, %v702_v36 }
 0x41b   :  { %v804_v50 = vadd.f32 %v800_v35, %v780_v43  ;;  %v754_v63 = vadd.f32 %v750_v53, %v726_v46 }
 0x41c   :  { %v714_v14 = vpop.permute.xlu1 %713  ;;  %v784_v59 = vpop.permute.xlu0 %783 }
 0x41d   :  { %v727_v55 = vadd.f32 %v714_v14, %v703_v45 }
 0x420   :  { %v738_v17 = vpop.permute.xlu1 %737 }
 0x421   :  { %v751_v47 = vmul.f32 %v738_v17, %v4149_v30 }
 0x423   :  { %v755_v3 = vadd.f32 %v751_v47, %v727_v55 }
 0x425   :  { %v796_v20 = vpop.permute.xlu1 %795 }
 0x426   :  { %v801_v48 = vmul.f32 %v796_v20, %v4153_v37 }
 0x428   :  { %v805_v62 = vadd.f32 %v801_v48, %v781_v54 }
 0x42a   :  { %v760_v22 = vpop.permute.xlu1 %759 }
 0x42b   :  { %v774_v57 = vmul.f32 %v760_v22, %v4155_v39 }
 0x42d   :  { %v778_v6 = vadd.f32 %v774_v57, %v754_v63  ;;  %v3456_v57 = vld [vmem:[%s5261_s10 + $0x30] sm:$0xff] }
 0x42f   :  { %v584_v23 = vpop.permute.xlu1 %583 }
 0x433   :  { %v589_v40 = vpop.permute.xlu1 %588 }
 0x438   :  { %v788_v7 = vpop.permute.xlu1 %787 }
 0x439   :  { %v799_v9 = vmul.f32 %v788_v7, %v4153_v37  ;;  %v3445_v7 = vld [vmem:[%s5256_s5 + $0x38] sm:$0xff] }
 0x4c5   :  { %v3708_v41 = vpop.f32.mrf.mxu1 }
 0x4c6   :  { %v660_v44 = vadd.f32 %v3708_v41, %v594_v8  ;;  %v798_v8 = vmul.f32 %v784_v59, %v4153_v37 }
 0x4c7   :  { %v651_v49 = vpop.f32.mrf.mxu1 }
 0x4c8   :  { %v816_v51 = vadd.f32 %v660_v44, %v4162_v52  ;;  %v652_v1 = vadd.f32 %v651_v49, %v584_v23  ;;  %v802_v17 = vadd.f32 %v798_v8, %v778_v6  ;;  %v3443_v6 = vld [vmem:[%s5256_s5 + $0x28] sm:$0xff] }
 0x4c9   :  { %v3709_v56 = vpop.f32.mrf.mxu1 }
 0x4ca   :  { %v4367_v61 = vadd.f32 %v816_v51, %v804_v50  ;;  %v663_v29 = vadd.f32 %v3709_v56, %v599_v13  ;;  %v779_v13 = vadd.f32 %v775_v58, %v755_v3  ;;  %v814_v14 = vadd.f32 %v652_v1, %v4176_v16  ;;  %v3444_v51 = vld [vmem:[%s5256_s5 + $0x30] sm:$0xff]  ;;  %v3442_v58 = vld [vmem:[%s5256_s5 + $0x20] sm:$0xff] }
 0x4cb   :  { %v654_v0 = vpop.f32.mrf.mxu1 }
 0x4cc   :  { %v817_v52 = vadd.f32 %v663_v29, %v4168_v60  ;;  %v655_v4 = vadd.f32 %v654_v0, %v589_v40  ;;  %844 = vadd.xlane.f32.xlu1 %v4367_v61  ;;  %v850_v5 = vmul.f32 %v4367_v61, %v4367_v61  ;;  %v803_v18 = vadd.f32 %v799_v9, %v779_v13  ;;  %v3454_v29 = vld [vmem:[%s5261_s10 + $0x20] sm:$0xff] }
 0x4cd   :  { %v4383_v20 = vadd.f32 %v814_v14, %v802_v17  ;;  %v3446_v13 = vld [vmem:[%s5257_s6 + $0x20] sm:$0xff] }
 0x4ce   :  { %v4376_v11 = vadd.f32 %v817_v52, %v805_v62  ;;  %856 = vadd.xlane.f32.xlu0 %v850_v5  ;;  %v815_v15 = vadd.f32 %v655_v4, %v4180_v19  ;;  %v3448_v52 = vld [vmem:[%s5257_s6 + $0x30] sm:$0xff] }
 0x4cf   :  { %v848_v16 = vmul.f32 %v4383_v20, %v4383_v20 }
 0x4d0   :  { %v851_v60 = vmul.f32 %v4376_v11, %v4376_v11  ;;  %v4385_v21 = vadd.f32 %v815_v15, %v803_v18 }
 0x4d2   :  { %846 = vadd.xlane.f32.xlu0 %v4376_v11  ;;  %858 = vadd.xlane.f32.xlu1 %v851_v60  ;;  %v849_v19 = vmul.f32 %v4385_v21, %v4385_v21  ;;  %v3449_v60 = vld [vmem:[%s5257_s6 + $0x38] sm:$0xff] }
 0x4d6   :  { %840 = vadd.xlane.f32.xlu0 %v4383_v20  ;;  %842 = vadd.xlane.f32.xlu1 %v4385_v21 }
 0x4da   :  { %852 = vadd.xlane.f32.xlu0 %v848_v16  ;;  %854 = vadd.xlane.f32.xlu1 %v849_v19  ;;  %v3447_v16 = vld [vmem:[%s5257_s6 + $0x28] sm:$0xff] }
 0x555   :  { %v845_v22 = vpop.xlane.xlu1 %844 }
 0x556   :  { %v862_v23 = vmul.f32 0.0078125, %v845_v22  ;;  %v3457_v22 = vld [vmem:[%s5261_s10 + $0x38] sm:$0xff] }
 0x557   :  { %v857_v24 = vpop.xlane.xlu0 %856 }
 0x558   :  { %v870_v25 = vmul.f32 %v862_v23, %v862_v23  ;;  %v866_v26 = vmul.f32 0.0078125, %v857_v24  ;;  %v3455_v24 = vld [vmem:[%s5261_s10 + $0x28] sm:$0xff] }
 0x55a   :  { %v874_v27 = vsub.f32 %v866_v26, %v870_v25 }
 0x55b   :  { %v847_v28 = vpop.xlane.xlu0 %846  ;;  %v859_v31 = vpop.xlane.xlu1 %858 }
 0x55c   :  { %v878_v32 = vadd.f32 1e-05, %v874_v27  ;;  %v863_v33 = vmul.f32 0.0078125, %v847_v28  ;;  %v867_v40 = vmul.f32 0.0078125, %v859_v31 }
 0x55e   :  { %3887 = vrsqrt.f32 %v878_v32  ;;  %v871_v36 = vmul.f32 %v863_v33, %v863_v33 }
 0x55f   :  { %v841_v34 = vpop.xlane.xlu0 %840  ;;  %v843_v35 = vpop.xlane.xlu1 %842 }
 0x560   :  { %v860_v38 = vmul.f32 0.0078125, %v841_v34  ;;  %v875_v42 = vsub.f32 %v867_v40, %v871_v36  ;;  %v861_v46 = vmul.f32 0.0078125, %v843_v35 }
 0x562   :  { %v868_v43 = vmul.f32 %v860_v38, %v860_v38  ;;  %v879_v48 = vadd.f32 1e-05, %v875_v42  ;;  %v869_v53 = vmul.f32 %v861_v46, %v861_v46 }
 0x563   :  { %v853_v41 = vpop.xlane.xlu0 %852  ;;  %v855_v45 = vpop.xlane.xlu1 %854 }
 0x564   :  { %v864_v44 = vmul.f32 0.0078125, %v853_v41  ;;  %v865_v50 = vmul.f32 0.0078125, %v855_v45 }
 0x566   :  { %v872_v47 = vsub.f32 %v864_v44, %v868_v43  ;;  %v873_v55 = vsub.f32 %v865_v50, %v869_v53 }
 0x568   :  { %v876_v49 = vadd.f32 1e-05, %v872_v47  ;;  %v877_v59 = vadd.f32 1e-05, %v873_v55 }
 0x56a   :  { %3889 = vrsqrt.f32 %v876_v49 }
 0x56b   :  { %v3888_v54 = vpop.eup %3887  ;;  %3891 = vrsqrt.f32 %v879_v48 }
 0x56c   :  { %v886_v56 = vmul.f32 %v3888_v54, %v3444_v51  ;;  %3893 = vrsqrt.f32 %v877_v59  ;;  %v3856_v51 = vld [vmem:[%s5260_s9 + $0x18] sm:$0xff]  }
 0x56e   :  { %908 = vperm.xlu0 %3807, %v886_v56   ;;  %v890_v0 = vmul.f32 %v886_v56, %v862_v23  ;;  %v3855_v23 = vld [vmem:[%s5260_s9 + $0x10] sm:$0xff]  }
 0x56f   :  { %3714 = vmatprep.mubr.msk.bf16.mxu0 %vm391_vm0, %v3855_v23 }
 0x570   :  { %v894_v4 = vsub.f32 %v3448_v52, %v890_v0 }
 0x572   :  { %972 = vperm.xlu0 %3807, %v3456_v57  }
 0x576   :  { %962 = vperm.xlu0 %3807, %v3454_v29  }
 0x577   :  { %v3890_v63 = vpop.eup %3889 }
 0x578   :  { %v884_v3 = vmul.f32 %v3890_v63, %v3442_v58  ;;  %v3892_v62 = vpop.eup %3891 }
 0x579   :  { %v887_v1 = vmul.f32 %v3892_v62, %v3445_v7  ;;  %v3894_v5 = vpop.eup %3893 }
 0x57a   :  { %898 = vperm.xlu1 %3808, %v884_v3   ;;  %v885_v8 = vmul.f32 %v3894_v5, %v3443_v6  ;;  %v888_v9 = vmul.f32 %v884_v3, %v860_v38 }
 0x57b   :  { %v891_v15 = vmul.f32 %v887_v1, %v863_v33 }
 0x57c   :  { %v892_v14 = vsub.f32 %v3446_v13, %v888_v9  ;;  %v889_v18 = vmul.f32 %v885_v8, %v861_v46 }
 0x57d   :  { %v895_v17 = vsub.f32 %v3449_v60, %v891_v15 }
 0x57e   :  { %913 = vperm.xlu1 %3808, %v887_v1   ;;  %v893_v19 = vsub.f32 %v3447_v16, %v889_v18 }
 0x582   :  { %932 = vperm.xlu1 %3808, %v894_v4  }
 0x586   :  { %903 = vperm.xlu1 %3808, %v885_v8  }
 0x58a   :  { %922 = vperm.xlu1 %3808, %v892_v14  }
 0x58e   :  { %937 = vperm.xlu1 %3808, %v895_v17  }
 0x592   :  { %927 = vperm.xlu1 %3808, %v893_v19  }
 0x596   :  { %977 = vperm.xlu1 %3808, %v3457_v22  }
 0x59a   :  { %967 = vperm.xlu1 %3808, %v3455_v24  }
 0x5e9   :  { %v909_v31 = vpop.permute.xlu0 %908 }
 0x5ea   :  { %v918_v33 = vmul.f32 %v909_v31, %v4367_v61 }
 0x5ed   :  { %v973_v53 = vpop.permute.xlu0 %972 }
 0x5f1   :  { %v963_v63 = vpop.permute.xlu0 %962 }
 0x5f5   :  { %v899_v25 = vpop.permute.xlu1 %898 }
 0x5f6   :  { %v916_v38 = vmul.f32 %v899_v25, %v4383_v20 }
 0x5f9   :  { %v914_v26 = vpop.permute.xlu1 %913 }
 0x5fa   :  { %v919_v34 = vmul.f32 %v914_v26, %v4376_v11 }
 0x5fd   :  { %v933_v27 = vpop.permute.xlu1 %932 }
 0x5fe   :  { %v942_v35 = vadd.f32 %v933_v27, %v918_v33 }
 0x600   :  { %v946_v41 = vmax.f32 %v942_v35, 0.0 }
 0x601   :  { %v904_v28 = vpop.permute.xlu1 %903 }
 0x602   :  { %v917_v42 = vmul.f32 %v904_v28, %v4385_v21 }
 0x605   :  { %v923_v32 = vpop.permute.xlu1 %922 }
 0x606   :  { %v940_v43 = vadd.f32 %v923_v32, %v916_v38 }
 0x608   :  { %v944_v48 = vmax.f32 %v940_v43, 0.0 }
 0x609   :  { %v938_v36 = vpop.permute.xlu1 %937 }
 0x60a   :  { %v943_v40 = vadd.f32 %v938_v36, %v919_v34 }
 0x60c   :  { %v947_v44 = vmax.f32 %v943_v40, 0.0 }
 0x60d   :  { %v928_v45 = vpop.permute.xlu1 %927 }
 0x60e   :  { %v941_v46 = vadd.f32 %v928_v45, %v917_v42  ;;  %v954_v47 = vpack.c.bf16 %v947_v44, %v946_v41  ;;  %v3464_v42 = vld [vmem:[%s5258_s7 + $0x30] sm:$0xff] }
 0x60f   :  { %v3468_v45 = vld [vmem:[%s5259_s8 + $0x30] sm:$0xff] }
 0x610   :  { %v945_v49 = vmax.f32 %v941_v46, 0.0  ;;  %3710 = vmatprep.subr.bf16.mxu0 %v954_v47  ;;  %v3465_v46 = vld [vmem:[%s5258_s7 + $0x38] sm:$0xff] }
 0x611   :  { %3711 = vmatpush3.bf16.msra.mxu0 %v954_v47  ;;  %v978_v57 = vpop.permute.xlu1 %977 }
 0x612   :  { %v953_v50 = vpack.c.bf16 %v945_v49, %v944_v48 }
 0x614   :  { %3712 = vmatprep.subr.bf16.mxu0 %v953_v50 }
 0x615   :  { %3713 = vmatpush3.bf16.msra.mxu0 %v953_v50  ;;  %v968_v0 = vpop.permute.xlu1 %967 }
 0x618   :  { %3715 = vmatmul.mubr.msk.bf16.vlgmr.msra.gmra.mxu0 %vm391_vm0, %v3856_v51  ;;  %v3462_v51 = vld [vmem:[%s5258_s7 + $0x20] sm:$0xff] }
 0x6d8   :  { %v3716_v54 = vpop.f32.mrf.mxu0 }
 0x6d9   :  { %v4441_v55 = vadd.f32 %v3716_v54, %v973_v53 }
 0x6da   :  { %v1030_v56 = vpop.f32.mrf.mxu0 }
 0x6db   :  { %1067 = vadd.xlane.f32.xlu0 %v4441_v55  ;;  %v1073_v58 = vmul.f32 %v4441_v55, %v4441_v55  ;;  %v4449_v3 = vadd.f32 %v1030_v56, %v963_v63  ;;  %v3463_v56 = vld [vmem:[%s5258_s7 + $0x28] sm:$0xff] }
 0x6dc   :  { %v3717_v59 = vpop.f32.mrf.mxu0 }
 0x6dd   :  { %v4444_v29 = vadd.f32 %v3717_v59, %v978_v57  ;;  %v1071_v52 = vmul.f32 %v4449_v3, %v4449_v3  ;;  %v3466_v57 = vld [vmem:[%s5259_s8 + $0x20] sm:$0xff] }
 0x6de   :  { %v1033_v7 = vpop.f32.mrf.mxu0 }
 0x6df   :  { %1079 = vadd.xlane.f32.xlu0 %v1073_v58  ;;  %1069 = vadd.xlane.f32.xlu1 %v4444_v29  ;;  %v1074_v62 = vmul.f32 %v4444_v29, %v4444_v29  ;;  %v4454_v1 = vadd.f32 %v1033_v7, %v968_v0  ;;  %v3469_v0 = vld [vmem:[%s5259_s8 + $0x38] sm:$0xff] }
 0x6e1   :  { %v1072_v4 = vmul.f32 %v4454_v1, %v4454_v1 }
 0x6e3   :  { %1063 = vadd.xlane.f32.xlu1 %v4449_v3  ;;  %1081 = vadd.xlane.f32.xlu0 %v1074_v62 }
 0x6e7   :  { %1075 = vadd.xlane.f32.xlu1 %v1071_v52  ;;  %1065 = vadd.xlane.f32.xlu0 %v4454_v1  ;;  %v3488_v52 = vld [vmem:[%s5265_s14 + $0x30] sm:$0xff] }
 0x6eb   :  { %1077 = vadd.xlane.f32.xlu0 %v1072_v4 }
 0x764   :  { %v1068_v5 = vpop.xlane.xlu0 %1067 }
 0x765   :  { %v1085_v6 = vmul.f32 0.0078125, %v1068_v5 }
 0x767   :  { %v1093_v13 = vmul.f32 %v1085_v6, %v1085_v6 }
 0x768   :  { %v1080_v8 = vpop.xlane.xlu0 %1079  ;;  %v1070_v9 = vpop.xlane.xlu1 %1069 }
 0x769   :  { %v1089_v14 = vmul.f32 0.0078125, %v1080_v8  ;;  %v1086_v15 = vmul.f32 0.0078125, %v1070_v9  ;;  %v3492_v8 = vld [vmem:[%s5266_s15 + $0x30] sm:$0xff] }
 0x76b   :  { %v1097_v60 = vsub.f32 %v1089_v14, %v1093_v13  ;;  %v1094_v19 = vmul.f32 %v1086_v15, %v1086_v15  ;;  %v3489_v13 = vld [vmem:[%s5265_s14 + $0x38] sm:$0xff]  ;;  %v3484_v14 = vld [vmem:[%s5264_s13 + $0x30] sm:$0xff] }
 0x76c   :  { %v1082_v17 = vpop.xlane.xlu0 %1081  ;;  %v1064_v18 = vpop.xlane.xlu1 %1063 }
 0x76d   :  { %v1101_v16 = vadd.f32 1e-05, %v1097_v60  ;;  %v1090_v22 = vmul.f32 0.0078125, %v1082_v17  ;;  %v1083_v23 = vmul.f32 0.0078125, %v1064_v18  ;;  %v3493_v60 = vld [vmem:[%s5266_s15 + $0x38] sm:$0xff]  ;;  %v3486_v17 = vld [vmem:[%s5265_s14 + $0x20] sm:$0xff] }
 0x76e   :  { %v3485_v18 = vld [vmem:[%s5264_s13 + $0x38] sm:$0xff] }
 0x76f   :  { %3895 = vrsqrt.f32 %v1101_v16  ;;  %v1098_v24 = vsub.f32 %v1090_v22, %v1094_v19  ;;  %v1091_v28 = vmul.f32 %v1083_v23, %v1083_v23  ;;  %v3477_v16 = vld [vmem:[%s5288_s2 + $0x38] sm:$0xff]  ;;  %v3487_v19 = vld [vmem:[%s5265_s14 + $0x28] sm:$0xff]  ;;  %v3482_v22 = vld [vmem:[%s5264_s13 + $0x20] sm:$0xff] }
 0x770   :  { %v1066_v25 = vpop.xlane.xlu0 %1065  ;;  %v1076_v26 = vpop.xlane.xlu1 %1075 }
 0x771   :  { %v1102_v27 = vadd.f32 1e-05, %v1098_v24  ;;  %v1084_v31 = vmul.f32 0.0078125, %v1066_v25  ;;  %v1087_v32 = vmul.f32 0.0078125, %v1076_v26  ;;  %v3476_v24 = vld [vmem:[%s5288_s2 + $0x30] sm:$0xff]  ;;  %v3490_v25 = vld [vmem:[%s5266_s15 + $0x20] sm:$0xff] }
 0x772   :  { %v3491_v26 = vld [vmem:[%s5266_s15 + $0x28] sm:$0xff] }
 0x773   :  { %3897 = vrsqrt.f32 %v1102_v27  ;;  %v1095_v33 = vsub.f32 %v1087_v32, %v1091_v28  ;;  %v1092_v35 = vmul.f32 %v1084_v31, %v1084_v31  ;;  %v3474_v27 = vld [vmem:[%s5288_s2 + $0x20] sm:$0xff]  ;;  %v3475_v28 = vld [vmem:[%s5288_s2 + $0x28] sm:$0xff] }
 0x774   :  { %v1078_v34 = vpop.xlane.xlu0 %1077 }
 0x775   :  { %v1099_v36 = vadd.f32 1e-05, %v1095_v33  ;;  %v1088_v38 = vmul.f32 0.0078125, %v1078_v34 }
 0x777   :  { %3899 = vrsqrt.f32 %v1099_v36  ;;  %v1096_v40 = vsub.f32 %v1088_v38, %v1092_v35 }
 0x779   :  { %v1100_v41 = vadd.f32 1e-05, %v1096_v40 }
 0x77b   :  { %3901 = vrsqrt.f32 %v1100_v41 }
 0x77c   :  { %v3896_v43 = vpop.eup %3895 }
 0x77d   :  { %v1109_v44 = vmul.f32 %v3896_v43, %v3464_v42 }
 0x77f   :  { %1131 = vperm.xlu1 %3808, %v1109_v44   ;;  %v1113_v47 = vmul.f32 %v1109_v44, %v1085_v6  ;;  %v3467_v6 = vld [vmem:[%s5259_s8 + $0x28] sm:$0xff] }
 0x780   :  { %v3898_v48 = vpop.eup %3897 }
 0x781   :  { %v1117_v49 = vsub.f32 %v3468_v45, %v1113_v47  ;;  %v1110_v50 = vmul.f32 %v3898_v48, %v3465_v46 }
 0x783   :  { %1155 = vperm.xlu1 %3808, %v1117_v49   ;;  %1136 = vperm.xlu0 %3807, %v1110_v50   ;;  %v1114_v63 = vmul.f32 %v1110_v50, %v1086_v15  ;;  %v3857_v15 = vld [vmem:[%s5262_s11 + $0x10] sm:$0xff]  }
 0x784   :  { %v3900_v53 = vpop.eup %3899  ;;  %3722 = vmatprep.mubr.msk.bf16.mxu1 %vm391_vm0, %v3857_v15 }
 0x785   :  { %v1107_v54 = vmul.f32 %v3900_v53, %v3462_v51  ;;  %v1118_v4 = vsub.f32 %v3469_v0, %v1114_v63 }
 0x787   :  { %1121 = vperm.xlu0 %3807, %v1107_v54   ;;  %v1111_v59 = vmul.f32 %v1107_v54, %v1083_v23  ;;  %v3483_v23 = vld [vmem:[%s5264_s13 + $0x28] sm:$0xff] }
 0x788   :  { %v3902_v58 = vpop.eup %3901 }
 0x789   :  { %v1108_v62 = vmul.f32 %v3902_v58, %v3463_v56  ;;  %v1115_v7 = vsub.f32 %v3466_v57, %v1111_v59 }
 0x78b   :  { %1126 = vperm.xlu1 %3808, %v1108_v62   ;;  %1145 = vperm.xlu0 %3807, %v1115_v7   ;;  %v1112_v5 = vmul.f32 %v1108_v62, %v1084_v31 }
 0x78d   :  { %v1116_v9 = vsub.f32 %v3467_v6, %v1112_v5 }
 0x78f   :  { %1160 = vperm.xlu1 %3808, %v1118_v4   ;;  %1299 = vperm.xlu0 %3807, %v3488_v52  }
 0x793   :  { %1150 = vperm.xlu1 %3808, %v1116_v9   ;;  %1323 = vperm.xlu0 %3807, %v3492_v8  }
 0x797   :  { %1304 = vperm.xlu1 %3808, %v3489_v13   ;;  %1347 = vperm.xlu0 %3807, %v3484_v14  }
 0x79b   :  { %1328 = vperm.xlu1 %3808, %v3493_v60   ;;  %1289 = vperm.xlu0 %3807, %v3486_v17   ;;  %v4558_v17 = vld [vmem:[%s5287_s1] ss:$0 sm:$0xff] }
 0x79f   :  { %1352 = vperm.xlu1 %3808, %v3485_v18   ;;  %1200 = vperm.xlu0 %3807, %v3477_v16  }
 0x7a3   :  { %1294 = vperm.xlu1 %3808, %v3487_v19   ;;  %1337 = vperm.xlu0 %3807, %v3482_v22  }
 0x7a7   :  { %3809 = vset.pattern.permute.xlu1 %v3984_v10  ;;  %3811 = vset.pattern.permute.xlu0 %v3984_v10 }
 0x7a8   :  { %1376 = vperm.xlu1 %3809, %v3485_v18   ;;  %1372 = vperm.xlu0 %3811, %v3484_v14  }
 0x7ac   :  { %3810 = vset.pattern.permute.xlu1 %v3983_v2  ;;  %1368 = vperm.xlu0 %3811, %v3483_v23  }
 0x7ad   :  { %1195 = vperm.xlu1 %3810, %v3476_v24  }
 0x7b0   :  { %3814 = vset.pattern.permute.xlu0 %v3985_v12 }
 0x7b1   :  { %1313 = vperm.xlu1 %3810, %v3490_v25   ;;  %1396 = vperm.xlu0 %3814, %v3484_v14  }
 0x7b5   :  { %1318 = vperm.xlu1 %3810, %v3491_v26   ;;  %1388 = vperm.xlu0 %3814, %v3482_v22  }
 0x7b9   :  { %1342 = vperm.xlu1 %3810, %v3483_v23   ;;  %3817 = vset.pattern.permute.xlu0 %v3983_v2 }
 0x7bd   :  { %3812 = vset.pattern.permute.xlu1 %v3985_v12 }
 0x7be   :  { %1400 = vperm.xlu1 %3812, %v3485_v18  }
 0x7c2   :  { %3813 = vset.pattern.permute.xlu1 %v3984_v10 }
 0x7c3   :  { %1364 = vperm.xlu1 %3813, %v3482_v22  }
 0x7c7   :  { %3815 = vset.pattern.permute.xlu1 %v3983_v2 }
 0x7c8   :  { %1185 = vperm.xlu1 %3815, %v3474_v27  }
 0x7cc   :  { %1190 = vperm.xlu1 %3815, %v3475_v28  }
 0x7d0   :  { %3816 = vset.pattern.permute.xlu1 %v3985_v12 }
 0x7d1   :  { %1392 = vperm.xlu1 %3816, %v3483_v23  }
 0x7d5   :  { %3818 = vset.pattern.permute.xlu1 %v3983_v2 }
 0x7fa   :  { %v1132_v31 = vpop.permute.xlu1 %1131 }
 0x7fb   :  { %v1141_v36 = vmul.f32 %v1132_v31, %v4441_v55 }
 0x7fe   :  { %v1137_v32 = vpop.permute.xlu0 %1136  ;;  %v1156_v33 = vpop.permute.xlu1 %1155 }
 0x7ff   :  { %v1142_v38 = vmul.f32 %v1137_v32, %v4444_v29  ;;  %v1165_v40 = vadd.f32 %v1156_v33, %v1141_v36  ;;  %v3858_v29 = vld [vmem:[%s5262_s11 + $0x18] sm:$0xff]  }
 0x801   :  { %v1169_v45 = vmax.f32 %v1165_v40, 0.0 }
 0x802   :  { %v1122_v34 = vpop.permute.xlu0 %1121 }
 0x803   :  { %v1139_v43 = vmul.f32 %v1122_v34, %v4449_v3 }
 0x806   :  { %v1127_v35 = vpop.permute.xlu1 %1126  ;;  %v1146_v41 = vpop.permute.xlu0 %1145 }
 0x807   :  { %v1163_v46 = vadd.f32 %v1146_v41, %v1139_v43  ;;  %v1140_v47 = vmul.f32 %v1127_v35, %v4454_v1 }
 0x809   :  { %v1167_v53 = vmax.f32 %v1163_v46, 0.0 }
 0x80a   :  { %v1161_v42 = vpop.permute.xlu1 %1160  ;;  %v1300_v57 = vpop.permute.xlu0 %1299 }
 0x80b   :  { %v1166_v44 = vadd.f32 %v1161_v42, %v1142_v38  ;;  %v1309_v18 = vmul.f32 %v4558_v17, %v1300_v57 }
 0x80d   :  { %v1170_v48 = vmax.f32 %v1166_v44, 0.0 }
 0x80e   :  { %v1151_v49 = vpop.permute.xlu1 %1150  ;;  %v1324_v58 = vpop.permute.xlu0 %1323 }
 0x80f   :  { %v1164_v50 = vadd.f32 %v1151_v49, %v1140_v47  ;;  %v1177_v51 = vpack.c.bf16 %v1170_v48, %v1169_v45  ;;  %v1333_v22 = vadd.f32 %v1324_v58, %v1309_v18 }
 0x811   :  { %v1168_v54 = vmax.f32 %v1164_v50, 0.0  ;;  %3718 = vmatprep.subr.bf16.mxu1 %v1177_v51 }
 0x812   :  { %3719 = vmatpush3.bf16.msra.mxu1 %v1177_v51  ;;  %v1305_v3 = vpop.permute.xlu1 %1304  ;;  %v1348_v62 = vpop.permute.xlu0 %1347 }
 0x813   :  { %v1176_v55 = vpack.c.bf16 %v1168_v54, %v1167_v53  ;;  %v1357_v16 = vmul.f32 %v1348_v62, %v4149_v30  ;;  %v1310_v23 = vmul.f32 %v4558_v17, %v1305_v3 }
 0x815   :  { %3720 = vmatprep.subr.bf16.mxu1 %v1176_v55  ;;  %v1361_v26 = vadd.f32 %v1357_v16, %v1333_v22 }
 0x816   :  { %3721 = vmatpush3.bf16.msra.mxu1 %v1176_v55  ;;  %v1329_v56 = vpop.permute.xlu1 %1328  ;;  %v1290_v0 = vpop.permute.xlu0 %1289 }
 0x817   :  { %v1334_v27 = vadd.f32 %v1329_v56, %v1310_v23  ;;  %v1307_v31 = vmul.f32 %v4558_v17, %v1290_v0 }
 0x819   :  { %3723 = vmatmul.mubr.msk.bf16.vlgmr.msra.gmra.mxu1 %vm391_vm0, %v3858_v29 }
 0x81a   :  { %v1353_v1 = vpop.permute.xlu1 %1352  ;;  %v1201_v4 = vpop.permute.xlu0 %1200 }
 0x81b   :  { %v1358_v24 = vmul.f32 %v1353_v1, %v4149_v30 }
 0x81d   :  { %v1362_v35 = vadd.f32 %v1358_v24, %v1334_v27 }
 0x81e   :  { %v1295_v59 = vpop.permute.xlu1 %1294  ;;  %v1338_v6 = vpop.permute.xlu0 %1337 }
 0x81f   :  { %v1308_v40 = vmul.f32 %v4558_v17, %v1295_v59  ;;  %v1355_v47 = vmul.f32 %v1338_v6, %v4149_v30 }
 0x823   :  { %v1377_v63 = vpop.permute.xlu1 %1376  ;;  %v1373_v9 = vpop.permute.xlu0 %1372 }
 0x824   :  { %v1381_v25 = vmul.f32 %v1373_v9, %v4155_v39  ;;  %v1382_v32 = vmul.f32 %v1377_v63, %v4155_v39 }
 0x826   :  { %v1385_v36 = vadd.f32 %v1381_v25, %v1361_v26  ;;  %v1386_v48 = vadd.f32 %v1382_v32, %v1362_v35 }
 0x827   :  { %v1369_v14 = vpop.permute.xlu0 %1368 }
 0x828   :  { %v1196_v7 = vpop.permute.xlu1 %1195  ;;  %v1380_v29 = vmul.f32 %v1369_v14, %v4155_v39 }
 0x82c   :  { %v1314_v52 = vpop.permute.xlu1 %1313  ;;  %v1397_v19 = vpop.permute.xlu0 %1396 }
 0x82d   :  { %v1405_v28 = vmul.f32 %v1397_v19, %v4153_v37  ;;  %v1331_v41 = vadd.f32 %v1314_v52, %v1307_v31 }
 0x82f   :  { %v1409_v45 = vadd.f32 %v1405_v28, %v1385_v36  ;;  %v1359_v3 = vadd.f32 %v1355_v47, %v1331_v41  ;;  %v3496_v47 = vld [vmem:[%s5256_s5 + $0x50] sm:$0xff] }
 0x830   :  { %v1319_v5 = vpop.permute.xlu1 %1318  ;;  %v1389_v53 = vpop.permute.xlu0 %1388 }
 0x831   :  { %v1332_v49 = vadd.f32 %v1319_v5, %v1308_v40  ;;  %v1403_v0 = vmul.f32 %v1389_v53, %v4153_v37  ;;  %v3509_v53 = vld [vmem:[%s5261_s10 + $0x58] sm:$0xff] }
 0x834   :  { %v1343_v8 = vpop.permute.xlu1 %1342 }
 0x835   :  { %v1356_v42 = vmul.f32 %v1343_v8, %v4149_v30 }
 0x837   :  { %v1360_v56 = vadd.f32 %v1356_v42, %v1332_v49 }
 0x839   :  { %v1401_v13 = vpop.permute.xlu1 %1400  ;;  %v1384_v5 = vadd.f32 %v1380_v29, %v1360_v56  ;;  %v3507_v29 = vld [vmem:[%s5261_s10 + $0x48] sm:$0xff] }
 0x83a   :  { %v1406_v43 = vmul.f32 %v1401_v13, %v4153_v37 }
 0x83c   :  { %v1410_v1 = vadd.f32 %v1406_v43, %v1386_v48 }
 0x83e   :  { %v1365_v15 = vpop.permute.xlu1 %1364 }
 0x83f   :  { %v1379_v51 = vmul.f32 %v1365_v15, %v4155_v39 }
 0x843   :  { %v1186_v60 = vpop.permute.xlu1 %1185 }
 0x847   :  { %v1191_v33 = vpop.permute.xlu1 %1190 }
 0x84c   :  { %v1393_v57 = vpop.permute.xlu1 %1392 }
 0x84d   :  { %v1404_v52 = vmul.f32 %v1393_v57, %v4153_v37 }
 0x84f   :  { %v1408_v13 = vadd.f32 %v1404_v52, %v1384_v5 }
 0x8d9   :  { %v3724_v34 = vpop.f32.mrf.mxu1 }
 0x8da   :  { %v1262_v38 = vadd.f32 %v3724_v34, %v1196_v7  ;;  %v1383_v7 = vadd.f32 %v1379_v51, %v1359_v3  ;;  %v3494_v3 = vld [vmem:[%s5256_s5 + $0x40] sm:$0xff] }
 0x8db   :  { %v1253_v44 = vpop.f32.mrf.mxu1 }
 0x8dc   :  { %v1421_v46 = vadd.f32 %v1262_v38, %v4367_v61  ;;  %v1254_v58 = vadd.f32 %v1253_v44, %v1186_v60  ;;  %v1407_v9 = vadd.f32 %v1403_v0, %v1383_v7  ;;  %v3495_v0 = vld [vmem:[%s5256_s5 + $0x48] sm:$0xff] }
 0x8dd   :  { %v3725_v50 = vpop.f32.mrf.mxu1 }
 0x8de   :  { %v4574_v54 = vadd.f32 %v1421_v46, %v1409_v45  ;;  %v1265_v55 = vadd.f32 %v3725_v50, %v1201_v4  ;;  %v1419_v6 = vadd.f32 %v1254_v58, %v4383_v20 }
 0x8df   :  { %v1256_v59 = vpop.f32.mrf.mxu1 }
 0x8e0   :  { %v1422_v61 = vadd.f32 %v1265_v55, %v4376_v11  ;;  %v1257_v63 = vadd.f32 %v1256_v59, %v1191_v33  ;;  %1449 = vadd.xlane.f32.xlu1 %v4574_v54  ;;  %v1455_v62 = vmul.f32 %v4574_v54, %v4574_v54  ;;  %v4590_v14 = vadd.f32 %v1419_v6, %v1407_v9  ;;  %v3497_v59 = vld [vmem:[%s5256_s5 + $0x58] sm:$0xff]  ;;  %v3498_v6 = vld [vmem:[%s5257_s6 + $0x40] sm:$0xff] }
 0x8e1   :  { %v3501_v9 = vld [vmem:[%s5257_s6 + $0x58] sm:$0xff] }
 0x8e2   :  { %v4583_v4 = vadd.f32 %v1422_v61, %v1410_v1  ;;  %1461 = vadd.xlane.f32.xlu0 %v1455_v62  ;;  %v1420_v8 = vadd.f32 %v1257_v63, %v4385_v21  ;;  %v1453_v20 = vmul.f32 %v4590_v14, %v4590_v14  ;;  %v3500_v63 = vld [vmem:[%s5257_s6 + $0x50] sm:$0xff] }
 0x8e4   :  { %v1456_v11 = vmul.f32 %v4583_v4, %v4583_v4  ;;  %v4592_v15 = vadd.f32 %v1420_v8, %v1408_v13 }
 0x8e6   :  { %1451 = vadd.xlane.f32.xlu0 %v4583_v4  ;;  %1463 = vadd.xlane.f32.xlu1 %v1456_v11  ;;  %v1454_v21 = vmul.f32 %v4592_v15, %v4592_v15 }
 0x8ea   :  { %1445 = vadd.xlane.f32.xlu0 %v4590_v14  ;;  %1447 = vadd.xlane.f32.xlu1 %v4592_v15 }
 0x8ee   :  { %1457 = vadd.xlane.f32.xlu0 %v1453_v20  ;;  %1459 = vadd.xlane.f32.xlu1 %v1454_v21  ;;  %v3499_v21 = vld [vmem:[%s5257_s6 + $0x48] sm:$0xff] }
 0x969   :  { %v1450_v60 = vpop.xlane.xlu1 %1449 }
 0x96a   :  { %v1467_v18 = vmul.f32 0.0078125, %v1450_v60 }
 0x96b   :  { %v1462_v16 = vpop.xlane.xlu0 %1461 }
 0x96c   :  { %v1475_v19 = vmul.f32 %v1467_v18, %v1467_v18  ;;  %v1471_v22 = vmul.f32 0.0078125, %v1462_v16  ;;  %v3859_v16 = vld [vmem:[%s5260_s9 + $0x20] sm:$0xff]  }
 0x96d   :  { %3730 = vmatprep.mubr.msk.bf16.mxu0 %vm391_vm0, %v3859_v16 }
 0x96e   :  { %v1479_v23 = vsub.f32 %v1471_v22, %v1475_v19  ;;  %v3506_v19 = vld [vmem:[%s5261_s10 + $0x40] sm:$0xff] }
 0x96f   :  { %v1452_v24 = vpop.xlane.xlu0 %1451  ;;  %v1464_v25 = vpop.xlane.xlu1 %1463 }
 0x970   :  { %v1483_v26 = vadd.f32 1e-05, %v1479_v23  ;;  %v1468_v27 = vmul.f32 0.0078125, %v1452_v24  ;;  %v1472_v34 = vmul.f32 0.0078125, %v1464_v25 }
 0x972   :  { %3903 = vrsqrt.f32 %v1483_v26  ;;  %v1476_v32 = vmul.f32 %v1468_v27, %v1468_v27 }
 0x973   :  { %v1446_v28 = vpop.xlane.xlu0 %1445  ;;  %v1448_v31 = vpop.xlane.xlu1 %1447 }
 0x974   :  { %v1465_v33 = vmul.f32 0.0078125, %v1446_v28  ;;  %v1480_v36 = vsub.f32 %v1472_v34, %v1476_v32  ;;  %v1466_v42 = vmul.f32 0.0078125, %v1448_v31 }
 0x976   :  { %v1473_v38 = vmul.f32 %v1465_v33, %v1465_v33  ;;  %v1484_v44 = vadd.f32 1e-05, %v1480_v36  ;;  %v1474_v48 = vmul.f32 %v1466_v42, %v1466_v42 }
 0x977   :  { %v1458_v35 = vpop.xlane.xlu0 %1457  ;;  %v1460_v41 = vpop.xlane.xlu1 %1459 }
 0x978   :  { %v1469_v40 = vmul.f32 0.0078125, %v1458_v35  ;;  %v1470_v46 = vmul.f32 0.0078125, %v1460_v41 }
 0x97a   :  { %v1477_v43 = vsub.f32 %v1469_v40, %v1473_v38  ;;  %v1478_v50 = vsub.f32 %v1470_v46, %v1474_v48  ;;  %v3860_v48 = vld [vmem:[%s5260_s9 + $0x28] sm:$0xff]  }
 0x97c   :  { %v1481_v45 = vadd.f32 1e-05, %v1477_v43  ;;  %v1482_v55 = vadd.f32 1e-05, %v1478_v50 }
 0x97e   :  { %3905 = vrsqrt.f32 %v1481_v45 }
 0x97f   :  { %v3904_v49 = vpop.eup %3903  ;;  %3907 = vrsqrt.f32 %v1484_v44 }
 0x980   :  { %v1491_v51 = vmul.f32 %v3904_v49, %v3496_v47  ;;  %3909 = vrsqrt.f32 %v1482_v55 }
 0x982   :  { %1513 = vperm.xlu0 %3817, %v1491_v51   ;;  %v1495_v61 = vmul.f32 %v1491_v51, %v1467_v18  ;;  %v3508_v18 = vld [vmem:[%s5261_s10 + $0x50] sm:$0xff] }
 0x984   :  { %v1499_v62 = vsub.f32 %v3500_v63, %v1495_v61 }
 0x986   :  { %1582 = vperm.xlu0 %3817, %v3509_v53  }
 0x98a   :  { %1572 = vperm.xlu0 %3817, %v3507_v29  }
 0x98b   :  { %v3906_v56 = vpop.eup %3905 }
 0x98c   :  { %v1489_v1 = vmul.f32 %v3906_v56, %v3494_v3  ;;  %v3908_v57 = vpop.eup %3907 }
 0x98d   :  { %v1492_v58 = vmul.f32 %v3908_v57, %v3497_v59  ;;  %v3910_v7 = vpop.eup %3909 }
 0x98e   :  { %1503 = vperm.xlu1 %3818, %v1489_v1   ;;  %v1490_v52 = vmul.f32 %v3910_v7, %v3495_v0  ;;  %v1493_v5 = vmul.f32 %v1489_v1, %v1465_v33 }
 0x98f   :  { %v1496_v11 = vmul.f32 %v1492_v58, %v1468_v27 }
 0x990   :  { %v1497_v8 = vsub.f32 %v3498_v6, %v1493_v5  ;;  %v1494_v20 = vmul.f32 %v1490_v52, %v1466_v42 }
 0x991   :  { %v1500_v13 = vsub.f32 %v3501_v9, %v1496_v11 }
 0x992   :  { %1518 = vperm.xlu1 %3818, %v1492_v58   ;;  %v1498_v60 = vsub.f32 %v3499_v21, %v1494_v20 }
 0x996   :  { %1537 = vperm.xlu1 %3818, %v1499_v62  }
 0x99a   :  { %1508 = vperm.xlu1 %3818, %v1490_v52  }
 0x99e   :  { %1527 = vperm.xlu1 %3818, %v1497_v8  }
 0x9a2   :  { %1542 = vperm.xlu1 %3818, %v1500_v13  }
 0x9a6   :  { %1532 = vperm.xlu1 %3818, %v1498_v60  }
 0x9aa   :  { %1577 = vperm.xlu1 %3818, %v3508_v18  }
 0x9ae   :  { %1567 = vperm.xlu1 %3818, %v3506_v19  }
 0x9fd   :  { %v1514_v26 = vpop.permute.xlu0 %1513 }
 0x9fe   :  { %v1523_v28 = vmul.f32 %v1514_v26, %v4574_v54 }
 0xa01   :  { %v1583_v29 = vpop.permute.xlu0 %1582 }
 0xa05   :  { %v1573_v59 = vpop.permute.xlu0 %1572 }
 0xa09   :  { %v1504_v22 = vpop.permute.xlu1 %1503 }
 0xa0a   :  { %v1521_v34 = vmul.f32 %v1504_v22, %v4590_v14 }
 0xa0d   :  { %v1519_v23 = vpop.permute.xlu1 %1518 }
 0xa0e   :  { %v1524_v31 = vmul.f32 %v1519_v23, %v4583_v4 }
 0xa11   :  { %v1538_v24 = vpop.permute.xlu1 %1537 }
 0xa12   :  { %v1547_v32 = vadd.f32 %v1538_v24, %v1523_v28 }
 0xa14   :  { %v1551_v36 = vmax.f32 %v1547_v32, 0.0 }
 0xa15   :  { %v1509_v25 = vpop.permute.xlu1 %1508 }
 0xa16   :  { %v1522_v38 = vmul.f32 %v1509_v25, %v4592_v15 }
 0xa19   :  { %v1528_v27 = vpop.permute.xlu1 %1527 }
 0xa1a   :  { %v1545_v40 = vadd.f32 %v1528_v27, %v1521_v34 }
 0xa1c   :  { %v1549_v45 = vmax.f32 %v1545_v40, 0.0  ;;  %v3516_v40 = vld [vmem:[%s5258_s7 + $0x50] sm:$0xff] }
 0xa1d   :  { %v1543_v33 = vpop.permute.xlu1 %1542 }
 0xa1e   :  { %v1548_v35 = vadd.f32 %v1543_v33, %v1524_v31 }
 0xa20   :  { %v1552_v41 = vmax.f32 %v1548_v35, 0.0 }
 0xa21   :  { %v1533_v42 = vpop.permute.xlu1 %1532 }
 0xa22   :  { %v1546_v43 = vadd.f32 %v1533_v42, %v1522_v38  ;;  %v1559_v44 = vpack.c.bf16 %v1552_v41, %v1551_v36 }
 0xa24   :  { %v1550_v46 = vmax.f32 %v1546_v43, 0.0  ;;  %3726 = vmatprep.subr.bf16.mxu0 %v1559_v44 }
 0xa25   :  { %3727 = vmatpush3.bf16.msra.mxu0 %v1559_v44  ;;  %v1578_v49 = vpop.permute.xlu1 %1577  ;;  %v3517_v44 = vld [vmem:[%s5258_s7 + $0x58] sm:$0xff] }
 0xa26   :  { %v1558_v47 = vpack.c.bf16 %v1550_v46, %v1549_v45  ;;  %v3514_v45 = vld [vmem:[%s5258_s7 + $0x40] sm:$0xff] }
 0xa28   :  { %3728 = vmatprep.subr.bf16.mxu0 %v1558_v47 }
 0xa29   :  { %3729 = vmatpush3.bf16.msra.mxu0 %v1558_v47  ;;  %v1568_v58 = vpop.permute.xlu1 %1567  ;;  %v3515_v47 = vld [vmem:[%s5258_s7 + $0x48] sm:$0xff] }
 0xa2c   :  { %3731 = vmatmul.mubr.msk.bf16.vlgmr.msra.gmra.mxu0 %vm391_vm0, %v3860_v48 }
 0xaec   :  { %v3732_v50 = vpop.f32.mrf.mxu0 }
 0xaed   :  { %v4648_v51 = vadd.f32 %v3732_v50, %v1578_v49 }
 0xaee   :  { %v1635_v53 = vpop.f32.mrf.mxu0 }
 0xaef   :  { %1672 = vadd.xlane.f32.xlu1 %v4648_v51  ;;  %v1678_v55 = vmul.f32 %v4648_v51, %v4648_v51  ;;  %v4658_v61 = vadd.f32 %v1635_v53, %v1568_v58  ;;  %v3519_v58 = vld [vmem:[%s5259_s8 + $0x48] sm:$0xff] }
 0xaf0   :  { %v3733_v3 = vpop.f32.mrf.mxu0 }
 0xaf1   :  { %v4653_v56 = vadd.f32 %v3733_v3, %v1583_v29  ;;  %1684 = vadd.xlane.f32.xlu0 %v1678_v55  ;;  %v1676_v7 = vmul.f32 %v4658_v61, %v4658_v61  ;;  %v3521_v29 = vld [vmem:[%s5259_s8 + $0x58] sm:$0xff] }
 0xaf2   :  { %v1638_v57 = vpop.f32.mrf.mxu0 }
 0xaf3   :  { %v1679_v1 = vmul.f32 %v4653_v56, %v4653_v56  ;;  %v4660_v63 = vadd.f32 %v1638_v57, %v1573_v59  ;;  %v3520_v57 = vld [vmem:[%s5259_s8 + $0x50] sm:$0xff] }
 0xaf5   :  { %1686 = vadd.xlane.f32.xlu1 %v1679_v1  ;;  %1674 = vadd.xlane.f32.xlu0 %v4653_v56  ;;  %v1677_v62 = vmul.f32 %v4660_v63, %v4660_v63 }
 0xaf9   :  { %1670 = vadd.xlane.f32.xlu1 %v4660_v63  ;;  %1668 = vadd.xlane.f32.xlu0 %v4658_v61 }
 0xafd   :  { %1682 = vadd.xlane.f32.xlu1 %v1677_v62  ;;  %1680 = vadd.xlane.f32.xlu0 %v1676_v7 }
 0xb78   :  { %v1673_v0 = vpop.xlane.xlu1 %1672 }
 0xb79   :  { %v1690_v52 = vmul.f32 0.0078125, %v1673_v0 }
 0xb7a   :  { %v1685_v5 = vpop.xlane.xlu0 %1684 }
 0xb7b   :  { %v1698_v6 = vmul.f32 %v1690_v52, %v1690_v52  ;;  %v1694_v8 = vmul.f32 0.0078125, %v1685_v5  ;;  %v3518_v5 = vld [vmem:[%s5259_s8 + $0x40] sm:$0xff] }
 0xb7d   :  { %v1702_v11 = vsub.f32 %v1694_v8, %v1698_v6  ;;  %v3537_v6 = vld [vmem:[%s5264_s13 + $0x58] sm:$0xff]  ;;  %v3540_v8 = vld [vmem:[%s5265_s14 + $0x50] sm:$0xff] }
 0xb7e   :  { %v1675_v9 = vpop.xlane.xlu0 %1674  ;;  %v1687_v13 = vpop.xlane.xlu1 %1686 }
 0xb7f   :  { %v1706_v20 = vadd.f32 1e-05, %v1702_v11  ;;  %v1691_v21 = vmul.f32 0.0078125, %v1675_v9  ;;  %v1695_v18 = vmul.f32 0.0078125, %v1687_v13  ;;  %v3541_v11 = vld [vmem:[%s5265_s14 + $0x58] sm:$0xff]  ;;  %v3861_v9 = vld [vmem:[%s5262_s11 + $0x20] sm:$0xff]  }
 0xb80   :  { %v3544_v13 = vld [vmem:[%s5266_s15 + $0x50] sm:$0xff]  ;;  %3738 = vmatprep.mubr.msk.bf16.mxu1 %vm391_vm0, %v3861_v9 }
 0xb81   :  { %3911 = vrsqrt.f32 %v1706_v20  ;;  %v1699_v60 = vmul.f32 %v1691_v21, %v1691_v21  ;;  %v3545_v20 = vld [vmem:[%s5266_s15 + $0x58] sm:$0xff] }
 0xb82   :  { %v1669_v16 = vpop.xlane.xlu0 %1668  ;;  %v1671_v19 = vpop.xlane.xlu1 %1670 }
 0xb83   :  { %v1703_v22 = vsub.f32 %v1695_v18, %v1699_v60  ;;  %v1688_v23 = vmul.f32 0.0078125, %v1669_v16  ;;  %v1689_v24 = vmul.f32 0.0078125, %v1671_v19  ;;  %v3538_v60 = vld [vmem:[%s5265_s14 + $0x40] sm:$0xff]  ;;  %v3539_v18 = vld [vmem:[%s5265_s14 + $0x48] sm:$0xff]  ;;  %v3528_v19 = vld [vmem:[%s5288_s2 + $0x50] sm:$0xff] }
 0xb84   :  { %v3542_v16 = vld [vmem:[%s5266_s15 + $0x40] sm:$0xff] }
 0xb85   :  { %v1707_v25 = vadd.f32 1e-05, %v1703_v22  ;;  %v1696_v28 = vmul.f32 %v1688_v23, %v1688_v23  ;;  %v1697_v31 = vmul.f32 %v1689_v24, %v1689_v24  ;;  %v3535_v22 = vld [vmem:[%s5264_s13 + $0x48] sm:$0xff] }
 0xb86   :  { %v1681_v26 = vpop.xlane.xlu0 %1680  ;;  %v1683_v27 = vpop.xlane.xlu1 %1682 }
 0xb87   :  { %v1692_v32 = vmul.f32 0.0078125, %v1681_v26  ;;  %v1693_v33 = vmul.f32 0.0078125, %v1683_v27  ;;  %3913 = vrsqrt.f32 %v1707_v25  ;;  %v3534_v25 = vld [vmem:[%s5264_s13 + $0x40] sm:$0xff]  ;;  %v3527_v27 = vld [vmem:[%s5288_s2 + $0x48] sm:$0xff] }
 0xb88   :  { %v3526_v26 = vld [vmem:[%s5288_s2 + $0x40] sm:$0xff] }
 0xb89   :  { %v1700_v34 = vsub.f32 %v1692_v32, %v1696_v28  ;;  %v1701_v35 = vsub.f32 %v1693_v33, %v1697_v31 }
 0xb8b   :  { %v1704_v36 = vadd.f32 1e-05, %v1700_v34  ;;  %v1705_v38 = vadd.f32 1e-05, %v1701_v35 }
 0xb8d   :  { %3915 = vrsqrt.f32 %v1704_v36 }
 0xb8e   :  { %v3912_v41 = vpop.eup %3911  ;;  %3917 = vrsqrt.f32 %v1705_v38 }
 0xb8f   :  { %v1714_v42 = vmul.f32 %v3912_v41, %v3516_v40 }
 0xb91   :  { %1736 = vperm.xlu0 %3817, %v1714_v42   ;;  %v1718_v3 = vmul.f32 %v1714_v42, %v1690_v52 }
 0xb93   :  { %v1722_v62 = vsub.f32 %v3520_v57, %v1718_v3 }
 0xb94   :  { %v3914_v43 = vpop.eup %3913 }
 0xb95   :  { %v1715_v46 = vmul.f32 %v3914_v43, %v3517_v44 }
 0xb97   :  { %v1719_v55 = vmul.f32 %v1715_v46, %v1691_v21  ;;  %v3536_v21 = vld [vmem:[%s5264_s13 + $0x50] sm:$0xff] }
 0xb99   :  { %v1723_v1 = vsub.f32 %v3521_v29, %v1719_v55 }
 0xb9a   :  { %v3916_v48 = vpop.eup %3915 }
 0xb9b   :  { %v3918_v49 = vpop.eup %3917  ;;  %v1712_v50 = vmul.f32 %v3916_v48, %v3514_v45 }
 0xb9c   :  { %v1713_v53 = vmul.f32 %v3918_v49, %v3515_v47 }
 0xb9d   :  { %1726 = vperm.xlu1 %3818, %v1712_v50   ;;  %v1716_v7 = vmul.f32 %v1712_v50, %v1688_v23  ;;  %v3529_v23 = vld [vmem:[%s5288_s2 + $0x58] sm:$0xff] }
 0xb9e   :  { %1731 = vperm.xlu0 %3817, %v1713_v53   ;;  %v1717_v59 = vmul.f32 %v1713_v53, %v1689_v24  ;;  %v3543_v24 = vld [vmem:[%s5266_s15 + $0x48] sm:$0xff] }
 0xb9f   :  { %v1720_v52 = vsub.f32 %v3518_v5, %v1716_v7 }
 0xba0   :  { %v1721_v0 = vsub.f32 %v3519_v58, %v1717_v59 }
 0xba1   :  { %1741 = vperm.xlu1 %3818, %v1715_v46  }
 0xba2   :  { %1765 = vperm.xlu0 %3817, %v1723_v1  }
 0xba5   :  { %1760 = vperm.xlu1 %3818, %v1722_v62  }
 0xba6   :  { %1755 = vperm.xlu0 %3817, %v1721_v0  }
 0xba9   :  { %1750 = vperm.xlu1 %3818, %v1720_v52  }
 0xbaa   :  { %3820 = vset.pattern.permute.xlu0 %v3984_v10 }
 0xbab   :  { %1981 = vperm.xlu0 %3820, %v3537_v6  }
 0xbad   :  { %1904 = vperm.xlu1 %3818, %v3540_v8  }
 0xbaf   :  { %3821 = vset.pattern.permute.xlu0 %v3983_v2 }
 0xbb0   :  { %1909 = vperm.xlu0 %3821, %v3541_v11  }
 0xbb1   :  { %1928 = vperm.xlu1 %3818, %v3544_v13  }
 0xbb4   :  { %1933 = vperm.xlu0 %3821, %v3545_v20  }
 0xbb5   :  { %1952 = vperm.xlu1 %3818, %v3536_v21  }
 0xbb8   :  { %1957 = vperm.xlu0 %3821, %v3537_v6  }
 0xbb9   :  { %1894 = vperm.xlu1 %3818, %v3538_v60  }
 0xbbc   :  { %1899 = vperm.xlu0 %3821, %v3539_v18  }
 0xbbd   :  { %3819 = vset.pattern.permute.xlu1 %v3984_v10 }
 0xbbe   :  { %1977 = vperm.xlu1 %3819, %v3536_v21  }
 0xbc0   :  { %1918 = vperm.xlu0 %3821, %v3542_v16  }
 0xbc2   :  { %3822 = vset.pattern.permute.xlu1 %v3983_v2 }
 0xbc3   :  { %1800 = vperm.xlu1 %3822, %v3528_v19  }
 0xbc4   :  { %1947 = vperm.xlu0 %3821, %v3535_v22  }
 0xbc7   :  { %1805 = vperm.xlu1 %3822, %v3529_v23  }
 0xbc8   :  { %1790 = vperm.xlu0 %3821, %v3526_v26  }
 0xbcb   :  { %1923 = vperm.xlu1 %3822, %v3543_v24  }
 0xbcc   :  { %3825 = vset.pattern.permute.xlu0 %v3985_v12 }
 0xbcd   :  { %2005 = vperm.xlu0 %3825, %v3537_v6  }
 0xbcf   :  { %1942 = vperm.xlu1 %3822, %v3534_v25  }
 0xbd1   :  { %1997 = vperm.xlu0 %3825, %v3535_v22  }
 0xbd3   :  { %3823 = vset.pattern.permute.xlu1 %v3985_v12 }
 0xbd4   :  { %2001 = vperm.xlu1 %3823, %v3536_v21  }
 0xbd5   :  { %3829 = vset.pattern.permute.xlu0 %v3983_v2 }
 0xbd8   :  { %3824 = vset.pattern.permute.xlu1 %v3984_v10 }
 0xbd9   :  { %1969 = vperm.xlu1 %3824, %v3534_v25  }
 0xbdd   :  { %1973 = vperm.xlu1 %3824, %v3535_v22  }
 0xbe1   :  { %3826 = vset.pattern.permute.xlu1 %v3983_v2 }
 0xbe2   :  { %1795 = vperm.xlu1 %3826, %v3527_v27  }
 0xbe6   :  { %3827 = vset.pattern.permute.xlu1 %v3985_v12 }
 0xbe7   :  { %1993 = vperm.xlu1 %3827, %v3534_v25  }
 0xbeb   :  { %3828 = vset.pattern.permute.xlu1 %v3983_v2 }
 0xc0c   :  { %v1737_v28 = vpop.permute.xlu0 %1736 }
 0xc0d   :  { %v1746_v36 = vmul.f32 %v1737_v28, %v4648_v51  ;;  %v3862_v51 = vld [vmem:[%s5262_s11 + $0x28] sm:$0xff]  }
 0xc18   :  { %v1727_v31 = vpop.permute.xlu1 %1726 }
 0xc19   :  { %v1732_v32 = vpop.permute.xlu0 %1731  ;;  %v1744_v44 = vmul.f32 %v1727_v31, %v4658_v61 }
 0xc1a   :  { %v1745_v41 = vmul.f32 %v1732_v32, %v4660_v63 }
 0xc1c   :  { %v1742_v33 = vpop.permute.xlu1 %1741 }
 0xc1d   :  { %v1766_v34 = vpop.permute.xlu0 %1765  ;;  %v1747_v35 = vmul.f32 %v1742_v33, %v4653_v56 }
 0xc1f   :  { %v1771_v38 = vadd.f32 %v1766_v34, %v1747_v35 }
 0xc20   :  { %v1761_v40 = vpop.permute.xlu1 %1760 }
 0xc21   :  { %v1756_v42 = vpop.permute.xlu0 %1755  ;;  %v1770_v43 = vadd.f32 %v1761_v40, %v1746_v36  ;;  %v1775_v45 = vmax.f32 %v1771_v38, 0.0 }
 0xc22   :  { %v1769_v46 = vadd.f32 %v1756_v42, %v1745_v41 }
 0xc23   :  { %v1774_v47 = vmax.f32 %v1770_v43, 0.0 }
 0xc24   :  { %v1751_v48 = vpop.permute.xlu1 %1750  ;;  %v1773_v53 = vmax.f32 %v1769_v46, 0.0 }
 0xc25   :  { %v1768_v49 = vadd.f32 %v1751_v48, %v1744_v44  ;;  %v1782_v50 = vpack.c.bf16 %v1775_v45, %v1774_v47 }
 0xc26   :  { %v1982_v57 = vpop.permute.xlu0 %1981 }
 0xc27   :  { %v1772_v55 = vmax.f32 %v1768_v49, 0.0  ;;  %3734 = vmatprep.subr.bf16.mxu1 %v1782_v50  ;;  %v1987_v27 = vmul.f32 %v1982_v57, %v4155_v39 }
 0xc28   :  { %3735 = vmatpush3.bf16.msra.mxu1 %v1782_v50  ;;  %v1905_v61 = vpop.permute.xlu1 %1904 }
 0xc29   :  { %v1781_v56 = vpack.c.bf16 %v1773_v53, %v1772_v55  ;;  %v1914_v60 = vmul.f32 %v4558_v17, %v1905_v61 }
 0xc2b   :  { %3736 = vmatprep.subr.bf16.mxu1 %v1781_v56  ;;  %v1910_v58 = vpop.permute.xlu0 %1909 }
 0xc2c   :  { %3737 = vmatpush3.bf16.msra.mxu1 %v1781_v56  ;;  %v1929_v63 = vpop.permute.xlu1 %1928  ;;  %v1915_v20 = vmul.f32 %v4558_v17, %v1910_v58 }
 0xc2d   :  { %v1938_v23 = vadd.f32 %v1929_v63, %v1914_v60 }
 0xc2f   :  { %3739 = vmatmul.mubr.msk.bf16.vlgmr.msra.gmra.mxu1 %vm391_vm0, %v3862_v51  ;;  %v1934_v7 = vpop.permute.xlu0 %1933 }
 0xc30   :  { %v1953_v29 = vpop.permute.xlu1 %1952  ;;  %v1939_v18 = vadd.f32 %v1934_v7, %v1915_v20 }
 0xc31   :  { %v1962_v16 = vmul.f32 %v1953_v29, %v4149_v30 }
 0xc33   :  { %v1958_v5 = vpop.permute.xlu0 %1957  ;;  %v1966_v28 = vadd.f32 %v1962_v16, %v1938_v23 }
 0xc34   :  { %v1895_v3 = vpop.permute.xlu1 %1894  ;;  %v1963_v19 = vmul.f32 %v1958_v5, %v4149_v30 }
 0xc35   :  { %v1912_v36 = vmul.f32 %v4558_v17, %v1895_v3 }
 0xc36   :  { %v1967_v31 = vadd.f32 %v1963_v19, %v1939_v18 }
 0xc37   :  { %v1900_v6 = vpop.permute.xlu0 %1899 }
 0xc38   :  { %v1913_v25 = vmul.f32 %v4558_v17, %v1900_v6  ;;  %v1991_v45 = vadd.f32 %v1987_v27, %v1967_v31 }
 0xc39   :  { %v1978_v1 = vpop.permute.xlu1 %1977 }
 0xc3a   :  { %v1986_v24 = vmul.f32 %v1978_v1, %v4155_v39 }
 0xc3b   :  { %v1919_v11 = vpop.permute.xlu0 %1918 }
 0xc3c   :  { %v1990_v34 = vadd.f32 %v1986_v24, %v1966_v28  ;;  %v1936_v48 = vadd.f32 %v1919_v11, %v1912_v36 }
 0xc3e   :  { %v1801_v59 = vpop.permute.xlu1 %1800 }
 0xc3f   :  { %v1948_v13 = vpop.permute.xlu0 %1947 }
 0xc40   :  { %v1961_v41 = vmul.f32 %v1948_v13, %v4149_v30 }
 0xc42   :  { %v1806_v62 = vpop.permute.xlu1 %1805 }
 0xc43   :  { %v1791_v22 = vpop.permute.xlu0 %1790 }
 0xc46   :  { %v1924_v0 = vpop.permute.xlu1 %1923 }
 0xc47   :  { %v1937_v38 = vadd.f32 %v1924_v0, %v1913_v25 }
 0xc48   :  { %v2006_v42 = vpop.permute.xlu0 %2005 }
 0xc49   :  { %v2011_v46 = vmul.f32 %v2006_v42, %v4153_v37  ;;  %v1965_v61 = vadd.f32 %v1961_v41, %v1937_v38 }
 0xc4a   :  { %v1943_v52 = vpop.permute.xlu1 %1942 }
 0xc4b   :  { %v1960_v40 = vmul.f32 %v1943_v52, %v4149_v30  ;;  %v2015_v1 = vadd.f32 %v2011_v46, %v1991_v45 }
 0xc4d   :  { %v1964_v51 = vadd.f32 %v1960_v40, %v1936_v48  ;;  %v3548_v48 = vld [vmem:[%s5256_s5 + $0x70] sm:$0xff] }
 0xc4f   :  { %v2002_v8 = vpop.permute.xlu1 %2001 }
 0xc50   :  { %v2010_v32 = vmul.f32 %v2002_v8, %v4153_v37 }
 0xc52   :  { %v2014_v44 = vadd.f32 %v2010_v32, %v1990_v34 }
 0xc54   :  { %v1970_v9 = vpop.permute.xlu1 %1969 }
 0xc55   :  { %v1984_v49 = vmul.f32 %v1970_v9, %v4155_v39 }
 0xc58   :  { %v1974_v21 = vpop.permute.xlu1 %1973 }
 0xc59   :  { %v1985_v29 = vmul.f32 %v1974_v21, %v4155_v39 }
 0xc5b   :  { %v1989_v52 = vadd.f32 %v1985_v29, %v1965_v61 }
 0xc5d   :  { %v1796_v26 = vpop.permute.xlu1 %1795 }
 0xc62   :  { %v1994_v50 = vpop.permute.xlu1 %1993 }
 0xc63   :  { %v2008_v3 = vmul.f32 %v1994_v50, %v4153_v37 }
 0xcef   :  { %v3740_v33 = vpop.f32.mrf.mxu1 }
 0xcf0   :  { %v1867_v35 = vadd.f32 %v3740_v33, %v1801_v59  ;;  %v1998_v59 = vpop.permute.xlu0 %1997 }
 0xcf1   :  { %v1858_v43 = vpop.f32.mrf.mxu1  ;;  %v2009_v6 = vmul.f32 %v1998_v59, %v4153_v37 }
 0xcf2   :  { %v2026_v47 = vadd.f32 %v1867_v35, %v4574_v54  ;;  %v1859_v17 = vadd.f32 %v1858_v43, %v1791_v22  ;;  %v1988_v54 = vadd.f32 %v1984_v49, %v1964_v51  ;;  %v3546_v51 = vld [vmem:[%s5256_s5 + $0x60] sm:$0xff] }
 0xcf3   :  { %v3741_v53 = vpop.f32.mrf.mxu1  ;;  %v2013_v11 = vadd.f32 %v2009_v6, %v1989_v52 }
 0xcf4   :  { %v4777_v55 = vadd.f32 %v2026_v47, %v2014_v44  ;;  %v1870_v56 = vadd.f32 %v3741_v53, %v1806_v62  ;;  %v2024_v58 = vadd.f32 %v1859_v17, %v4590_v14  ;;  %v2012_v5 = vadd.f32 %v2008_v3, %v1988_v54  ;;  %v3549_v53 = vld [vmem:[%s5256_s5 + $0x78] sm:$0xff] }
 0xcf5   :  { %v1861_v63 = vpop.f32.mrf.mxu1 }
 0xcf6   :  { %v2027_v57 = vadd.f32 %v1870_v56, %v4583_v4  ;;  %2054 = vadd.xlane.f32.xlu1 %v4777_v55  ;;  %v1862_v0 = vadd.f32 %v1861_v63, %v1796_v26  ;;  %v2060_v62 = vmul.f32 %v4777_v55, %v4777_v55  ;;  %v4790_v4 = vadd.f32 %v2024_v58, %v2012_v5  ;;  %v3561_v63 = vld [vmem:[%s5261_s10 + $0x78] sm:$0xff]  ;;  %v3547_v58 = vld [vmem:[%s5256_s5 + $0x68] sm:$0xff]  ;;  %v3550_v5 = vld [vmem:[%s5257_s6 + $0x60] sm:$0xff] }
 0xcf8   :  { %v4784_v7 = vadd.f32 %v2027_v57, %v2015_v1  ;;  %v2025_v8 = vadd.f32 %v1862_v0, %v4592_v15  ;;  %v2058_v13 = vmul.f32 %v4790_v4, %v4790_v4  ;;  %v3552_v1 = vld [vmem:[%s5257_s6 + $0x70] sm:$0xff]  ;;  %v3559_v57 = vld [vmem:[%s5261_s10 + $0x68] sm:$0xff] }
 0xcfa   :  { %2056 = vadd.xlane.f32.xlu0 %v4784_v7  ;;  %2066 = vadd.xlane.f32.xlu1 %v2060_v62  ;;  %v2061_v14 = vmul.f32 %v4784_v7, %v4784_v7  ;;  %v4796_v9 = vadd.f32 %v2025_v8, %v2013_v11  ;;  %v3553_v8 = vld [vmem:[%s5257_s6 + $0x78] sm:$0xff] }
 0xcfc   :  { %v2059_v20 = vmul.f32 %v4796_v9, %v4796_v9 }
 0xcfe   :  { %2068 = vadd.xlane.f32.xlu0 %v2061_v14  ;;  %2050 = vadd.xlane.f32.xlu1 %v4790_v4 }
 0xd02   :  { %2052 = vadd.xlane.f32.xlu0 %v4796_v9  ;;  %2062 = vadd.xlane.f32.xlu1 %v2058_v13  ;;  %v3551_v13 = vld [vmem:[%s5257_s6 + $0x68] sm:$0xff] }
 0xd06   :  { %2064 = vadd.xlane.f32.xlu0 %v2059_v20 }
 0xd7f   :  { %v2055_v15 = vpop.xlane.xlu1 %2054 }
 0xd80   :  { %v2072_v21 = vmul.f32 0.0078125, %v2055_v15  ;;  %v3560_v15 = vld [vmem:[%s5261_s10 + $0x70] sm:$0xff] }
 0xd82   :  { %v2080_v16 = vmul.f32 %v2072_v21, %v2072_v21 }
 0xd83   :  { %v2057_v60 = vpop.xlane.xlu0 %2056  ;;  %v2067_v18 = vpop.xlane.xlu1 %2066 }
 0xd84   :  { %v2073_v19 = vmul.f32 0.0078125, %v2057_v60  ;;  %v2076_v22 = vmul.f32 0.0078125, %v2067_v18  ;;  %v3558_v60 = vld [vmem:[%s5261_s10 + $0x60] sm:$0xff] }
 0xd86   :  { %v2084_v23 = vsub.f32 %v2076_v22, %v2080_v16  ;;  %v2081_v26 = vmul.f32 %v2073_v19, %v2073_v19 }
 0xd87   :  { %v2069_v24 = vpop.xlane.xlu0 %2068  ;;  %v2051_v25 = vpop.xlane.xlu1 %2050 }
 0xd88   :  { %v2088_v27 = vadd.f32 1e-05, %v2084_v23  ;;  %v2077_v28 = vmul.f32 0.0078125, %v2069_v24  ;;  %v2070_v31 = vmul.f32 0.0078125, %v2051_v25 }
 0xd8a   :  { %3919 = vrsqrt.f32 %v2088_v27  ;;  %v2085_v32 = vsub.f32 %v2077_v28, %v2081_v26  ;;  %v2078_v36 = vmul.f32 %v2070_v31, %v2070_v31 }
 0xd8b   :  { %v2053_v33 = vpop.xlane.xlu0 %2052  ;;  %v2063_v34 = vpop.xlane.xlu1 %2062 }
 0xd8c   :  { %v2089_v35 = vadd.f32 1e-05, %v2085_v32  ;;  %v2071_v38 = vmul.f32 0.0078125, %v2053_v33  ;;  %v2074_v40 = vmul.f32 0.0078125, %v2063_v34 }
 0xd8e   :  { %3921 = vrsqrt.f32 %v2089_v35  ;;  %v2082_v41 = vsub.f32 %v2074_v40, %v2078_v36  ;;  %v2079_v43 = vmul.f32 %v2071_v38, %v2071_v38 }
 0xd8f   :  { %v2065_v42 = vpop.xlane.xlu0 %2064 }
 0xd90   :  { %v2086_v44 = vadd.f32 1e-05, %v2082_v41  ;;  %v2075_v45 = vmul.f32 0.0078125, %v2065_v42 }
 0xd92   :  { %3923 = vrsqrt.f32 %v2086_v44  ;;  %v2083_v46 = vsub.f32 %v2075_v45, %v2079_v43  ;;  %v3864_v45 = vld [vmem:[%s5260_s9 + $0x38] sm:$0xff]  }
 0xd94   :  { %v2087_v47 = vadd.f32 1e-05, %v2083_v46 }
 0xd96   :  { %3925 = vrsqrt.f32 %v2087_v47 }
 0xd97   :  { %v3920_v49 = vpop.eup %3919 }
 0xd98   :  { %v2096_v50 = vmul.f32 %v3920_v49, %v3548_v48 }
 0xd9a   :  { %2118 = vperm.xlu1 %3828, %v2096_v50   ;;  %v2100_v3 = vmul.f32 %v2096_v50, %v2072_v21  ;;  %v3863_v21 = vld [vmem:[%s5260_s9 + $0x30] sm:$0xff]  }
 0xd9b   :  { %v3922_v17 = vpop.eup %3921  ;;  %3746 = vmatprep.mubr.msk.bf16.mxu0 %vm391_vm0, %v3863_v21 }
 0xd9c   :  { %v2097_v56 = vmul.f32 %v3922_v17, %v3549_v53  ;;  %v2104_v54 = vsub.f32 %v3552_v1, %v2100_v3 }
 0xd9e   :  { %2123 = vperm.xlu0 %3829, %v2097_v56   ;;  %v2101_v6 = vmul.f32 %v2097_v56, %v2073_v19 }
 0xd9f   :  { %v3924_v61 = vpop.eup %3923 }
 0xda0   :  { %v2094_v29 = vmul.f32 %v3924_v61, %v3546_v51  ;;  %v2105_v14 = vsub.f32 %v3553_v8, %v2101_v6 }
 0xda2   :  { %2108 = vperm.xlu1 %3828, %v2094_v29   ;;  %2187 = vperm.xlu0 %3829, %v3561_v63   ;;  %v2098_v62 = vmul.f32 %v2094_v29, %v2070_v31 }
 0xda3   :  { %v3926_v59 = vpop.eup %3925 }
 0xda4   :  { %v2095_v0 = vmul.f32 %v3926_v59, %v3547_v58  ;;  %v2102_v52 = vsub.f32 %v3550_v5, %v2098_v62 }
 0xda6   :  { %2142 = vperm.xlu1 %3828, %v2104_v54   ;;  %2177 = vperm.xlu0 %3829, %v3559_v57   ;;  %v2099_v11 = vmul.f32 %v2095_v0, %v2071_v38 }
 0xda8   :  { %v2103_v20 = vsub.f32 %v3551_v13, %v2099_v11 }
 0xdaa   :  { %2113 = vperm.xlu1 %3828, %v2095_v0  }
 0xdae   :  { %2132 = vperm.xlu1 %3828, %v2102_v52  }
 0xdb2   :  { %2147 = vperm.xlu1 %3828, %v2105_v14  }
 0xdb6   :  { %2137 = vperm.xlu1 %3828, %v2103_v20  }
 0xdba   :  { %2182 = vperm.xlu1 %3828, %v3560_v15  }
 0xdbe   :  { %2172 = vperm.xlu1 %3828, %v3558_v60  }
 0xe15   :  { %v2119_v18 = vpop.permute.xlu1 %2118 }
 0xe16   :  { %v2128_v25 = vmul.f32 %v2119_v18, %v4777_v55 }
 0xe19   :  { %v2124_v23 = vpop.permute.xlu0 %2123 }
 0xe1a   :  { %v2129_v26 = vmul.f32 %v2124_v23, %v4784_v7 }
 0xe1d   :  { %v2109_v16 = vpop.permute.xlu1 %2108  ;;  %v2188_v53 = vpop.permute.xlu0 %2187 }
 0xe1e   :  { %v2126_v31 = vmul.f32 %v2109_v16, %v4790_v4 }
 0xe21   :  { %v2143_v19 = vpop.permute.xlu1 %2142  ;;  %v2178_v63 = vpop.permute.xlu0 %2177 }
 0xe22   :  { %v2152_v27 = vadd.f32 %v2143_v19, %v2128_v25 }
 0xe24   :  { %v2156_v33 = vmax.f32 %v2152_v27, 0.0 }
 0xe25   :  { %v2114_v22 = vpop.permute.xlu1 %2113 }
 0xe26   :  { %v2127_v34 = vmul.f32 %v2114_v22, %v4796_v9 }
 0xe29   :  { %v2133_v24 = vpop.permute.xlu1 %2132 }
 0xe2a   :  { %v2150_v35 = vadd.f32 %v2133_v24, %v2126_v31 }
 0xe2c   :  { %v2154_v42 = vmax.f32 %v2150_v35, 0.0 }
 0xe2d   :  { %v2148_v28 = vpop.permute.xlu1 %2147 }
 0xe2e   :  { %v2153_v32 = vadd.f32 %v2148_v28, %v2129_v26 }
 0xe30   :  { %v2157_v36 = vmax.f32 %v2153_v32, 0.0 }
 0xe31   :  { %v2138_v38 = vpop.permute.xlu1 %2137 }
 0xe32   :  { %v2151_v40 = vadd.f32 %v2138_v38, %v2127_v34  ;;  %v2164_v41 = vpack.c.bf16 %v2157_v36, %v2156_v33  ;;  %v3568_v34 = vld [vmem:[%s5258_s7 + $0x70] sm:$0xff] }
 0xe34   :  { %v2155_v43 = vmax.f32 %v2151_v40, 0.0  ;;  %3742 = vmatprep.subr.bf16.mxu0 %v2164_v41  ;;  %v3569_v40 = vld [vmem:[%s5258_s7 + $0x78] sm:$0xff] }
 0xe35   :  { %3743 = vmatpush3.bf16.msra.mxu0 %v2164_v41  ;;  %v2183_v46 = vpop.permute.xlu1 %2182  ;;  %v3566_v41 = vld [vmem:[%s5258_s7 + $0x60] sm:$0xff] }
 0xe36   :  { %v2163_v44 = vpack.c.bf16 %v2155_v43, %v2154_v42  ;;  %v3567_v43 = vld [vmem:[%s5258_s7 + $0x68] sm:$0xff] }
 0xe38   :  { %3744 = vmatprep.subr.bf16.mxu0 %v2163_v44 }
 0xe39   :  { %3745 = vmatpush3.bf16.msra.mxu0 %v2163_v44  ;;  %v2173_v29 = vpop.permute.xlu1 %2172 }
 0xe3c   :  { %3747 = vmatmul.mubr.msk.bf16.vlgmr.msra.gmra.mxu0 %vm391_vm0, %v3864_v45 }
 0xefc   :  { %v3748_v47 = vpop.f32.mrf.mxu0 }
 0xefd   :  { %v4851_v48 = vadd.f32 %v3748_v47, %v2183_v46 }
 0xefe   :  { %v2240_v49 = vpop.f32.mrf.mxu0 }
 0xeff   :  { %2277 = vadd.xlane.f32.xlu1 %v4851_v48  ;;  %v2283_v50 = vmul.f32 %v4851_v48, %v4851_v48  ;;  %v4861_v3 = vadd.f32 %v2240_v49, %v2173_v29 }
 0xf00   :  { %v3749_v17 = vpop.f32.mrf.mxu0 }
 0xf01   :  { %v4856_v56 = vadd.f32 %v3749_v17, %v2188_v53  ;;  %2289 = vadd.xlane.f32.xlu0 %v2283_v50  ;;  %v2281_v54 = vmul.f32 %v4861_v3, %v4861_v3  ;;  %v3573_v50 = vld [vmem:[%s5259_s8 + $0x78] sm:$0xff] }
 0xf02   :  { %v2243_v61 = vpop.f32.mrf.mxu0 }
 0xf03   :  { %v2284_v51 = vmul.f32 %v4856_v56, %v4856_v56  ;;  %v4863_v1 = vadd.f32 %v2243_v61, %v2178_v63  ;;  %v3571_v63 = vld [vmem:[%s5259_s8 + $0x68] sm:$0xff] }
 0xf05   :  { %2291 = vadd.xlane.f32.xlu1 %v2284_v51  ;;  %2279 = vadd.xlane.f32.xlu0 %v4856_v56  ;;  %v2282_v57 = vmul.f32 %v4863_v1, %v4863_v1  ;;  %v3572_v51 = vld [vmem:[%s5259_s8 + $0x70] sm:$0xff] }
 0xf09   :  { %2275 = vadd.xlane.f32.xlu1 %v4863_v1  ;;  %2273 = vadd.xlane.f32.xlu0 %v4861_v3 }
 0xf0d   :  { %2287 = vadd.xlane.f32.xlu1 %v2282_v57  ;;  %2285 = vadd.xlane.f32.xlu0 %v2281_v54 }
 0xf88   :  { %v2278_v59 = vpop.xlane.xlu1 %2277 }
 0xf89   :  { %v2295_v58 = vmul.f32 0.0078125, %v2278_v59  ;;  %v3570_v59 = vld [vmem:[%s5259_s8 + $0x60] sm:$0xff] }
 0xf8a   :  { %v2290_v0 = vpop.xlane.xlu0 %2289 }
 0xf8b   :  { %v2303_v62 = vmul.f32 %v2295_v58, %v2295_v58  ;;  %v2299_v5 = vmul.f32 0.0078125, %v2290_v0  ;;  %v3589_v0 = vld [vmem:[%s5264_s13 + $0x78] sm:$0xff] }
 0xf8d   :  { %v2307_v52 = vsub.f32 %v2299_v5, %v2303_v62  ;;  %v3592_v62 = vld [vmem:[%s5265_s14 + $0x70] sm:$0xff]  ;;  %v3593_v5 = vld [vmem:[%s5265_s14 + $0x78] sm:$0xff] }
 0xf8e   :  { %v2280_v6 = vpop.xlane.xlu0 %2279  ;;  %v2292_v8 = vpop.xlane.xlu1 %2291 }
 0xf8f   :  { %v2311_v14 = vadd.f32 1e-05, %v2307_v52  ;;  %v2296_v11 = vmul.f32 0.0078125, %v2280_v6  ;;  %v2300_v20 = vmul.f32 0.0078125, %v2292_v8  ;;  %v3865_v52 = vld [vmem:[%s5262_s11 + $0x30] sm:$0xff]   ;;  %v3597_v8 = vld [vmem:[%s5266_s15 + $0x78] sm:$0xff] }
 0xf90   :  { %v3596_v6 = vld [vmem:[%s5266_s15 + $0x70] sm:$0xff]  ;;  %3754 = vmatprep.mubr.msk.bf16.mxu1 %vm391_vm0, %v3865_v52 }
 0xf91   :  { %3927 = vrsqrt.f32 %v2311_v14  ;;  %v2304_v13 = vmul.f32 %v2296_v11, %v2296_v11  ;;  %v3588_v14 = vld [vmem:[%s5264_s13 + $0x70] sm:$0xff] }
 0xf92   :  { %v2274_v15 = vpop.xlane.xlu0 %2273  ;;  %v2276_v21 = vpop.xlane.xlu1 %2275 }
 0xf93   :  { %v2308_v60 = vsub.f32 %v2300_v20, %v2304_v13  ;;  %v2293_v18 = vmul.f32 0.0078125, %v2274_v15  ;;  %v2294_v16 = vmul.f32 0.0078125, %v2276_v21  ;;  %v3591_v13 = vld [vmem:[%s5265_s14 + $0x68] sm:$0xff]  ;;  %v3594_v20 = vld [vmem:[%s5266_s15 + $0x60] sm:$0xff]  ;;  %v3580_v15 = vld [vmem:[%s5288_s2 + $0x70] sm:$0xff] }
 0xf94   :  { %v3587_v21 = vld [vmem:[%s5264_s13 + $0x68] sm:$0xff] }
 0xf95   :  { %v2312_v19 = vadd.f32 1e-05, %v2308_v60  ;;  %v2301_v24 = vmul.f32 %v2293_v18, %v2293_v18  ;;  %v2302_v25 = vmul.f32 %v2294_v16, %v2294_v16  ;;  %v3581_v60 = vld [vmem:[%s5288_s2 + $0x78] sm:$0xff] }
 0xf96   :  { %v2286_v22 = vpop.xlane.xlu0 %2285  ;;  %v2288_v23 = vpop.xlane.xlu1 %2287 }
 0xf97   :  { %v2297_v26 = vmul.f32 0.0078125, %v2286_v22  ;;  %v2298_v27 = vmul.f32 0.0078125, %v2288_v23  ;;  %3929 = vrsqrt.f32 %v2312_v19  ;;  %v3578_v19 = vld [vmem:[%s5288_s2 + $0x60] sm:$0xff]  ;;  %v3579_v22 = vld [vmem:[%s5288_s2 + $0x68] sm:$0xff] }
 0xf99   :  { %v2305_v28 = vsub.f32 %v2297_v26, %v2301_v24  ;;  %v2306_v31 = vsub.f32 %v2298_v27, %v2302_v25 }
 0xf9b   :  { %v2309_v32 = vadd.f32 1e-05, %v2305_v28  ;;  %v2310_v33 = vadd.f32 1e-05, %v2306_v31 }
 0xf9d   :  { %3931 = vrsqrt.f32 %v2309_v32 }
 0xf9e   :  { %v3928_v35 = vpop.eup %3927  ;;  %3933 = vrsqrt.f32 %v2310_v33 }
 0xf9f   :  { %v2319_v36 = vmul.f32 %v3928_v35, %v3568_v34 }
 0xfa1   :  { %2341 = vperm.xlu0 %3829, %v2319_v36   ;;  %v2323_v53 = vmul.f32 %v2319_v36, %v2295_v58 }
 0xfa3   :  { %v2327_v29 = vsub.f32 %v3572_v51, %v2323_v53 }
 0xfa4   :  { %v3930_v38 = vpop.eup %3929 }
 0xfa5   :  { %v2320_v42 = vmul.f32 %v3930_v38, %v3569_v40 }
 0xfa7   :  { %v2324_v49 = vmul.f32 %v2320_v42, %v2296_v11  ;;  %v3590_v11 = vld [vmem:[%s5265_s14 + $0x60] sm:$0xff] }
 0xfa9   :  { %v2328_v17 = vsub.f32 %v3573_v50, %v2324_v49 }
 0xfaa   :  { %v3932_v44 = vpop.eup %3931 }
 0xfab   :  { %v3934_v45 = vpop.eup %3933  ;;  %v2317_v46 = vmul.f32 %v3932_v44, %v3566_v41 }
 0xfac   :  { %v2318_v47 = vmul.f32 %v3934_v45, %v3567_v43 }
 0xfad   :  { %2331 = vperm.xlu1 %3828, %v2317_v46   ;;  %v2321_v57 = vmul.f32 %v2317_v46, %v2293_v18  ;;  %v3595_v18 = vld [vmem:[%s5266_s15 + $0x68] sm:$0xff] }
 0xfae   :  { %2336 = vperm.xlu0 %3829, %v2318_v47   ;;  %v2322_v61 = vmul.f32 %v2318_v47, %v2294_v16  ;;  %v3586_v16 = vld [vmem:[%s5264_s13 + $0x60] sm:$0xff] }
 0xfaf   :  { %v2325_v58 = vsub.f32 %v3570_v59, %v2321_v57 }
 0xfb0   :  { %v2326_v54 = vsub.f32 %v3571_v63, %v2322_v61 }
 0xfb1   :  { %2346 = vperm.xlu1 %3828, %v2320_v42  }
 0xfb2   :  { %2370 = vperm.xlu0 %3829, %v2328_v17  }
 0xfb5   :  { %2365 = vperm.xlu1 %3828, %v2327_v29  }
 0xfb6   :  { %2360 = vperm.xlu0 %3829, %v2326_v54  }
 0xfb9   :  { %2355 = vperm.xlu1 %3828, %v2325_v58  }
 0xfba   :  { %3831 = vset.pattern.permute.xlu0 %v3984_v10 }
 0xfbb   :  { %2586 = vperm.xlu0 %3831, %v3589_v0  }
 0xfbd   :  { %2509 = vperm.xlu1 %3828, %v3592_v62  }
 0xfbf   :  { %3832 = vset.pattern.permute.xlu0 %v3983_v2 }
 0xfc0   :  { %2514 = vperm.xlu0 %3832, %v3593_v5  }
 0xfc1   :  { %2533 = vperm.xlu1 %3828, %v3596_v6   ;;  %v4969_v6 = vld [vmem:[%s5287_s1] ss:$0 sm:$0xff] }
 0xfc4   :  { %2538 = vperm.xlu0 %3832, %v3597_v8  }
 0xfc5   :  { %2557 = vperm.xlu1 %3828, %v3588_v14  }
 0xfc8   :  { %2562 = vperm.xlu0 %3832, %v3589_v0  }
 0xfc9   :  { %2499 = vperm.xlu1 %3828, %v3590_v11  }
 0xfcc   :  { %2504 = vperm.xlu0 %3832, %v3591_v13  }
 0xfcd   :  { %3830 = vset.pattern.permute.xlu1 %v3984_v10 }
 0xfce   :  { %2582 = vperm.xlu1 %3830, %v3588_v14  }
 0xfd0   :  { %2523 = vperm.xlu0 %3832, %v3594_v20  }
 0xfd2   :  { %3833 = vset.pattern.permute.xlu1 %v3983_v2 }
 0xfd3   :  { %2405 = vperm.xlu1 %3833, %v3580_v15  }
 0xfd4   :  { %2552 = vperm.xlu0 %3832, %v3587_v21  }
 0xfd7   :  { %2410 = vperm.xlu1 %3833, %v3581_v60  }
 0xfd8   :  { %2395 = vperm.xlu0 %3832, %v3578_v19  }
 0xfdb   :  { %2528 = vperm.xlu1 %3833, %v3595_v18  }
 0xfdc   :  { %3836 = vset.pattern.permute.xlu0 %v3985_v12 }
 0xfdd   :  { %2610 = vperm.xlu0 %3836, %v3589_v0  }
 0xfdf   :  { %2547 = vperm.xlu1 %3833, %v3586_v16  }
 0xfe1   :  { %2602 = vperm.xlu0 %3836, %v3587_v21  }
 0xfe3   :  { %3834 = vset.pattern.permute.xlu1 %v3985_v12 }
 0xfe4   :  { %2606 = vperm.xlu1 %3834, %v3588_v14  }
 0xfe5   :  { %3840 = vset.pattern.permute.xlu0 %v3983_v2 }
 0xfe8   :  { %3835 = vset.pattern.permute.xlu1 %v3984_v10 }
 0xfe9   :  { %2574 = vperm.xlu1 %3835, %v3586_v16  }
 0xfed   :  { %2578 = vperm.xlu1 %3835, %v3587_v21  }
 0xff1   :  { %3837 = vset.pattern.permute.xlu1 %v3983_v2 }
 0xff2   :  { %2400 = vperm.xlu1 %3837, %v3579_v22  }
 0xff6   :  { %3838 = vset.pattern.permute.xlu1 %v3985_v12 }
 0xff7   :  { %2598 = vperm.xlu1 %3838, %v3586_v16  }
 0xffb   :  { %3839 = vset.pattern.permute.xlu1 %v3983_v2 }
0x101c   :  { %v2342_v23 = vpop.permute.xlu0 %2341 }
0x101d   :  { %v2351_v31 = vmul.f32 %v2342_v23, %v4851_v48  ;;  %v3866_v48 = vld [vmem:[%s5262_s11 + $0x38] sm:$0xff]  }
0x1028   :  { %v2332_v24 = vpop.permute.xlu1 %2331 }
0x1029   :  { %v2337_v25 = vpop.permute.xlu0 %2336  ;;  %v2349_v38 = vmul.f32 %v2332_v24, %v4861_v3 }
0x102a   :  { %v2350_v34 = vmul.f32 %v2337_v25, %v4863_v1 }
0x102c   :  { %v2347_v26 = vpop.permute.xlu1 %2346 }
0x102d   :  { %v2371_v27 = vpop.permute.xlu0 %2370  ;;  %v2352_v28 = vmul.f32 %v2347_v26, %v4856_v56 }
0x102f   :  { %v2376_v32 = vadd.f32 %v2371_v27, %v2352_v28 }
0x1030   :  { %v2366_v33 = vpop.permute.xlu1 %2365 }
0x1031   :  { %v2361_v35 = vpop.permute.xlu0 %2360  ;;  %v2375_v36 = vadd.f32 %v2366_v33, %v2351_v31  ;;  %v2380_v40 = vmax.f32 %v2376_v32, 0.0 }
0x1032   :  { %v2374_v41 = vadd.f32 %v2361_v35, %v2350_v34 }
0x1033   :  { %v2379_v42 = vmax.f32 %v2375_v36, 0.0 }
0x1034   :  { %v2356_v43 = vpop.permute.xlu1 %2355  ;;  %v2378_v46 = vmax.f32 %v2374_v41, 0.0 }
0x1035   :  { %v2373_v44 = vadd.f32 %v2356_v43, %v2349_v38  ;;  %v2387_v45 = vpack.c.bf16 %v2380_v40, %v2379_v42 }
0x1036   :  { %v2587_v17 = vpop.permute.xlu0 %2586 }
0x1037   :  { %v2377_v47 = vmax.f32 %v2373_v44, 0.0  ;;  %3750 = vmatprep.subr.bf16.mxu1 %v2387_v45  ;;  %v2592_v22 = vmul.f32 %v2587_v17, %v4155_v39 }
0x1038   :  { %3751 = vmatpush3.bf16.msra.mxu1 %v2387_v45  ;;  %v2510_v3 = vpop.permute.xlu1 %2509 }
0x1039   :  { %v2386_v56 = vpack.c.bf16 %v2378_v46, %v2377_v47  ;;  %v2519_v11 = vmul.f32 %v4969_v6, %v2510_v3 }
0x103b   :  { %3752 = vmatprep.subr.bf16.mxu1 %v2386_v56  ;;  %v2515_v61 = vpop.permute.xlu0 %2514 }
0x103c   :  { %3753 = vmatpush3.bf16.msra.mxu1 %v2386_v56  ;;  %v2534_v1 = vpop.permute.xlu1 %2533  ;;  %v2520_v8 = vmul.f32 %v4969_v6, %v2515_v61 }
0x103d   :  { %v2543_v60 = vadd.f32 %v2534_v1, %v2519_v11 }
0x103f   :  { %3755 = vmatmul.mubr.msk.bf16.vlgmr.msra.gmra.mxu1 %vm391_vm0, %v3866_v48  ;;  %v2539_v29 = vpop.permute.xlu0 %2538 }
0x1040   :  { %v2558_v49 = vpop.permute.xlu1 %2557  ;;  %v2544_v13 = vadd.f32 %v2539_v29, %v2520_v8 }
0x1041   :  { %v2567_v20 = vmul.f32 %v2558_v49, %v4149_v30 }
0x1043   :  { %v2563_v54 = vpop.permute.xlu0 %2562  ;;  %v2571_v23 = vadd.f32 %v2567_v20, %v2543_v60 }
0x1044   :  { %v2500_v50 = vpop.permute.xlu1 %2499  ;;  %v2568_v15 = vmul.f32 %v2563_v54, %v4149_v30 }
0x1045   :  { %v2517_v31 = vmul.f32 %v4969_v6, %v2500_v50 }
0x1046   :  { %v2572_v24 = vadd.f32 %v2568_v15, %v2544_v13 }
0x1047   :  { %v2505_v58 = vpop.permute.xlu0 %2504 }
0x1048   :  { %v2518_v16 = vmul.f32 %v4969_v6, %v2505_v58  ;;  %v2596_v40 = vadd.f32 %v2592_v22, %v2572_v24 }
0x1049   :  { %v2583_v53 = vpop.permute.xlu1 %2582 }
0x104a   :  { %v2591_v18 = vmul.f32 %v2583_v53, %v4155_v39 }
0x104b   :  { %v2524_v62 = vpop.permute.xlu0 %2523 }
0x104c   :  { %v2595_v27 = vadd.f32 %v2591_v18, %v2571_v23  ;;  %v2541_v43 = vadd.f32 %v2524_v62, %v2517_v31 }
0x104e   :  { %v2406_v51 = vpop.permute.xlu1 %2405 }
0x104f   :  { %v2553_v52 = vpop.permute.xlu0 %2552 }
0x1050   :  { %v2566_v34 = vmul.f32 %v2553_v52, %v4149_v30 }
0x1052   :  { %v2411_v63 = vpop.permute.xlu1 %2410 }
0x1053   :  { %v2396_v21 = vpop.permute.xlu0 %2395 }
0x1056   :  { %v2529_v57 = vpop.permute.xlu1 %2528 }
0x1057   :  { %v2542_v32 = vadd.f32 %v2529_v57, %v2518_v16 }
0x1058   :  { %v2611_v35 = vpop.permute.xlu0 %2610 }
0x1059   :  { %v2616_v41 = vmul.f32 %v2611_v35, %v4153_v37  ;;  %v2570_v1 = vadd.f32 %v2566_v34, %v2542_v32 }
0x105a   :  { %v2548_v59 = vpop.permute.xlu1 %2547 }
0x105b   :  { %v2565_v33 = vmul.f32 %v2548_v59, %v4149_v30  ;;  %v2620_v17 = vadd.f32 %v2616_v41, %v2596_v40 }
0x105c   :  { %v2603_v61 = vpop.permute.xlu0 %2602 }
0x105d   :  { %v2569_v3 = vadd.f32 %v2565_v33, %v2541_v43 }
0x105f   :  { %v2607_v0 = vpop.permute.xlu1 %2606 }
0x1060   :  { %v2615_v25 = vmul.f32 %v2607_v0, %v4153_v37  ;;  %v2614_v0 = vmul.f32 %v2603_v61, %v4153_v37 }
0x1062   :  { %v2619_v38 = vadd.f32 %v2615_v25, %v2595_v27 }
0x1064   :  { %v2575_v5 = vpop.permute.xlu1 %2574 }
0x1065   :  { %v2589_v44 = vmul.f32 %v2575_v5, %v4155_v39 }
0x1068   :  { %v2579_v14 = vpop.permute.xlu1 %2578 }
0x1069   :  { %v2590_v50 = vmul.f32 %v2579_v14, %v4155_v39 }
0x106b   :  { %v2594_v58 = vadd.f32 %v2590_v50, %v2570_v1  ;;  %v3598_v1 = vld [vmem:[%s5256_s5 + $0x80] sm:$0xff] }
0x106c   :  { %v3610_v50 = vld [vmem:[%s5261_s10 + $0x80] sm:$0xff] }
0x106d   :  { %v2401_v19 = vpop.permute.xlu1 %2400  ;;  %v2618_v5 = vadd.f32 %v2614_v0, %v2594_v58 }
0x1072   :  { %v2599_v45 = vpop.permute.xlu1 %2598 }
0x1073   :  { %v2613_v53 = vmul.f32 %v2599_v45, %v4153_v37 }
0x10ff   :  { %v3756_v26 = vpop.f32.mrf.mxu1 }
0x1100   :  { %v2472_v28 = vadd.f32 %v3756_v26, %v2406_v51 }
0x1101   :  { %v2463_v36 = vpop.f32.mrf.mxu1 }
0x1102   :  { %v2631_v42 = vadd.f32 %v2472_v28, %v4777_v55  ;;  %v2464_v56 = vadd.f32 %v2463_v36, %v2396_v21  ;;  %v2593_v55 = vadd.f32 %v2589_v44, %v2569_v3  ;;  %v3600_v44 = vld [vmem:[%s5256_s5 + $0x90] sm:$0xff] }
0x1103   :  { %v3757_v46 = vpop.f32.mrf.mxu1 }
0x1104   :  { %v4985_v47 = vadd.f32 %v2631_v42, %v2619_v38  ;;  %v2475_v48 = vadd.f32 %v3757_v46, %v2411_v63  ;;  %v2629_v29 = vadd.f32 %v2464_v56, %v4790_v4  ;;  %v2617_v59 = vadd.f32 %v2613_v53, %v2593_v55  ;;  %v3601_v56 = vld [vmem:[%s5256_s5 + $0x98] sm:$0xff] }
0x1105   :  { %v2466_v49 = vpop.f32.mrf.mxu1 }
0x1106   :  { %v2632_v51 = vadd.f32 %v2475_v48, %v4784_v7  ;;  %2659 = vadd.xlane.f32.xlu1 %v4985_v47  ;;  %v2467_v54 = vadd.f32 %v2466_v49, %v2401_v19  ;;  %v2665_v63 = vmul.f32 %v4985_v47, %v4985_v47  ;;  %v4998_v7 = vadd.f32 %v2629_v29, %v2617_v59  ;;  %v3599_v29 = vld [vmem:[%s5256_s5 + $0x88] sm:$0xff]  ;;  %v3602_v59 = vld [vmem:[%s5257_s6 + $0x80] sm:$0xff] }
0x1108   :  { %v4992_v57 = vadd.f32 %v2632_v51, %v2620_v17  ;;  %v2630_v62 = vadd.f32 %v2467_v54, %v4796_v9  ;;  %v2663_v8 = vmul.f32 %v4998_v7, %v4998_v7  ;;  %v3604_v51 = vld [vmem:[%s5257_s6 + $0x90] sm:$0xff] }
0x110a   :  { %2661 = vadd.xlane.f32.xlu0 %v4992_v57  ;;  %2671 = vadd.xlane.f32.xlu1 %v2665_v63  ;;  %v2666_v4 = vmul.f32 %v4992_v57, %v4992_v57  ;;  %v5004_v52 = vadd.f32 %v2630_v62, %v2618_v5  ;;  %v3605_v62 = vld [vmem:[%s5257_s6 + $0x98] sm:$0xff] }
0x110c   :  { %v2664_v14 = vmul.f32 %v5004_v52, %v5004_v52 }
0x110e   :  { %2673 = vadd.xlane.f32.xlu0 %v2666_v4  ;;  %2655 = vadd.xlane.f32.xlu1 %v4998_v7 }
0x1112   :  { %2657 = vadd.xlane.f32.xlu0 %v5004_v52  ;;  %2667 = vadd.xlane.f32.xlu1 %v2663_v8  ;;  %v3603_v8 = vld [vmem:[%s5257_s6 + $0x88] sm:$0xff] }
0x1116   :  { %2669 = vadd.xlane.f32.xlu0 %v2664_v14 }
0x118f   :  { %v2660_v9 = vpop.xlane.xlu1 %2659 }
0x1190   :  { %v2677_v11 = vmul.f32 0.0078125, %v2660_v9  ;;  %v3612_v9 = vld [vmem:[%s5261_s10 + $0x90] sm:$0xff] }
0x1192   :  { %v2685_v15 = vmul.f32 %v2677_v11, %v2677_v11 }
0x1193   :  { %v2662_v13 = vpop.xlane.xlu0 %2661  ;;  %v2672_v20 = vpop.xlane.xlu1 %2671 }
0x1194   :  { %v2678_v21 = vmul.f32 0.0078125, %v2662_v13  ;;  %v2681_v60 = vmul.f32 0.0078125, %v2672_v20  ;;  %v3613_v13 = vld [vmem:[%s5261_s10 + $0x98] sm:$0xff]  ;;  %v3611_v20 = vld [vmem:[%s5261_s10 + $0x88] sm:$0xff] }
0x1196   :  { %v2689_v18 = vsub.f32 %v2681_v60, %v2685_v15  ;;  %v2686_v22 = vmul.f32 %v2678_v21, %v2678_v21 }
0x1197   :  { %v2674_v16 = vpop.xlane.xlu0 %2673  ;;  %v2656_v19 = vpop.xlane.xlu1 %2655 }
0x1198   :  { %v2693_v23 = vadd.f32 1e-05, %v2689_v18  ;;  %v2682_v24 = vmul.f32 0.0078125, %v2674_v16  ;;  %v2675_v25 = vmul.f32 0.0078125, %v2656_v19 }
0x119a   :  { %3935 = vrsqrt.f32 %v2693_v23  ;;  %v2690_v26 = vsub.f32 %v2682_v24, %v2686_v22  ;;  %v2683_v32 = vmul.f32 %v2675_v25, %v2675_v25 }
0x119b   :  { %v2658_v27 = vpop.xlane.xlu0 %2657  ;;  %v2668_v28 = vpop.xlane.xlu1 %2667 }
0x119c   :  { %v2694_v31 = vadd.f32 1e-05, %v2690_v26  ;;  %v2676_v33 = vmul.f32 0.0078125, %v2658_v27  ;;  %v2679_v34 = vmul.f32 0.0078125, %v2668_v28 }
0x119e   :  { %3937 = vrsqrt.f32 %v2694_v31  ;;  %v2687_v35 = vsub.f32 %v2679_v34, %v2683_v32  ;;  %v2684_v38 = vmul.f32 %v2676_v33, %v2676_v33 }
0x119f   :  { %v2670_v36 = vpop.xlane.xlu0 %2669 }
0x11a0   :  { %v2691_v40 = vadd.f32 1e-05, %v2687_v35  ;;  %v2680_v41 = vmul.f32 0.0078125, %v2670_v36 }
0x11a2   :  { %3939 = vrsqrt.f32 %v2691_v40  ;;  %v2688_v42 = vsub.f32 %v2680_v41, %v2684_v38 }
0x11a4   :  { %v2692_v43 = vadd.f32 1e-05, %v2688_v42  ;;  %v3868_v42 = vld [vmem:[%s5260_s9 + $0x48] sm:$0xff]  }
0x11a6   :  { %3941 = vrsqrt.f32 %v2692_v43 }
0x11a7   :  { %v3936_v45 = vpop.eup %3935 }
0x11a8   :  { %v2701_v46 = vmul.f32 %v3936_v45, %v3600_v44 }
0x11aa   :  { %2723 = vperm.xlu1 %3839, %v2701_v46   ;;  %v2705_v17 = vmul.f32 %v2701_v46, %v2677_v11  ;;  %v3867_v11 = vld [vmem:[%s5260_s9 + $0x40] sm:$0xff]  }
0x11ab   :  { %v3938_v48 = vpop.eup %3937  ;;  %3762 = vmatprep.mubr.msk.bf16.mxu0 %vm391_vm0, %v3867_v11 }
0x11ac   :  { %v2702_v3 = vmul.f32 %v3938_v48, %v3601_v56  ;;  %v2709_v55 = vsub.f32 %v3604_v51, %v2705_v17 }
0x11ae   :  { %2728 = vperm.xlu0 %3840, %v2702_v3   ;;  %v2706_v0 = vmul.f32 %v2702_v3, %v2678_v21 }
0x11af   :  { %v3940_v49 = vpop.eup %3939 }
0x11b0   :  { %v2699_v53 = vmul.f32 %v3940_v49, %v3598_v1  ;;  %v2710_v4 = vsub.f32 %v3605_v62, %v2706_v0 }
0x11b2   :  { %2713 = vperm.xlu1 %3839, %v2699_v53   ;;  %2777 = vperm.xlu0 %3840, %v3610_v50   ;;  %v2703_v63 = vmul.f32 %v2699_v53, %v2675_v25 }
0x11b3   :  { %v3942_v61 = vpop.eup %3941 }
0x11b4   :  { %v2700_v54 = vmul.f32 %v3942_v61, %v3599_v29  ;;  %v2707_v58 = vsub.f32 %v3602_v59, %v2703_v63 }
0x11b6   :  { %2747 = vperm.xlu1 %3839, %v2709_v55   ;;  %v2704_v5 = vmul.f32 %v2700_v54, %v2676_v33 }
0x11b8   :  { %v2708_v14 = vsub.f32 %v3603_v8, %v2704_v5 }
0x11ba   :  { %2718 = vperm.xlu1 %3839, %v2700_v54  }
0x11be   :  { %2737 = vperm.xlu1 %3839, %v2707_v58  }
0x11c2   :  { %2752 = vperm.xlu1 %3839, %v2710_v4  }
0x11c6   :  { %2742 = vperm.xlu1 %3839, %v2708_v14  }
0x11ca   :  { %2787 = vperm.xlu1 %3839, %v3612_v9  }
0x11ce   :  { %2792 = vperm.xlu1 %3839, %v3613_v13  }
0x11d2   :  { %2782 = vperm.xlu1 %3839, %v3611_v20  }
0x1225   :  { %v2724_v15 = vpop.permute.xlu1 %2723 }
0x1226   :  { %v2733_v22 = vmul.f32 %v2724_v15, %v4985_v47 }
0x1229   :  { %v2729_v16 = vpop.permute.xlu0 %2728 }
0x122a   :  { %v2734_v23 = vmul.f32 %v2729_v16, %v4992_v57 }
0x122d   :  { %v2714_v21 = vpop.permute.xlu1 %2713  ;;  %v2778_v49 = vpop.permute.xlu0 %2777 }
0x122e   :  { %v2731_v26 = vmul.f32 %v2714_v21, %v4998_v7 }
0x1231   :  { %v2748_v60 = vpop.permute.xlu1 %2747 }
0x1232   :  { %v2757_v24 = vadd.f32 %v2748_v60, %v2733_v22 }
0x1234   :  { %v2761_v28 = vmax.f32 %v2757_v24, 0.0 }
0x1235   :  { %v2719_v18 = vpop.permute.xlu1 %2718 }
0x1236   :  { %v2732_v31 = vmul.f32 %v2719_v18, %v5004_v52 }
0x1239   :  { %v2738_v19 = vpop.permute.xlu1 %2737 }
0x123a   :  { %v2755_v32 = vadd.f32 %v2738_v19, %v2731_v26 }
0x123c   :  { %v2759_v38 = vmax.f32 %v2755_v32, 0.0  ;;  %v3620_v32 = vld [vmem:[%s5258_s7 + $0x90] sm:$0xff] }
0x123d   :  { %v2753_v25 = vpop.permute.xlu1 %2752 }
0x123e   :  { %v2758_v27 = vadd.f32 %v2753_v25, %v2734_v23 }
0x1240   :  { %v2762_v33 = vmax.f32 %v2758_v27, 0.0 }
0x1241   :  { %v2743_v34 = vpop.permute.xlu1 %2742 }
0x1242   :  { %v2769_v35 = vpack.c.bf16 %v2762_v33, %v2761_v28  ;;  %v2756_v36 = vadd.f32 %v2743_v34, %v2732_v31 }
0x1244   :  { %v2760_v40 = vmax.f32 %v2756_v36, 0.0  ;;  %3758 = vmatprep.subr.bf16.mxu0 %v2769_v35  ;;  %v3621_v36 = vld [vmem:[%s5258_s7 + $0x98] sm:$0xff] }
0x1245   :  { %3759 = vmatpush3.bf16.msra.mxu0 %v2769_v35  ;;  %v2788_v43 = vpop.permute.xlu1 %2787  ;;  %v3624_v35 = vld [vmem:[%s5259_s8 + $0x90] sm:$0xff] }
0x1246   :  { %v2768_v41 = vpack.c.bf16 %v2760_v40, %v2759_v38 }
0x1248   :  { %3760 = vmatprep.subr.bf16.mxu0 %v2768_v41 }
0x1249   :  { %3761 = vmatpush3.bf16.msra.mxu0 %v2768_v41  ;;  %v2793_v56 = vpop.permute.xlu1 %2792 }
0x124c   :  { %3763 = vmatmul.mubr.msk.bf16.vlgmr.msra.gmra.mxu0 %vm391_vm0, %v3868_v42 }
0x124d   :  { %v2783_v51 = vpop.permute.xlu1 %2782 }
0x130c   :  { %v3764_v44 = vpop.f32.mrf.mxu0 }
0x130d   :  { %v5059_v45 = vadd.f32 %v3764_v44, %v2788_v43  ;;  %v3618_v43 = vld [vmem:[%s5258_s7 + $0x80] sm:$0xff] }
0x130e   :  { %v2845_v46 = vpop.f32.mrf.mxu0 }
0x130f   :  { %2882 = vadd.xlane.f32.xlu0 %v5059_v45  ;;  %v2888_v1 = vmul.f32 %v5059_v45, %v5059_v45  ;;  %v5067_v50 = vadd.f32 %v2845_v46, %v2778_v49 }
0x1310   :  { %v3765_v48 = vpop.f32.mrf.mxu0 }
0x1311   :  { %v5062_v3 = vadd.f32 %v3765_v48, %v2793_v56  ;;  %v2886_v61 = vmul.f32 %v5067_v50, %v5067_v50  ;;  %v3619_v56 = vld [vmem:[%s5258_s7 + $0x88] sm:$0xff]  ;;  %v3622_v48 = vld [vmem:[%s5259_s8 + $0x80] sm:$0xff] }
0x1312   :  { %v2848_v17 = vpop.f32.mrf.mxu0 }
0x1313   :  { %2894 = vadd.xlane.f32.xlu0 %v2888_v1  ;;  %2884 = vadd.xlane.f32.xlu1 %v5062_v3  ;;  %v2889_v53 = vmul.f32 %v5062_v3, %v5062_v3  ;;  %v5072_v55 = vadd.f32 %v2848_v17, %v2783_v51 }
0x1315   :  { %v2887_v29 = vmul.f32 %v5072_v55, %v5072_v55 }
0x1317   :  { %2878 = vadd.xlane.f32.xlu1 %v5067_v50  ;;  %2896 = vadd.xlane.f32.xlu0 %v2889_v53 }
0x131b   :  { %2890 = vadd.xlane.f32.xlu1 %v2886_v61  ;;  %2880 = vadd.xlane.f32.xlu0 %v5072_v55  ;;  %v3625_v61 = vld [vmem:[%s5259_s8 + $0x98] sm:$0xff] }
0x131f   :  { %2892 = vadd.xlane.f32.xlu0 %v2887_v29  ;;  %v3644_v29 = vld [vmem:[%s5265_s14 + $0x90] sm:$0xff] }
0x1398   :  { %v2883_v54 = vpop.xlane.xlu0 %2882 }
0x1399   :  { %v2900_v63 = vmul.f32 0.0078125, %v2883_v54 }
0x139b   :  { %v2908_v0 = vmul.f32 %v2900_v63, %v2900_v63 }
0x139c   :  { %v2895_v59 = vpop.xlane.xlu0 %2894  ;;  %v2885_v58 = vpop.xlane.xlu1 %2884 }
0x139d   :  { %v2904_v62 = vmul.f32 0.0078125, %v2895_v59  ;;  %v2901_v4 = vmul.f32 0.0078125, %v2885_v58  ;;  %v3623_v59 = vld [vmem:[%s5259_s8 + $0x88] sm:$0xff]  ;;  %v3648_v58 = vld [vmem:[%s5266_s15 + $0x90] sm:$0xff] }
0x139f   :  { %v2912_v5 = vsub.f32 %v2904_v62, %v2908_v0  ;;  %v2909_v11 = vmul.f32 %v2901_v4, %v2901_v4  ;;  %v3645_v62 = vld [vmem:[%s5265_s14 + $0x98] sm:$0xff] }
0x13a0   :  { %v2897_v8 = vpop.xlane.xlu0 %2896  ;;  %v2879_v14 = vpop.xlane.xlu1 %2878 }
0x13a1   :  { %v2916_v9 = vadd.f32 1e-05, %v2912_v5  ;;  %v2905_v13 = vmul.f32 0.0078125, %v2897_v8  ;;  %v2898_v20 = vmul.f32 0.0078125, %v2879_v14  ;;  %v3869_v5 = vld [vmem:[%s5262_s11 + $0x40] sm:$0xff]   ;;  %v3649_v8 = vld [vmem:[%s5266_s15 + $0x98] sm:$0xff] }
0x13a2   :  { %v3642_v14 = vld [vmem:[%s5265_s14 + $0x80] sm:$0xff]  ;;  %3770 = vmatprep.mubr.msk.bf16.mxu1 %vm391_vm0, %v3869_v5 }
0x13a3   :  { %3943 = vrsqrt.f32 %v2916_v9  ;;  %v2913_v15 = vsub.f32 %v2905_v13, %v2909_v11  ;;  %v2906_v16 = vmul.f32 %v2898_v20, %v2898_v20  ;;  %v3641_v9 = vld [vmem:[%s5264_s13 + $0x98] sm:$0xff]  ;;  %v3643_v13 = vld [vmem:[%s5265_s14 + $0x88] sm:$0xff] }
0x13a4   :  { %v2881_v21 = vpop.xlane.xlu0 %2880  ;;  %v2891_v60 = vpop.xlane.xlu1 %2890  ;;  %v3633_v11 = vld [vmem:[%s5288_s2 + $0x98] sm:$0xff] }
0x13a5   :  { %v2917_v18 = vadd.f32 1e-05, %v2913_v15  ;;  %v2899_v19 = vmul.f32 0.0078125, %v2881_v21  ;;  %v2902_v22 = vmul.f32 0.0078125, %v2891_v60  ;;  %v3639_v15 = vld [vmem:[%s5264_s13 + $0x88] sm:$0xff]  ;;  %v3632_v21 = vld [vmem:[%s5288_s2 + $0x90] sm:$0xff] }
0x13a6   :  { %v3646_v60 = vld [vmem:[%s5266_s15 + $0x80] sm:$0xff] }
0x13a7   :  { %3945 = vrsqrt.f32 %v2917_v18  ;;  %v2910_v23 = vsub.f32 %v2902_v22, %v2906_v16  ;;  %v2907_v25 = vmul.f32 %v2899_v19, %v2899_v19  ;;  %v3647_v18 = vld [vmem:[%s5266_s15 + $0x88] sm:$0xff]  ;;  %v3630_v16 = vld [vmem:[%s5288_s2 + $0x80] sm:$0xff] }
0x13a8   :  { %v2893_v24 = vpop.xlane.xlu0 %2892 }
0x13a9   :  { %v2914_v26 = vadd.f32 1e-05, %v2910_v23  ;;  %v2903_v27 = vmul.f32 0.0078125, %v2893_v24 }
0x13ab   :  { %3947 = vrsqrt.f32 %v2914_v26  ;;  %v2911_v28 = vsub.f32 %v2903_v27, %v2907_v25 }
0x13ad   :  { %v2915_v31 = vadd.f32 1e-05, %v2911_v28 }
0x13af   :  { %3949 = vrsqrt.f32 %v2915_v31 }
0x13b0   :  { %v3944_v33 = vpop.eup %3943 }
0x13b1   :  { %v2924_v34 = vmul.f32 %v3944_v33, %v3620_v32 }
0x13b3   :  { %2946 = vperm.xlu1 %3839, %v2924_v34   ;;  %v2928_v38 = vmul.f32 %v2924_v34, %v2900_v63 }
0x13b4   :  { %v3946_v40 = vpop.eup %3945 }
0x13b5   :  { %v2932_v41 = vsub.f32 %v3624_v35, %v2928_v38  ;;  %v2925_v42 = vmul.f32 %v3946_v40, %v3621_v36 }
0x13b7   :  { %2970 = vperm.xlu1 %3839, %v2932_v41   ;;  %2951 = vperm.xlu0 %3840, %v2925_v42   ;;  %v2929_v51 = vmul.f32 %v2925_v42, %v2901_v4  ;;  %v3640_v4 = vld [vmem:[%s5264_s13 + $0x90] sm:$0xff] }
0x13b8   :  { %v3948_v44 = vpop.eup %3947 }
0x13b9   :  { %v2922_v46 = vmul.f32 %v3948_v44, %v3618_v43  ;;  %v2933_v54 = vsub.f32 %v3625_v61, %v2929_v51 }
0x13bb   :  { %2936 = vperm.xlu0 %3840, %v2922_v46   ;;  %v2926_v1 = vmul.f32 %v2922_v46, %v2898_v20  ;;  %v3638_v20 = vld [vmem:[%s5264_s13 + $0x80] sm:$0xff] }
0x13bc   :  { %v3950_v49 = vpop.eup %3949 }
0x13bd   :  { %v2923_v53 = vmul.f32 %v3950_v49, %v3619_v56  ;;  %v2930_v17 = vsub.f32 %v3622_v48, %v2926_v1 }
0x13bf   :  { %2941 = vperm.xlu1 %3839, %v2923_v53   ;;  %2960 = vperm.xlu0 %3840, %v2930_v17   ;;  %v2927_v63 = vmul.f32 %v2923_v53, %v2899_v19  ;;  %v3631_v19 = vld [vmem:[%s5288_s2 + $0x88] sm:$0xff] }
0x13c1   :  { %v2931_v0 = vsub.f32 %v3623_v59, %v2927_v63 }
0x13c3   :  { %2975 = vperm.xlu1 %3839, %v2933_v54   ;;  %3114 = vperm.xlu0 %3840, %v3644_v29  }
0x13c7   :  { %2965 = vperm.xlu1 %3839, %v2931_v0   ;;  %3138 = vperm.xlu0 %3840, %v3648_v58  }
0x13cb   :  { %3119 = vperm.xlu1 %3839, %v3645_v62   ;;  %3162 = vperm.xlu0 %3840, %v3640_v4  }
0x13cf   :  { %3143 = vperm.xlu1 %3839, %v3649_v8   ;;  %3104 = vperm.xlu0 %3840, %v3642_v14  }
0x13d3   :  { %3167 = vperm.xlu1 %3839, %v3641_v9   ;;  %3015 = vperm.xlu0 %3840, %v3633_v11  }
0x13d7   :  { %3109 = vperm.xlu1 %3839, %v3643_v13   ;;  %3152 = vperm.xlu0 %3840, %v3638_v20  }
0x13db   :  { %3841 = vset.pattern.permute.xlu1 %v3984_v10  ;;  %3843 = vset.pattern.permute.xlu0 %v3984_v10 }
0x13dc   :  { %3191 = vperm.xlu1 %3841, %v3641_v9   ;;  %3187 = vperm.xlu0 %3843, %v3640_v4  }
0x13e0   :  { %3842 = vset.pattern.permute.xlu1 %v3983_v2  ;;  %3183 = vperm.xlu0 %3843, %v3639_v15  }
0x13e1   :  { %3010 = vperm.xlu1 %3842, %v3632_v21  }
0x13e4   :  { %3846 = vset.pattern.permute.xlu0 %v3985_v12 }
0x13e5   :  { %3128 = vperm.xlu1 %3842, %v3646_v60   ;;  %3211 = vperm.xlu0 %3846, %v3640_v4  }
0x13e9   :  { %3133 = vperm.xlu1 %3842, %v3647_v18   ;;  %3203 = vperm.xlu0 %3846, %v3638_v20  }
0x13ed   :  { %3157 = vperm.xlu1 %3842, %v3639_v15   ;;  %3849 = vset.pattern.permute.xlu0 %v3983_v2 }
0x13f1   :  { %3844 = vset.pattern.permute.xlu1 %v3985_v12 }
0x13f2   :  { %3215 = vperm.xlu1 %3844, %v3641_v9  }
0x13f6   :  { %3845 = vset.pattern.permute.xlu1 %v3984_v10 }
0x13f7   :  { %3179 = vperm.xlu1 %3845, %v3638_v20  }
0x13fb   :  { %3847 = vset.pattern.permute.xlu1 %v3983_v2 }
0x13fc   :  { %3000 = vperm.xlu1 %3847, %v3630_v16  }
0x1400   :  { %3005 = vperm.xlu1 %3847, %v3631_v19  }
0x1404   :  { %3848 = vset.pattern.permute.xlu1 %v3985_v12 }
0x1405   :  { %3207 = vperm.xlu1 %3848, %v3639_v15  }
0x1409   :  { %3850 = vset.pattern.permute.xlu1 %v3983_v2 }
0x142e   :  { %v2947_v22 = vpop.permute.xlu1 %2946 }
0x142f   :  { %v2956_v26 = vmul.f32 %v2947_v22, %v5059_v45 }
0x1432   :  { %v2952_v10 = vpop.permute.xlu0 %2951  ;;  %v2971_v23 = vpop.permute.xlu1 %2970 }
0x1433   :  { %v2957_v27 = vmul.f32 %v2952_v10, %v5062_v3  ;;  %v2980_v28 = vadd.f32 %v2971_v23, %v2956_v26  ;;  %v3870_v3 = vld [vmem:[%s5262_s11 + $0x48] sm:$0xff]  }
0x1435   :  { %v2984_v35 = vmax.f32 %v2980_v28, 0.0 }
0x1436   :  { %v2937_v24 = vpop.permute.xlu0 %2936 }
0x1437   :  { %v2954_v33 = vmul.f32 %v2937_v24, %v5067_v50 }
0x143a   :  { %v2942_v25 = vpop.permute.xlu1 %2941  ;;  %v2961_v31 = vpop.permute.xlu0 %2960 }
0x143b   :  { %v2978_v12 = vadd.f32 %v2961_v31, %v2954_v33  ;;  %v2955_v36 = vmul.f32 %v2942_v25, %v5072_v55 }
0x143d   :  { %v2982_v42 = vmax.f32 %v2978_v12, 0.0 }
0x143e   :  { %v2976_v32 = vpop.permute.xlu1 %2975  ;;  %v3115_v46 = vpop.permute.xlu0 %3114 }
0x143f   :  { %v2981_v34 = vadd.f32 %v2976_v32, %v2957_v27  ;;  %v3124_v5 = vmul.f32 %v4969_v6, %v3115_v46 }
0x1441   :  { %v2985_v2 = vmax.f32 %v2981_v34, 0.0 }
0x1442   :  { %v2966_v38 = vpop.permute.xlu1 %2965  ;;  %v3139_v48 = vpop.permute.xlu0 %3138 }
0x1443   :  { %v2992_v40 = vpack.c.bf16 %v2985_v2, %v2984_v35  ;;  %v2979_v41 = vadd.f32 %v2966_v38, %v2955_v36  ;;  %v3148_v9 = vadd.f32 %v3139_v48, %v3124_v5 }
0x1445   :  { %v2983_v43 = vmax.f32 %v2979_v41, 0.0  ;;  %3766 = vmatprep.subr.bf16.mxu1 %v2992_v40 }
0x1446   :  { %3767 = vmatpush3.bf16.msra.mxu1 %v2992_v40  ;;  %v3120_v50 = vpop.permute.xlu1 %3119  ;;  %v3163_v49 = vpop.permute.xlu0 %3162 }
0x1447   :  { %v2991_v45 = vpack.c.bf16 %v2983_v43, %v2982_v42  ;;  %v3172_v8 = vmul.f32 %v3163_v49, %v4149_v30  ;;  %v3125_v11 = vmul.f32 %v4969_v6, %v3120_v50 }
0x1449   :  { %3768 = vmatprep.subr.bf16.mxu1 %v2991_v45  ;;  %v3176_v15 = vadd.f32 %v3172_v8, %v3148_v9 }
0x144a   :  { %3769 = vmatpush3.bf16.msra.mxu1 %v2991_v45  ;;  %v3144_v44 = vpop.permute.xlu1 %3143  ;;  %v3105_v17 = vpop.permute.xlu0 %3104 }
0x144b   :  { %v3149_v21 = vadd.f32 %v3144_v44, %v3125_v11  ;;  %v3122_v18 = vmul.f32 %v4969_v6, %v3105_v17 }
0x144d   :  { %3771 = vmatmul.mubr.msk.bf16.vlgmr.msra.gmra.mxu1 %vm391_vm0, %v3870_v3 }
0x144e   :  { %v3168_v55 = vpop.permute.xlu1 %3167  ;;  %v3016_v61 = vpop.permute.xlu0 %3015 }
0x144f   :  { %v3173_v13 = vmul.f32 %v3168_v55, %v4149_v30 }
0x1451   :  { %v3177_v10 = vadd.f32 %v3173_v13, %v3149_v21 }
0x1452   :  { %v3110_v56 = vpop.permute.xlu1 %3109  ;;  %v3153_v54 = vpop.permute.xlu0 %3152 }
0x1453   :  { %v3123_v25 = vmul.f32 %v4969_v6, %v3110_v56  ;;  %v3170_v34 = vmul.f32 %v3153_v54, %v4149_v30 }
0x1457   :  { %v3192_v1 = vpop.permute.xlu1 %3191  ;;  %v3188_v59 = vpop.permute.xlu0 %3187 }
0x1458   :  { %v3196_v20 = vmul.f32 %v3188_v59, %v4155_v39  ;;  %v3197_v16 = vmul.f32 %v3192_v1, %v4155_v39 }
0x145a   :  { %v3200_v23 = vadd.f32 %v3196_v20, %v3176_v15  ;;  %v3201_v35 = vadd.f32 %v3197_v16, %v3177_v10 }
0x145b   :  { %v3184_v0 = vpop.permute.xlu0 %3183 }
0x145c   :  { %v3011_v53 = vpop.permute.xlu1 %3010  ;;  %v3195_v6 = vmul.f32 %v3184_v0, %v4155_v39 }
0x1460   :  { %v3129_v51 = vpop.permute.xlu1 %3128  ;;  %v3212_v14 = vpop.permute.xlu0 %3211 }
0x1461   :  { %v3220_v60 = vmul.f32 %v3212_v14, %v4153_v37  ;;  %v3146_v26 = vadd.f32 %v3129_v51, %v3122_v18 }
0x1463   :  { %v3224_v32 = vadd.f32 %v3220_v60, %v3200_v23  ;;  %v3174_v42 = vadd.f32 %v3170_v34, %v3146_v26  ;;  %v3250_v34 = vld [vmem:[%s5267_s16] sm:$0xff] }
0x1464   :  { %v3134_v29 = vpop.permute.xlu1 %3133  ;;  %v3204_v38 = vpop.permute.xlu0 %3203 }
0x1465   :  { %v3147_v12 = vadd.f32 %v3134_v29, %v3123_v25  ;;  %v3218_v56 = vmul.f32 %v3204_v38, %v4153_v37  ;;  %v3252_v25 = vld [vmem:[%s5267_s16 + $0x10] sm:$0xff] }
0x1468   :  { %v3158_v63 = vpop.permute.xlu1 %3157 }
0x1469   :  { %v3171_v27 = vmul.f32 %v3158_v63, %v4149_v30 }
0x146b   :  { %v3175_v43 = vadd.f32 %v3171_v27, %v3147_v12 }
0x146d   :  { %v3216_v58 = vpop.permute.xlu1 %3215  ;;  %v3199_v1 = vadd.f32 %v3195_v6, %v3175_v43  ;;  %v3256_v6 = vld [vmem:[%s5268_s17 + $0x10] sm:$0xff] }
0x146e   :  { %v3221_v28 = vmul.f32 %v3216_v58, %v4153_v37 }
0x1470   :  { %v3225_v45 = vadd.f32 %v3221_v28, %v3201_v35 }
0x1472   :  { %v3180_v62 = vpop.permute.xlu1 %3179 }
0x1473   :  { %v3194_v2 = vmul.f32 %v3180_v62, %v4155_v39 }
0x1475   :  { %v3198_v46 = vadd.f32 %v3194_v2, %v3174_v42  ;;  %v3253_v2 = vld [vmem:[%s5267_s16 + $0x18] sm:$0xff] }
0x1477   :  { %v3001_v4 = vpop.permute.xlu1 %3000  ;;  %v3222_v17 = vadd.f32 %v3218_v56, %v3198_v46 }
0x147b   :  { %v3006_v19 = vpop.permute.xlu1 %3005 }
0x1480   :  { %v3208_v3 = vpop.permute.xlu1 %3207 }
0x1481   :  { %v3219_v48 = vmul.f32 %v3208_v3, %v4153_v37 }
0x1483   :  { %v3223_v51 = vadd.f32 %v3219_v48, %v3199_v1  ;;  %v3255_v48 = vld [vmem:[%s5268_s17 + $0x8] sm:$0xff] }
0x150d   :  { %v3772_v22 = vpop.f32.mrf.mxu1 }
0x150e   :  { %v3077_v24 = vadd.f32 %v3772_v22, %v3011_v53 }
0x150f   :  { %v3068_v31 = vpop.f32.mrf.mxu1 }
0x1510   :  { %v3236_v33 = vadd.f32 %v3077_v24, %v4985_v47  ;;  %v3069_v44 = vadd.f32 %v3068_v31, %v3001_v4 }
0x1511   :  { %v3773_v36 = vpop.f32.mrf.mxu1 }
0x1512   :  { %v3080_v40 = vadd.f32 %v3773_v36, %v3016_v61  ;;  %v5187_v41 = vadd.f32 %v3236_v33, %v3224_v32  ;;  %v3234_v49 = vadd.f32 %v3069_v44, %v4998_v7  ;;  %v3369_v32 = vld [vmem:[%s5270_s19] sm:$0x7] }
0x1513   :  { %v3071_v50 = vpop.f32.mrf.mxu1  ;;  %v3254_v44 = vld [vmem:[%s5268_s17] sm:$0xff] }
0x1514   :  { %v3237_v47 = vadd.f32 %v3080_v40, %v4992_v57  ;;  %v3072_v30 = vadd.f32 %v3071_v50, %v3006_v19  ;;  %3262 = vadd.xlane.f32.xlu1 %v5187_v41  ;;  %v3268_v55 = vmul.f32 %v5187_v41, %v5187_v41  ;;  %v5203_v61 = vadd.f32 %v3234_v49, %v3222_v17 }
0x1515   :  { %v3986_v49 = vmov 0.0  }
0x1516   :  { %3274 = vadd.xlane.f32.xlu0 %v3268_v55  ;;  %v5196_v39 = vadd.f32 %v3237_v47, %v3225_v45  ;;  %v3235_v53 = vadd.f32 %v3072_v30, %v5004_v52  ;;  %v3266_v37 = vmul.f32 %v5203_v61, %v5203_v61  ;;  %v3251_v45 = vld [vmem:[%s5267_s16 + $0x8] sm:$0xff]  ;;  %v3257_v55 = vld [vmem:[%s5268_s17 + $0x18] sm:$0xff]  ;;  %3774 = vmatprep.subr.bf16.mxu0 %v3986_v49 }
0x1517   :  { %3778 = vmatprep.mubr.msk.bf16.mxu0 %vm3987_vm1, %v3986_v49 }
0x1518   :  { %v3269_v57 = vmul.f32 %v5196_v39, %v5196_v39  ;;  %v5205_v29 = vadd.f32 %v3235_v53, %v3223_v51 }
0x151a   :  { %3264 = vadd.xlane.f32.xlu0 %v5196_v39  ;;  %3276 = vadd.xlane.f32.xlu1 %v3269_v57  ;;  %v3267_v7 = vmul.f32 %v5205_v29, %v5205_v29 }
0x151e   :  { %3258 = vadd.xlane.f32.xlu0 %v5203_v61  ;;  %3260 = vadd.xlane.f32.xlu1 %v5205_v29 }
0x1522   :  { %3270 = vadd.xlane.f32.xlu0 %v3266_v37  ;;  %3272 = vadd.xlane.f32.xlu1 %v3267_v7 }
0x159d   :  { %v3263_v52 = vpop.xlane.xlu1 %3262 }
0x159e   :  { %v3280_v54 = vmul.f32 0.0078125, %v3263_v52 }
0x159f   :  { %v3275_v63 = vpop.xlane.xlu0 %3274 }
0x15a0   :  { %v3288_v59 = vmul.f32 %v3280_v54, %v3280_v54  ;;  %v3284_v58 = vmul.f32 0.0078125, %v3275_v63 }
0x15a2   :  { %v3292_v0 = vsub.f32 %v3284_v58, %v3288_v59 }
0x15a3   :  { %v3265_v62 = vpop.xlane.xlu0 %3264  ;;  %v3277_v4 = vpop.xlane.xlu1 %3276 }
0x15a4   :  { %v3296_v5 = vadd.f32 1e-05, %v3292_v0  ;;  %v3281_v8 = vmul.f32 0.0078125, %v3265_v62  ;;  %v3285_v20 = vmul.f32 0.0078125, %v3277_v4 }
0x15a6   :  { %3951 = vrsqrt.f32 %v3296_v5  ;;  %v3289_v11 = vmul.f32 %v3281_v8, %v3281_v8 }
0x15a7   :  { %v3259_v14 = vpop.xlane.xlu0 %3258  ;;  %v3261_v9 = vpop.xlane.xlu1 %3260 }
0x15a8   :  { %v3278_v13 = vmul.f32 0.0078125, %v3259_v14  ;;  %v3293_v21 = vsub.f32 %v3285_v20, %v3289_v11  ;;  %v3279_v19 = vmul.f32 0.0078125, %v3261_v9 }
0x15aa   :  { %v3286_v60 = vmul.f32 %v3278_v13, %v3278_v13  ;;  %v3297_v10 = vadd.f32 1e-05, %v3293_v21  ;;  %v3287_v26 = vmul.f32 %v3279_v19, %v3279_v19 }
0x15ab   :  { %v3271_v15 = vpop.xlane.xlu0 %3270  ;;  %v3273_v16 = vpop.xlane.xlu1 %3272 }
0x15ac   :  { %v3282_v18 = vmul.f32 0.0078125, %v3271_v15  ;;  %v3283_v24 = vmul.f32 0.0078125, %v3273_v16 }
0x15ae   :  { %v3290_v22 = vsub.f32 %v3282_v18, %v3286_v60  ;;  %v3291_v28 = vsub.f32 %v3283_v24, %v3287_v26 }
0x15b0   :  { %v3294_v23 = vadd.f32 1e-05, %v3290_v22  ;;  %v3295_v33 = vadd.f32 1e-05, %v3291_v28 }
0x15b2   :  { %3953 = vrsqrt.f32 %v3294_v23 }
0x15b3   :  { %v3952_v27 = vpop.eup %3951  ;;  %3955 = vrsqrt.f32 %v3297_v10 }
0x15b4   :  { %v3304_v31 = vmul.f32 %v3952_v27, %v3252_v25  ;;  %3957 = vrsqrt.f32 %v3295_v33 }
0x15b6   :  { %3326 = vperm.xlu0 %3849, %v3304_v31   ;;  %v3308_v40 = vmul.f32 %v3304_v31, %v3280_v54 }
0x15b8   :  { %v3312_v42 = vsub.f32 %v3256_v6, %v3308_v40 }
0x15ba   :  { %3372 = vperm.xlu0 %3849, %v3369_v32  }
0x15bf   :  { %v3954_v35 = vpop.eup %3953 }
0x15c0   :  { %v3302_v12 = vmul.f32 %v3954_v35, %v3250_v34  ;;  %v3956_v36 = vpop.eup %3955 }
0x15c1   :  { %v3305_v38 = vmul.f32 %v3956_v36, %v3253_v2  ;;  %v3958_v43 = vpop.eup %3957 }
0x15c2   :  { %3316 = vperm.xlu1 %3850, %v3302_v12   ;;  %v3303_v3 = vmul.f32 %v3958_v43, %v3251_v45  ;;  %v3306_v50 = vmul.f32 %v3302_v12, %v3278_v13 }
0x15c3   :  { %v3309_v30 = vmul.f32 %v3305_v38, %v3281_v8 }
0x15c4   :  { %v3310_v47 = vsub.f32 %v3254_v44, %v3306_v50  ;;  %v3307_v56 = vmul.f32 %v3303_v3, %v3279_v19 }
0x15c5   :  { %v3313_v46 = vsub.f32 %v3257_v55, %v3309_v30 }
0x15c6   :  { %3331 = vperm.xlu1 %3850, %v3305_v38   ;;  %v3311_v1 = vsub.f32 %v3255_v48, %v3307_v56 }
0x15ca   :  { %3350 = vperm.xlu1 %3850, %v3312_v42  }
0x15ce   :  { %3321 = vperm.xlu1 %3850, %v3303_v3  }
0x15d2   :  { %3340 = vperm.xlu1 %3850, %v3310_v47  }
0x15d6   :  { %3355 = vperm.xlu1 %3850, %v3313_v46  }
0x15da   :  { %3345 = vperm.xlu1 %3850, %v3311_v1  }
0x1631   :  { %v3327_v37 = vpop.permute.xlu0 %3326 }
0x1632   :  { %v3336_v52 = vmul.f32 %v3327_v37, %v5187_v41 }
0x163d   :  { %v3317_v53 = vpop.permute.xlu1 %3316 }
0x163e   :  { %v3334_v58 = vmul.f32 %v3317_v53, %v5203_v61  ;;  %v3373_v61 = vpop.permute.xlu0 %3372 }
0x1641   :  { %v3332_v57 = vpop.permute.xlu1 %3331 }
0x1642   :  { %v3337_v54 = vmul.f32 %v3332_v57, %v5196_v39  ;;  %v3366_v39 = vld [vmem:[%s5269_s18] sm:$0x3] }
0x1645   :  { %v3351_v17 = vpop.permute.xlu1 %3350 }
0x1646   :  { %v3360_v63 = vadd.f32 %v3351_v17, %v3336_v52 }
0x1648   :  { %v3364_v62 = vmax.f32 %v3360_v63, 0.0 }
0x1649   :  { %v3322_v51 = vpop.permute.xlu1 %3321 }
0x164a   :  { %v3335_v4 = vmul.f32 %v3322_v51, %v5205_v29 }
0x164d   :  { %v3341_v7 = vpop.permute.xlu1 %3340 }
0x164e   :  { %v3358_v5 = vadd.f32 %v3341_v7, %v3334_v58 }
0x1650   :  { %v3362_v13 = vmax.f32 %v3358_v5, 0.0 }
0x1651   :  { %v3356_v59 = vpop.permute.xlu1 %3355 }
0x1652   :  { %v3361_v0 = vadd.f32 %v3356_v59, %v3337_v54 }
0x1654   :  { %v3365_v8 = vmax.f32 %v3361_v0, 0.0 }
0x1655   :  { %v3346_v14 = vpop.permute.xlu1 %3345 }
0x1656   :  { %v3368_v9 = vpack.c.bf16 %v3365_v8, %v3364_v62  ;;  %v3359_v11 = vadd.f32 %v3346_v14, %v3335_v4 }
0x1658   :  { %v3363_v20 = vmax.f32 %v3359_v11, 0.0  ;;  %3775 = vmatpush3.bf16.msra.mxu0 %v3368_v9 }
0x1659   :  { %3776 = vmatprep.subr.bf16.mxu0 %v3986_v49 }
0x165a   :  { %v3367_v41 = vpack.c.bf16 %v3363_v20, %v3362_v13 }
0x165c   :  { %3777 = vmatpush3.bf16.msra.mxu0 %v3367_v41 }
0x165f   :  { %3779 = vmatmul.mubr.msk.bf16.vlgmr.msra.gmra.mxu0 %vm391_vm0, %v3366_v39 }
0x171f   :  { %v3412_v29 = vpop.f32.mrf.mxu0 }
0x1720   :  { %v3413_v15 = vadd.f32 %v3412_v29, %v3373_v61 }
0x1721   :  { %v3780_v21 = vpop.f32.mrf.mxu0 }
0x1722   :  { %3418 = vst [vmem:[#allocation4] sm:$0x7] %v3413_v15 }
0x1723   :  { %v3415_v60 = vpop.f32.mrf.mxu0 }
0x1724   :  { %3972 = shalt.err (!%p3969_p4)
}
0x1725   :  { %3428 = dma.vmem_to_hbm [thread:$0]  %s3426_s4, 64, %s5271_s20, [#allocation5]   ;;  %v3781_v18 = vpop.f32.mrf.mxu0 }
0x1726   :  { %3981 = dma.done.wait [#allocation5], 64  }
0x1727   :  { %3982 = vsyncadd [#allocation5], 4294967232 }
0x1728   :  { %3432 = vsyncpa [#allocation5], 1 }

</bundles_post_ra>
